<compile_context>
chip_gen: v6e
topology: v6e:2x2x1
jax: 0.10.0
libtpu: 0.0.40
codegen_flags: <defaults>
</compile_context>

<pallas_src>
import jax
import jax.numpy as jnp
from jax.experimental import pallas as pl
from jax.experimental.pallas import tpu as pltpu

# ----------------------------- hyperparameters ------------------------------
NUM_OBS = 48            # num_obs
NUM_T = 25              # num_timesteps (conv stack -> final length 1)
HIDDEN = 32             # hidden_dim
F_IN = NUM_OBS - 6      # mlp_in input features (train_vel_only=False)
K1, S1 = 7, 3
K2, S2 = 5, 1
K3, S3 = 3, 1
L1 = (NUM_T - K1) // S1 + 1     # 7
L2 = (L1 - K2) // S2 + 1        # 3
L3 = (L2 - K3) // S3 + 1        # 1
assert L3 == 1, "mlp_out = Linear(hidden_dim, 3) requires the conv stack to reduce time to 1"


def _elu(x):
    # PyTorch ELU(alpha=1).  Applied in f32 only.  The exp argument is clamped so
    # the (discarded) positive branch cannot overflow.
    return jnp.where(x > 0, x, jnp.exp(jnp.minimum(x, 0.0)) - 1.0)


def _round_up(x, m):
    return ((x + m - 1) // m) * m


# --------------------------------- kernel -----------------------------------
def force_estimator_kernel(obs_ref, w_in_ref, b_in_ref,
                           w1_ref, b1_ref, w2_ref, b2_ref, w3_ref, b3_ref,
                           w_out_ref, b_out_ref, out_ref):
    """One batch block, processed as a time-major 2-D slab (row r = t*TB + b).

    obs_ref:   (T, TB, NUM_OBS) bf16  (feature trim folded into w_in)
    w_in_ref:  (NUM_OBS, H) bf16      (last 6 rows zero)
    wX_ref:    (KX, H, H)   bf16      conv weights, one (H,H) matrix per tap
    bX_ref:    (1, H)       f32
    w_out_ref: (H, 3) bf16,  b_out_ref: (1, 3) f32
    out_ref:   (TB, 3) f32            one force estimate per batch element
    """
    T, TB, C = obs_ref.shape
    R1 = (T - (K1 - 1)) * TB          # 19*TB : dilated conv1 rows
    R2 = R1 - S1 * (K2 - 1) * TB      # 7*TB  : conv1 stride-3 -> taps 3*TB apart
    R3 = R2 - S1 * (K3 - 1) * TB      # TB    : exactly one row per batch element

    # (T, TB, C) -> (T*TB, C): tile-aligned collapse (TB is a multiple of 16).
    x = obs_ref[...].reshape(T * TB, C)

    # mlp_in: ONE (T*TB, 48) @ (48, 32) matmul for the whole block.
    h0 = _elu(jnp.dot(x, w_in_ref[...], preferred_element_type=jnp.float32)
              + b_in_ref[...]).astype(jnp.bfloat16)

    def conv(h, w_ref, b_ref, rows, step):
        # Per-tap MXU accumulation: acc[r] = sum_k h[r + k*step] @ w[k].
        K = w_ref.shape[0]
        acc = jnp.dot(h[:rows, :], w_ref[0], preferred_element_type=jnp.float32)
        for k in range(1, K):
            acc = acc + jnp.dot(h[k * step:k * step + rows, :], w_ref[k],
                                preferred_element_type=jnp.float32)
        return _elu(acc + b_ref[...]).astype(jnp.bfloat16)

    f1 = conv(h0, w1_ref, b1_ref, R1, TB)        # conv1 (k=7): taps TB rows apart
    f2 = conv(f1, w2_ref, b2_ref, R2, S1 * TB)   # conv2 (k=5): taps 3*TB apart (s1=3 dilation)
    f3 = conv(f2, w3_ref, b3_ref, R3, S1 * TB)   # conv3 (k=3): first TB rows are the result

    # mlp_out: (TB, 32) @ (32, 3)  -- only the valid rows, nothing else stored.
    out_ref[...] = (jnp.dot(f3, w_out_ref[...], preferred_element_type=jnp.float32)
                    + b_out_ref[...])


# -------------------------------- wrapper ------------------------------------
def force_estimator_forward(obs, params, block_b=256):
    """obs: (B, NUM_T, NUM_OBS) float32 -> (B, 3) float32.

    block_b: batch elements per grid step.  Per-generation guidance:
      v6e: 384-512 is fine (raise vmem_limit_bytes further if needed),
      v7x: keep <= ~384 and prefer batch sizes giving >= 2 blocks (2 TensorCores),
      v5e: any multiple of 16; vmem_limit_bytes below already exceeds the 16 MiB default.
    """
    B, T, C = obs.shape
    assert T == NUM_T and C == NUM_OBS
    assert block_b % 16 == 0, "block_b must be a multiple of 16"
    H = HIDDEN

    # Batch tiling: tb rows per block, tb a multiple of 16 (bf16 sublane tile).
    tb = min(block_b, _round_up(B, 16))
    n_blocks = pl.cdiv(B, tb)
    Bp = n_blocks * tb

    obs = obs.astype(jnp.bfloat16)
    if Bp != B:
        obs = jnp.concatenate(
            [obs, jnp.zeros((Bp - B, T, C), jnp.bfloat16)], axis=0)
    # Time-major: (B, T, C) -> (T, Bp, C).  One XLA transpose pass over HBM,
    # far cheaper than the in-kernel misaligned-slice work it removes.
    obs_tm = jnp.transpose(obs, (1, 0, 2))

    # Fold the "drop last 6 features" into mlp_in (zero weight rows); cast all
    # matmul operands to bf16.  Biases stay f32 (added after the f32 accumulate).
    w_in_p = jnp.concatenate(
        [params["w_in"], jnp.zeros((NUM_OBS - F_IN, H), jnp.float32)],
        axis=0).astype(jnp.bfloat16)
    w1 = params["w1"].astype(jnp.bfloat16)       # (K1, H, H)
    w2 = params["w2"].astype(jnp.bfloat16)       # (K2, H, H)
    w3 = params["w3"].astype(jnp.bfloat16)       # (K3, H, H)
    w_out = params["w_out"].astype(jnp.bfloat16)  # (H, 3)

    in_arrays = (obs_tm, w_in_p, params["b_in"], w1, params["b1"],
                 w2, params["b2"], w3, params["b3"], w_out, params["b_out"])

    def resident(a):   # whole array, VMEM-resident across grid steps
        return pl.BlockSpec(a.shape, lambda i, _nd=a.ndim: (0,) * _nd)

    in_specs = [pl.BlockSpec((T, tb, C), lambda i: (0, i, 0))]
    in_specs += [resident(a) for a in in_arrays[1:]]

    out = pl.pallas_call(
        force_estimator_kernel,
        out_shape=jax.ShapeDtypeStruct((Bp, 3), jnp.float32),
        grid=(n_blocks,),
        in_specs=in_specs,
        out_specs=pl.BlockSpec((tb, 3), lambda i: (i, 0)),
        compiler_params=pltpu.CompilerParams(
            dimension_semantics=("parallel",),
            vmem_limit_bytes=48 * 1024 * 1024),
    )(*in_arrays)

    return out[:B]


# ------------------------------ params / reference ---------------------------
def init_params(key):
    ks = jax.random.split(key, 12)

    def uni(k, shape, scale):
        return jax.random.uniform(k, shape, jnp.float32, -scale, scale)

    h = HIDDEN
    return {
        # linear weights stored (fan_in, fan_out); conv weights (K, C_in, C_out)
        "w_in": uni(ks[0], (F_IN, h), 1.0 / jnp.sqrt(F_IN)),
        "b_in": uni(ks[1], (1, h), 1.0 / jnp.sqrt(F_IN)),
        "w1": uni(ks[2], (K1, h, h), 1.0 / jnp.sqrt(K1 * h)),
        "b1": uni(ks[3], (1, h), 1.0 / jnp.sqrt(K1 * h)),
        "w2": uni(ks[4], (K2, h, h), 1.0 / jnp.sqrt(K2 * h)),
        "b2": uni(ks[5], (1, h), 1.0 / jnp.sqrt(K2 * h)),
        "w3": uni(ks[6], (K3, h, h), 1.0 / jnp.sqrt(K3 * h)),
        "b3": uni(ks[7], (1, h), 1.0 / jnp.sqrt(K3 * h)),
        "w_out": uni(ks[8], (h, 3), 1.0 / jnp.sqrt(h)),
        "b_out": uni(ks[9], (1, 3), 1.0 / jnp.sqrt(h)),
    }


def reference_forward(obs, p):
    """Plain-JAX f32 reference mirroring the PyTorch module (correctness check)."""
    x = obs[:, :, :-6].astype(jnp.float32)
    h = _elu(jnp.einsum("btf,fh->bth", x, p["w_in"]) + p["b_in"][0])     # (B,T,H)

    def conv(xt, w, bias, stride):
        K = w.shape[0]
        L = (xt.shape[1] - K) // stride + 1
        cols = []
        for t in range(L):
            acc = bias[0]
            for k in range(K):
                acc = acc + xt[:, stride * t + k, :] @ w[k]
            cols.append(acc)
        return jnp.stack(cols, axis=1)                                   # (B,L,H)

    h = _elu(conv(h, p["w1"], p["b1"], S1))
    h = _elu(conv(h, p["w2"], p["b2"], S2))
    h = _elu(conv(h, p["w3"], p["b3"], S3))
    h = h.reshape(h.shape[0], -1)                                        # (B,H), L3==1
    return h @ p["w_out"] + p["b_out"][0]


# ---------------------------------- main --------------------------------------
if __name__ == "__main__":
    params = init_params(jax.random.PRNGKey(42))

    # Small case: single grid step (batch padded 8 -> 16).
    B = 8
    obs = jax.random.normal(jax.random.PRNGKey(0), (B, NUM_T, NUM_OBS), jnp.float32)
    out = jax.block_until_ready(force_estimator_forward(obs, params))
    ref = reference_forward(obs, params)
    assert out.shape == (B, 3)
    # bf16 matmul operands -> loosened tolerance (accumulation stays in f32).
    assert jnp.allclose(out, ref, atol=5e-2, rtol=5e-2), (out, ref)

    # Multi-block case: exercises the batch grid (3 blocks) and batch padding.
    B2 = 40
    obs2 = jax.random.normal(jax.random.PRNGKey(1), (B2, NUM_T, NUM_OBS), jnp.float32)
    out2 = jax.block_until_ready(force_estimator_forward(obs2, params, block_b=16))
    ref2 = reference_forward(obs2, params)
    assert out2.shape == (B2, 3)
    assert jnp.allclose(out2, ref2, atol=5e-2, rtol=5e-2)

    print("KERNEL_OK")
</pallas_src>

<mosaic_0001>
module attributes {stable_mosaic.version = 11 : i64} {
  func.func @force_estimator_kernel(%arg0: i32, %arg1: memref<25x16x48xbf16, #tpu.memory_space<vmem>>, %arg2: memref<48x32xbf16, #tpu.memory_space<vmem>>, %arg3: memref<1x32xf32, #tpu.memory_space<vmem>>, %arg4: memref<7x32x32xbf16, #tpu.memory_space<vmem>>, %arg5: memref<1x32xf32, #tpu.memory_space<vmem>>, %arg6: memref<5x32x32xbf16, #tpu.memory_space<vmem>>, %arg7: memref<1x32xf32, #tpu.memory_space<vmem>>, %arg8: memref<3x32x32xbf16, #tpu.memory_space<vmem>>, %arg9: memref<1x32xf32, #tpu.memory_space<vmem>>, %arg10: memref<32x3xbf16, #tpu.memory_space<vmem>>, %arg11: memref<1x3xf32, #tpu.memory_space<vmem>>, %arg12: memref<16x3xf32, #tpu.memory_space<vmem>>) attributes {dimension_semantics = [#tpu.dimension_semantics<parallel>], iteration_bounds = array<i64: 1>, scalar_prefetch = 0 : i64, scratch_operands = 0 : i64, tpu.core_type = #tpu.core_type<tc>, window_params = [{transform_indices = @transform_0, window_bounds = array<i64: 25, 16, 48>}, {pipeline_mode = #tpu.pipeline_mode<synchronous>, transform_indices = @transform_1, window_bounds = array<i64: 48, 32>}, {pipeline_mode = #tpu.pipeline_mode<synchronous>, transform_indices = @transform_2, window_bounds = array<i64: 1, 32>}, {pipeline_mode = #tpu.pipeline_mode<synchronous>, transform_indices = @transform_3, window_bounds = array<i64: 7, 32, 32>}, {pipeline_mode = #tpu.pipeline_mode<synchronous>, transform_indices = @transform_4, window_bounds = array<i64: 1, 32>}, {pipeline_mode = #tpu.pipeline_mode<synchronous>, transform_indices = @transform_5, window_bounds = array<i64: 5, 32, 32>}, {pipeline_mode = #tpu.pipeline_mode<synchronous>, transform_indices = @transform_6, window_bounds = array<i64: 1, 32>}, {pipeline_mode = #tpu.pipeline_mode<synchronous>, transform_indices = @transform_7, window_bounds = array<i64: 3, 32, 32>}, {pipeline_mode = #tpu.pipeline_mode<synchronous>, transform_indices = @transform_8, window_bounds = array<i64: 1, 32>}, {pipeline_mode = #tpu.pipeline_mode<synchronous>, transform_indices = @transform_9, window_bounds = array<i64: 32, 3>}, {pipeline_mode = #tpu.pipeline_mode<synchronous>, transform_indices = @transform_10, window_bounds = array<i64: 1, 3>}, {transform_indices = @transform_11, window_bounds = array<i64: 16, 3>}]} {
    %c0 = arith.constant 0 : index
    %c0_0 = arith.constant 0 : index
    %c0_1 = arith.constant 0 : index
    %0 = vector.load %arg1[%c0, %c0_0, %c0_1] : memref<25x16x48xbf16, #tpu.memory_space<vmem>>, vector<25x16x48xbf16>
    %1 = vector.shape_cast %0 : vector<25x16x48xbf16> to vector<400x48xbf16>
    %c0_2 = arith.constant 0 : index
    %c0_3 = arith.constant 0 : index
    %2 = vector.load %arg2[%c0_2, %c0_3] : memref<48x32xbf16, #tpu.memory_space<vmem>>, vector<48x32xbf16>
    %cst = arith.constant dense<0.000000e+00> : vector<400x32xf32>
    %3 = tpu.matmul %1, %2, %cst {dimension_numbers = #tpu.dot_dimension_numbers<[1], [0], [0], [1], [0, 0, 1, 1], [], []>} : vector<400x48xbf16>, vector<48x32xbf16>, vector<400x32xf32> -> vector<400x32xf32>
    %c0_4 = arith.constant 0 : index
    %c0_5 = arith.constant 0 : index
    %4 = vector.load %arg3[%c0_4, %c0_5] : memref<1x32xf32, #tpu.memory_space<vmem>>, vector<1x32xf32>
    %5 = vector.broadcast %4 : vector<1x32xf32> to vector<400x32xf32>
    %6 = arith.addf %3, %5 : vector<400x32xf32>
    %cst_6 = arith.constant 0.000000e+00 : f32
    %7 = vector.broadcast %cst_6 : f32 to vector<400x32xf32>
    %8 = arith.cmpf ogt, %6, %7 : vector<400x32xf32>
    %cst_7 = arith.constant 0.000000e+00 : f32
    %9 = vector.broadcast %cst_7 : f32 to vector<400x32xf32>
    %10 = arith.minimumf %6, %9 : vector<400x32xf32>
    %11 = math.exp %10 : vector<400x32xf32>
    %cst_8 = arith.constant 1.000000e+00 : f32
    %12 = vector.broadcast %cst_8 : f32 to vector<400x32xf32>
    %13 = arith.subf %11, %12 : vector<400x32xf32>
    %14 = arith.select %8, %6, %13 : vector<400x32xi1>, vector<400x32xf32>
    %15 = arith.truncf %14 : vector<400x32xf32> to vector<400x32xbf16>
    %16 = vector.extract_strided_slice %15 {offsets = [0, 0], sizes = [304, 32], strides = [1, 1]} : vector<400x32xbf16> to vector<304x32xbf16>
    %c0_9 = arith.constant 0 : index
    %c0_10 = arith.constant 0 : index
    %c0_11 = arith.constant 0 : index
    %17 = vector.load %arg4[%c0_9, %c0_10, %c0_11] : memref<7x32x32xbf16, #tpu.memory_space<vmem>>, vector<1x32x32xbf16>
    %18 = vector.shape_cast %17 : vector<1x32x32xbf16> to vector<32x32xbf16>
    %cst_12 = arith.constant dense<0.000000e+00> : vector<304x32xf32>
    %19 = tpu.matmul %16, %18, %cst_12 {dimension_numbers = #tpu.dot_dimension_numbers<[1], [0], [0], [1], [0, 0, 1, 1], [], []>} : vector<304x32xbf16>, vector<32x32xbf16>, vector<304x32xf32> -> vector<304x32xf32>
    %20 = vector.extract_strided_slice %15 {offsets = [16, 0], sizes = [304, 32], strides = [1, 1]} : vector<400x32xbf16> to vector<304x32xbf16>
    %c1 = arith.constant 1 : index
    %c0_13 = arith.constant 0 : index
    %c0_14 = arith.constant 0 : index
    %21 = vector.load %arg4[%c1, %c0_13, %c0_14] : memref<7x32x32xbf16, #tpu.memory_space<vmem>>, vector<1x32x32xbf16>
    %22 = vector.shape_cast %21 : vector<1x32x32xbf16> to vector<32x32xbf16>
    %cst_15 = arith.constant dense<0.000000e+00> : vector<304x32xf32>
    %23 = tpu.matmul %20, %22, %cst_15 {dimension_numbers = #tpu.dot_dimension_numbers<[1], [0], [0], [1], [0, 0, 1, 1], [], []>} : vector<304x32xbf16>, vector<32x32xbf16>, vector<304x32xf32> -> vector<304x32xf32>
    %24 = arith.addf %19, %23 : vector<304x32xf32>
    %25 = vector.extract_strided_slice %15 {offsets = [32, 0], sizes = [304, 32], strides = [1, 1]} : vector<400x32xbf16> to vector<304x32xbf16>
    %c2 = arith.constant 2 : index
    %c0_16 = arith.constant 0 : index
    %c0_17 = arith.constant 0 : index
    %26 = vector.load %arg4[%c2, %c0_16, %c0_17] : memref<7x32x32xbf16, #tpu.memory_space<vmem>>, vector<1x32x32xbf16>
    %27 = vector.shape_cast %26 : vector<1x32x32xbf16> to vector<32x32xbf16>
    %cst_18 = arith.constant dense<0.000000e+00> : vector<304x32xf32>
    %28 = tpu.matmul %25, %27, %cst_18 {dimension_numbers = #tpu.dot_dimension_numbers<[1], [0], [0], [1], [0, 0, 1, 1], [], []>} : vector<304x32xbf16>, vector<32x32xbf16>, vector<304x32xf32> -> vector<304x32xf32>
    %29 = arith.addf %24, %28 : vector<304x32xf32>
    %30 = vector.extract_strided_slice %15 {offsets = [48, 0], sizes = [304, 32], strides = [1, 1]} : vector<400x32xbf16> to vector<304x32xbf16>
    %c3 = arith.constant 3 : index
    %c0_19 = arith.constant 0 : index
    %c0_20 = arith.constant 0 : index
    %31 = vector.load %arg4[%c3, %c0_19, %c0_20] : memref<7x32x32xbf16, #tpu.memory_space<vmem>>, vector<1x32x32xbf16>
    %32 = vector.shape_cast %31 : vector<1x32x32xbf16> to vector<32x32xbf16>
    %cst_21 = arith.constant dense<0.000000e+00> : vector<304x32xf32>
    %33 = tpu.matmul %30, %32, %cst_21 {dimension_numbers = #tpu.dot_dimension_numbers<[1], [0], [0], [1], [0, 0, 1, 1], [], []>} : vector<304x32xbf16>, vector<32x32xbf16>, vector<304x32xf32> -> vector<304x32xf32>
    %34 = arith.addf %29, %33 : vector<304x32xf32>
    %35 = vector.extract_strided_slice %15 {offsets = [64, 0], sizes = [304, 32], strides = [1, 1]} : vector<400x32xbf16> to vector<304x32xbf16>
    %c4 = arith.constant 4 : index
    %c0_22 = arith.constant 0 : index
    %c0_23 = arith.constant 0 : index
    %36 = vector.load %arg4[%c4, %c0_22, %c0_23] : memref<7x32x32xbf16, #tpu.memory_space<vmem>>, vector<1x32x32xbf16>
    %37 = vector.shape_cast %36 : vector<1x32x32xbf16> to vector<32x32xbf16>
    %cst_24 = arith.constant dense<0.000000e+00> : vector<304x32xf32>
    %38 = tpu.matmul %35, %37, %cst_24 {dimension_numbers = #tpu.dot_dimension_numbers<[1], [0], [0], [1], [0, 0, 1, 1], [], []>} : vector<304x32xbf16>, vector<32x32xbf16>, vector<304x32xf32> -> vector<304x32xf32>
    %39 = arith.addf %34, %38 : vector<304x32xf32>
    %40 = vector.extract_strided_slice %15 {offsets = [80, 0], sizes = [304, 32], strides = [1, 1]} : vector<400x32xbf16> to vector<304x32xbf16>
    %c5 = arith.constant 5 : index
    %c0_25 = arith.constant 0 : index
    %c0_26 = arith.constant 0 : index
    %41 = vector.load %arg4[%c5, %c0_25, %c0_26] : memref<7x32x32xbf16, #tpu.memory_space<vmem>>, vector<1x32x32xbf16>
    %42 = vector.shape_cast %41 : vector<1x32x32xbf16> to vector<32x32xbf16>
    %cst_27 = arith.constant dense<0.000000e+00> : vector<304x32xf32>
    %43 = tpu.matmul %40, %42, %cst_27 {dimension_numbers = #tpu.dot_dimension_numbers<[1], [0], [0], [1], [0, 0, 1, 1], [], []>} : vector<304x32xbf16>, vector<32x32xbf16>, vector<304x32xf32> -> vector<304x32xf32>
    %44 = arith.addf %39, %43 : vector<304x32xf32>
    %45 = vector.extract_strided_slice %15 {offsets = [96, 0], sizes = [304, 32], strides = [1, 1]} : vector<400x32xbf16> to vector<304x32xbf16>
    %c6 = arith.constant 6 : index
    %c0_28 = arith.constant 0 : index
    %c0_29 = arith.constant 0 : index
    %46 = vector.load %arg4[%c6, %c0_28, %c0_29] : memref<7x32x32xbf16, #tpu.memory_space<vmem>>, vector<1x32x32xbf16>
    %47 = vector.shape_cast %46 : vector<1x32x32xbf16> to vector<32x32xbf16>
    %cst_30 = arith.constant dense<0.000000e+00> : vector<304x32xf32>
    %48 = tpu.matmul %45, %47, %cst_30 {dimension_numbers = #tpu.dot_dimension_numbers<[1], [0], [0], [1], [0, 0, 1, 1], [], []>} : vector<304x32xbf16>, vector<32x32xbf16>, vector<304x32xf32> -> vector<304x32xf32>
    %49 = arith.addf %44, %48 : vector<304x32xf32>
    %c0_31 = arith.constant 0 : index
    %c0_32 = arith.constant 0 : index
    %50 = vector.load %arg5[%c0_31, %c0_32] : memref<1x32xf32, #tpu.memory_space<vmem>>, vector<1x32xf32>
    %51 = vector.broadcast %50 : vector<1x32xf32> to vector<304x32xf32>
    %52 = arith.addf %49, %51 : vector<304x32xf32>
    %cst_33 = arith.constant 0.000000e+00 : f32
    %53 = vector.broadcast %cst_33 : f32 to vector<304x32xf32>
    %54 = arith.cmpf ogt, %52, %53 : vector<304x32xf32>
    %cst_34 = arith.constant 0.000000e+00 : f32
    %55 = vector.broadcast %cst_34 : f32 to vector<304x32xf32>
    %56 = arith.minimumf %52, %55 : vector<304x32xf32>
    %57 = math.exp %56 : vector<304x32xf32>
    %cst_35 = arith.constant 1.000000e+00 : f32
    %58 = vector.broadcast %cst_35 : f32 to vector<304x32xf32>
    %59 = arith.subf %57, %58 : vector<304x32xf32>
    %60 = arith.select %54, %52, %59 : vector<304x32xi1>, vector<304x32xf32>
    %61 = arith.truncf %60 : vector<304x32xf32> to vector<304x32xbf16>
    %62 = vector.extract_strided_slice %61 {offsets = [0, 0], sizes = [112, 32], strides = [1, 1]} : vector<304x32xbf16> to vector<112x32xbf16>
    %c0_36 = arith.constant 0 : index
    %c0_37 = arith.constant 0 : index
    %c0_38 = arith.constant 0 : index
    %63 = vector.load %arg6[%c0_36, %c0_37, %c0_38] : memref<5x32x32xbf16, #tpu.memory_space<vmem>>, vector<1x32x32xbf16>
    %64 = vector.shape_cast %63 : vector<1x32x32xbf16> to vector<32x32xbf16>
    %cst_39 = arith.constant dense<0.000000e+00> : vector<112x32xf32>
    %65 = tpu.matmul %62, %64, %cst_39 {dimension_numbers = #tpu.dot_dimension_numbers<[1], [0], [0], [1], [0, 0, 1, 1], [], []>} : vector<112x32xbf16>, vector<32x32xbf16>, vector<112x32xf32> -> vector<112x32xf32>
    %66 = vector.extract_strided_slice %61 {offsets = [48, 0], sizes = [112, 32], strides = [1, 1]} : vector<304x32xbf16> to vector<112x32xbf16>
    %c1_40 = arith.constant 1 : index
    %c0_41 = arith.constant 0 : index
    %c0_42 = arith.constant 0 : index
    %67 = vector.load %arg6[%c1_40, %c0_41, %c0_42] : memref<5x32x32xbf16, #tpu.memory_space<vmem>>, vector<1x32x32xbf16>
    %68 = vector.shape_cast %67 : vector<1x32x32xbf16> to vector<32x32xbf16>
    %cst_43 = arith.constant dense<0.000000e+00> : vector<112x32xf32>
    %69 = tpu.matmul %66, %68, %cst_43 {dimension_numbers = #tpu.dot_dimension_numbers<[1], [0], [0], [1], [0, 0, 1, 1], [], []>} : vector<112x32xbf16>, vector<32x32xbf16>, vector<112x32xf32> -> vector<112x32xf32>
    %70 = arith.addf %65, %69 : vector<112x32xf32>
    %71 = vector.extract_strided_slice %61 {offsets = [96, 0], sizes = [112, 32], strides = [1, 1]} : vector<304x32xbf16> to vector<112x32xbf16>
    %c2_44 = arith.constant 2 : index
    %c0_45 = arith.constant 0 : index
    %c0_46 = arith.constant 0 : index
    %72 = vector.load %arg6[%c2_44, %c0_45, %c0_46] : memref<5x32x32xbf16, #tpu.memory_space<vmem>>, vector<1x32x32xbf16>
    %73 = vector.shape_cast %72 : vector<1x32x32xbf16> to vector<32x32xbf16>
    %cst_47 = arith.constant dense<0.000000e+00> : vector<112x32xf32>
    %74 = tpu.matmul %71, %73, %cst_47 {dimension_numbers = #tpu.dot_dimension_numbers<[1], [0], [0], [1], [0, 0, 1, 1], [], []>} : vector<112x32xbf16>, vector<32x32xbf16>, vector<112x32xf32> -> vector<112x32xf32>
    %75 = arith.addf %70, %74 : vector<112x32xf32>
    %76 = vector.extract_strided_slice %61 {offsets = [144, 0], sizes = [112, 32], strides = [1, 1]} : vector<304x32xbf16> to vector<112x32xbf16>
    %c3_48 = arith.constant 3 : index
    %c0_49 = arith.constant 0 : index
    %c0_50 = arith.constant 0 : index
    %77 = vector.load %arg6[%c3_48, %c0_49, %c0_50] : memref<5x32x32xbf16, #tpu.memory_space<vmem>>, vector<1x32x32xbf16>
    %78 = vector.shape_cast %77 : vector<1x32x32xbf16> to vector<32x32xbf16>
    %cst_51 = arith.constant dense<0.000000e+00> : vector<112x32xf32>
    %79 = tpu.matmul %76, %78, %cst_51 {dimension_numbers = #tpu.dot_dimension_numbers<[1], [0], [0], [1], [0, 0, 1, 1], [], []>} : vector<112x32xbf16>, vector<32x32xbf16>, vector<112x32xf32> -> vector<112x32xf32>
    %80 = arith.addf %75, %79 : vector<112x32xf32>
    %81 = vector.extract_strided_slice %61 {offsets = [192, 0], sizes = [112, 32], strides = [1, 1]} : vector<304x32xbf16> to vector<112x32xbf16>
    %c4_52 = arith.constant 4 : index
    %c0_53 = arith.constant 0 : index
    %c0_54 = arith.constant 0 : index
    %82 = vector.load %arg6[%c4_52, %c0_53, %c0_54] : memref<5x32x32xbf16, #tpu.memory_space<vmem>>, vector<1x32x32xbf16>
    %83 = vector.shape_cast %82 : vector<1x32x32xbf16> to vector<32x32xbf16>
    %cst_55 = arith.constant dense<0.000000e+00> : vector<112x32xf32>
    %84 = tpu.matmul %81, %83, %cst_55 {dimension_numbers = #tpu.dot_dimension_numbers<[1], [0], [0], [1], [0, 0, 1, 1], [], []>} : vector<112x32xbf16>, vector<32x32xbf16>, vector<112x32xf32> -> vector<112x32xf32>
    %85 = arith.addf %80, %84 : vector<112x32xf32>
    %c0_56 = arith.constant 0 : index
    %c0_57 = arith.constant 0 : index
    %86 = vector.load %arg7[%c0_56, %c0_57] : memref<1x32xf32, #tpu.memory_space<vmem>>, vector<1x32xf32>
    %87 = vector.broadcast %86 : vector<1x32xf32> to vector<112x32xf32>
    %88 = arith.addf %85, %87 : vector<112x32xf32>
    %cst_58 = arith.constant 0.000000e+00 : f32
    %89 = vector.broadcast %cst_58 : f32 to vector<112x32xf32>
    %90 = arith.cmpf ogt, %88, %89 : vector<112x32xf32>
    %cst_59 = arith.constant 0.000000e+00 : f32
    %91 = vector.broadcast %cst_59 : f32 to vector<112x32xf32>
    %92 = arith.minimumf %88, %91 : vector<112x32xf32>
    %93 = math.exp %92 : vector<112x32xf32>
    %cst_60 = arith.constant 1.000000e+00 : f32
    %94 = vector.broadcast %cst_60 : f32 to vector<112x32xf32>
    %95 = arith.subf %93, %94 : vector<112x32xf32>
    %96 = arith.select %90, %88, %95 : vector<112x32xi1>, vector<112x32xf32>
    %97 = arith.truncf %96 : vector<112x32xf32> to vector<112x32xbf16>
    %98 = vector.extract_strided_slice %97 {offsets = [0, 0], sizes = [16, 32], strides = [1, 1]} : vector<112x32xbf16> to vector<16x32xbf16>
    %c0_61 = arith.constant 0 : index
    %c0_62 = arith.constant 0 : index
    %c0_63 = arith.constant 0 : index
    %99 = vector.load %arg8[%c0_61, %c0_62, %c0_63] : memref<3x32x32xbf16, #tpu.memory_space<vmem>>, vector<1x32x32xbf16>
    %100 = vector.shape_cast %99 : vector<1x32x32xbf16> to vector<32x32xbf16>
    %cst_64 = arith.constant dense<0.000000e+00> : vector<16x32xf32>
    %101 = tpu.matmul %98, %100, %cst_64 {dimension_numbers = #tpu.dot_dimension_numbers<[1], [0], [0], [1], [0, 0, 1, 1], [], []>} : vector<16x32xbf16>, vector<32x32xbf16>, vector<16x32xf32> -> vector<16x32xf32>
    %102 = vector.extract_strided_slice %97 {offsets = [48, 0], sizes = [16, 32], strides = [1, 1]} : vector<112x32xbf16> to vector<16x32xbf16>
    %c1_65 = arith.constant 1 : index
    %c0_66 = arith.constant 0 : index
    %c0_67 = arith.constant 0 : index
    %103 = vector.load %arg8[%c1_65, %c0_66, %c0_67] : memref<3x32x32xbf16, #tpu.memory_space<vmem>>, vector<1x32x32xbf16>
    %104 = vector.shape_cast %103 : vector<1x32x32xbf16> to vector<32x32xbf16>
    %cst_68 = arith.constant dense<0.000000e+00> : vector<16x32xf32>
    %105 = tpu.matmul %102, %104, %cst_68 {dimension_numbers = #tpu.dot_dimension_numbers<[1], [0], [0], [1], [0, 0, 1, 1], [], []>} : vector<16x32xbf16>, vector<32x32xbf16>, vector<16x32xf32> -> vector<16x32xf32>
    %106 = arith.addf %101, %105 : vector<16x32xf32>
    %107 = vector.extract_strided_slice %97 {offsets = [96, 0], sizes = [16, 32], strides = [1, 1]} : vector<112x32xbf16> to vector<16x32xbf16>
    %c2_69 = arith.constant 2 : index
    %c0_70 = arith.constant 0 : index
    %c0_71 = arith.constant 0 : index
    %108 = vector.load %arg8[%c2_69, %c0_70, %c0_71] : memref<3x32x32xbf16, #tpu.memory_space<vmem>>, vector<1x32x32xbf16>
    %109 = vector.shape_cast %108 : vector<1x32x32xbf16> to vector<32x32xbf16>
    %cst_72 = arith.constant dense<0.000000e+00> : vector<16x32xf32>
    %110 = tpu.matmul %107, %109, %cst_72 {dimension_numbers = #tpu.dot_dimension_numbers<[1], [0], [0], [1], [0, 0, 1, 1], [], []>} : vector<16x32xbf16>, vector<32x32xbf16>, vector<16x32xf32> -> vector<16x32xf32>
    %111 = arith.addf %106, %110 : vector<16x32xf32>
    %c0_73 = arith.constant 0 : index
    %c0_74 = arith.constant 0 : index
    %112 = vector.load %arg9[%c0_73, %c0_74] : memref<1x32xf32, #tpu.memory_space<vmem>>, vector<1x32xf32>
    %113 = vector.broadcast %112 : vector<1x32xf32> to vector<16x32xf32>
    %114 = arith.addf %111, %113 : vector<16x32xf32>
    %cst_75 = arith.constant 0.000000e+00 : f32
    %115 = vector.broadcast %cst_75 : f32 to vector<16x32xf32>
    %116 = arith.cmpf ogt, %114, %115 : vector<16x32xf32>
    %cst_76 = arith.constant 0.000000e+00 : f32
    %117 = vector.broadcast %cst_76 : f32 to vector<16x32xf32>
    %118 = arith.minimumf %114, %117 : vector<16x32xf32>
    %119 = math.exp %118 : vector<16x32xf32>
    %cst_77 = arith.constant 1.000000e+00 : f32
    %120 = vector.broadcast %cst_77 : f32 to vector<16x32xf32>
    %121 = arith.subf %119, %120 : vector<16x32xf32>
    %122 = arith.select %116, %114, %121 : vector<16x32xi1>, vector<16x32xf32>
    %123 = arith.truncf %122 : vector<16x32xf32> to vector<16x32xbf16>
    %c0_78 = arith.constant 0 : index
    %c0_79 = arith.constant 0 : index
    %124 = vector.load %arg10[%c0_78, %c0_79] : memref<32x3xbf16, #tpu.memory_space<vmem>>, vector<32x3xbf16>
    %cst_80 = arith.constant dense<0.000000e+00> : vector<16x3xf32>
    %125 = tpu.matmul %123, %124, %cst_80 {dimension_numbers = #tpu.dot_dimension_numbers<[1], [0], [0], [1], [0, 0, 1, 1], [], []>} : vector<16x32xbf16>, vector<32x3xbf16>, vector<16x3xf32> -> vector<16x3xf32>
    %c0_81 = arith.constant 0 : index
    %c0_82 = arith.constant 0 : index
    %126 = vector.load %arg11[%c0_81, %c0_82] : memref<1x3xf32, #tpu.memory_space<vmem>>, vector<1x3xf32>
    %127 = vector.broadcast %126 : vector<1x3xf32> to vector<16x3xf32>
    %128 = arith.addf %125, %127 : vector<16x3xf32>
    %c0_83 = arith.constant 0 : index
    %c0_84 = arith.constant 0 : index
    %129 = vector.load %arg12[%c0_83, %c0_84] : memref<16x3xf32, #tpu.memory_space<vmem>>, vector<16x3xf32>
    tpu.vector_store %arg12[%c0_83, %c0_84], %128 {strides = array<i32>} : memref<16x3xf32, #tpu.memory_space<vmem>>, vector<16x3xf32>,
    return
  }
  func.func @transform_0(%arg0: i32) -> (i32, i32, i32) {
    %c0_i32 = arith.constant 0 : i32
    %c0_i32_0 = arith.constant 0 : i32
    %c0_i32_1 = arith.constant 0 : i32
    return %c0_i32, %arg0, %c0_i32_0 : i32, i32, i32
  }
  func.func @transform_1(%arg0: i32) -> (i32, i32) {
    %c0_i32 = arith.constant 0 : i32
    %c0_i32_0 = arith.constant 0 : i32
    %c0_i32_1 = arith.constant 0 : i32
    return %c0_i32, %c0_i32_0 : i32, i32
  }
  func.func @transform_2(%arg0: i32) -> (i32, i32) {
    %c0_i32 = arith.constant 0 : i32
    %c0_i32_0 = arith.constant 0 : i32
    %c0_i32_1 = arith.constant 0 : i32
    return %c0_i32, %c0_i32_0 : i32, i32
  }
  func.func @transform_3(%arg0: i32) -> (i32, i32, i32) {
    %c0_i32 = arith.constant 0 : i32
    %c0_i32_0 = arith.constant 0 : i32
    %c0_i32_1 = arith.constant 0 : i32
    %c0_i32_2 = arith.constant 0 : i32
    return %c0_i32, %c0_i32_0, %c0_i32_1 : i32, i32, i32
  }
  func.func @transform_4(%arg0: i32) -> (i32, i32) {
    %c0_i32 = arith.constant 0 : i32
    %c0_i32_0 = arith.constant 0 : i32
    %c0_i32_1 = arith.constant 0 : i32
    return %c0_i32, %c0_i32_0 : i32, i32
  }
  func.func @transform_5(%arg0: i32) -> (i32, i32, i32) {
    %c0_i32 = arith.constant 0 : i32
    %c0_i32_0 = arith.constant 0 : i32
    %c0_i32_1 = arith.constant 0 : i32
    %c0_i32_2 = arith.constant 0 : i32
    return %c0_i32, %c0_i32_0, %c0_i32_1 : i32, i32, i32
  }
  func.func @transform_6(%arg0: i32) -> (i32, i32) {
    %c0_i32 = arith.constant 0 : i32
    %c0_i32_0 = arith.constant 0 : i32
    %c0_i32_1 = arith.constant 0 : i32
    return %c0_i32, %c0_i32_0 : i32, i32
  }
  func.func @transform_7(%arg0: i32) -> (i32, i32, i32) {
    %c0_i32 = arith.constant 0 : i32
    %c0_i32_0 = arith.constant 0 : i32
    %c0_i32_1 = arith.constant 0 : i32
    %c0_i32_2 = arith.constant 0 : i32
    return %c0_i32, %c0_i32_0, %c0_i32_1 : i32, i32, i32
  }
  func.func @transform_8(%arg0: i32) -> (i32, i32) {
    %c0_i32 = arith.constant 0 : i32
    %c0_i32_0 = arith.constant 0 : i32
    %c0_i32_1 = arith.constant 0 : i32
    return %c0_i32, %c0_i32_0 : i32, i32
  }
  func.func @transform_9(%arg0: i32) -> (i32, i32) {
    %c0_i32 = arith.constant 0 : i32
    %c0_i32_0 = arith.constant 0 : i32
    %c0_i32_1 = arith.constant 0 : i32
    return %c0_i32, %c0_i32_0 : i32, i32
  }
  func.func @transform_10(%arg0: i32) -> (i32, i32) {
    %c0_i32 = arith.constant 0 : i32
    %c0_i32_0 = arith.constant 0 : i32
    %c0_i32_1 = arith.constant 0 : i32
    return %c0_i32, %c0_i32_0 : i32, i32
  }
  func.func @transform_11(%arg0: i32) -> (i32, i32) {
    %c0_i32 = arith.constant 0 : i32
    %c0_i32_0 = arith.constant 0 : i32
    return %arg0, %c0_i32 : i32, i32
  }
}

</mosaic_0001>

<bundles_post_ra>
// kernel: tpu_custom_call.1
= control target key start
LH: loop header
LB: loop body
LE: loop exit
PB: predicated region body
PF: predicated region fallthrough
CT: control target
= control target key end

     0   :  { %16 = vsyncpa [#allocation3], 0  ;;  %s7761_s0 = inlined_call_operand.hbm [shape: bf16[25,16,48], index: 0, kind: input, shape index: {}]   ;;  %s7762_s1 = inlined_call_operand.vmem [shape: bf16[48,32], index: 1, kind: input, shape index: {}]   ;;  %s7763_s2 = inlined_call_operand.vmem [shape: f32[1,32], index: 2, kind: input, shape index: {}]   ;;  %s7764_s3 = inlined_call_operand.hbm [shape: bf16[7,32,32], index: 3, kind: input, shape index: {}]   ;;  %s7765_s4 = inlined_call_operand.vmem [shape: f32[1,32], index: 4, kind: input, shape index: {}]   ;;  %s7766_s5 = inlined_call_operand.hbm [shape: bf16[5,32,32], index: 5, kind: input, shape index: {}]   ;;  %s7767_s6 = inlined_call_operand.vmem [shape: f32[1,32], index: 6, kind: input, shape index: {}]   ;;  %s7768_s7 = inlined_call_operand.vmem [shape: bf16[3,32,32], index: 7, kind: input, shape index: {}]   ;;  %s7769_s8 = inlined_call_operand.vmem [shape: f32[1,32], index: 8, kind: input, shape index: {}]   ;;  %s7770_s9 = inlined_call_operand.vmem [shape: bf16[32,3], index: 9, kind: input, shape index: {}]   ;;  %s7771_s10 = inlined_call_operand.vmem [shape: f32[1,3], index: 10, kind: input, shape index: {}]   ;;  %s7772_s11 = inlined_call_operand.vmem [shape: f32[16,3], index: 11, kind: output, shape index: {}]  }
   0x1   :  { %17 = vsyncpa [#allocation5], 0  ;;  %s5570_s17 = smov [#allocation4]   ;;  %s5571_s19 = smov [#allocation2]  }
   0x2   :  { %s39_s18 = sshll.u32 %s5570_s17, 4  ;;  %s23_s20 = sshll.u32 %s5571_s19, 4  ;;  %s40_s18 = int_to_ptr.vmem [resolvable:$true] %s39_s18  ;;  %s24_s20 = int_to_ptr.vmem [resolvable:$true] %s23_s20 }
   0x3   :  { %s5514_s21 = scalar_lea.vmem %s40_s18, 1792  ;;  %p5519_p1 = scmp.lt.s32.totalorder %s40_s18, %s40_s18 }
   0x4   :  { %p5515_p0 = scmp.ne.s32.totalorder %s40_s18, %s5514_s21  ;;  %p5520_p2 = scmp.lt.s32.totalorder %s5514_s21, %s5514_s21 }
   0x6   :  { %p5521_p3 = por %p5520_p2, %p5519_p1 }
   0x8   :  { %p5522_p4 = pnand %p5521_p3, %p5515_p0 }
   0xa   :  { %5525 = shalt.err (!%p5522_p4)
}
   0xb   :  { %s5572_s22 = smov 64   ;;  %s5573_s23 = smov 4  }
   0xc   :  { %45 = dma.hbm_to_vmem [thread:$0]  %s7764_s3, 1792, %s40_s18, [#allocation5], %s5572_s22, %s5572_s22, %s5573_s23  }
   0xd   :  { %s5534_s26 = scalar_lea.vmem %s24_s20, 3200  ;;  %p5539_p6 = scmp.lt.s32.totalorder %s24_s20, %s24_s20 }
   0xe   :  { %p5535_p5 = scmp.ne.s32.totalorder %s24_s20, %s5534_s26  ;;  %p5540_p7 = scmp.lt.s32.totalorder %s5534_s26, %s5534_s26 }
  0x10   :  { %p5541_p8 = por %p5540_p7, %p5539_p6 }
  0x12   :  { %p5542_p9 = pnand %p5541_p8, %p5535_p5 }
  0x14   :  { %5545 = shalt.err (!%p5542_p9)
}
  0x15   :  { %29 = dma.hbm_to_vmem [thread:$0]  %s7761_s0, 3200, %s24_s20, [#allocation3], %s5572_s22, %s5572_s22, %s5573_s23  }
  0x16   :  { %s5574_s29 = smov [#allocation6]  }
  0x17   :  { %s53_s30 = sshll.u32 %s5574_s29, 4  ;;  %s54_s30 = int_to_ptr.vmem [resolvable:$true] %s53_s30 }
  0x18   :  { %s5554_s12 = scalar_lea.vmem %s54_s30, 1280  ;;  %p5559_p11 = scmp.lt.s32.totalorder %s54_s30, %s54_s30 }
  0x19   :  { %p5555_p10 = scmp.ne.s32.totalorder %s54_s30, %s5554_s12  ;;  %p5560_p12 = scmp.lt.s32.totalorder %s5554_s12, %s5554_s12 }
  0x1b   :  { %p5561_p13 = por %p5560_p12, %p5559_p11 }
  0x1d   :  { %p5562_p0 = pnand %p5561_p13, %p5555_p10 }
  0x1f   :  { %5565 = shalt.err (!%p5562_p0)
}
  0x20   :  { %59 = dma.hbm_to_vmem [thread:$0]  %s7766_s5, 1280, %s54_s30, [#allocation5], %s5572_s22, %s5572_s22, %s5573_s23  }
  0x21   :  { %5566 = dma.done.wait [#allocation3], 3200  }
  0x22   :  { %5567 = vsyncadd [#allocation3], 4294964096 }
  0x23   :  { %5568 = dma.done.wait [#allocation5], 3072  }
  0x24   :  { %5569 = vsyncadd [#allocation5], 4294964224  ;;  %v7775_v0 = vmov 0.0   ;;  %vm5576_vm0 = vmmov 0   ;;  %v5252_v1 = vld [vmem:[%s7762_s1 + $0x10] sm:$0xff]   ;;  %v5253_v2 = vld [vmem:[%s7762_s1 + $0x8] sm:$0xff]  }
  0x25   :  { %4387 = vmatprep.subr.bf16.mxu0 %v7775_v0  ;;  %4393 = vmatprep.mubr.msk.bf16.mxu0 %vm5576_vm0, %v7775_v0  ;;  %v5254_v3 = vld [vmem:[%s7762_s1] sm:$0xff]   ;;  %vm286_vm1 = vcmask 392192   ;;  %v5256_v5 = vld [vmem:[#allocation2 + $0x8] sm:$0xff]   ;;  %v5257_v6 = vld [vmem:[#allocation2 + $0x10] sm:$0xff]   ;;  %vm941_vm6 = vcmask 261120  }
  0x26   :  { %4493 = vmatprep.subr.bf16.mxu1 %v7775_v0  ;;  %4497 = vmatprep.mubr.msk.bf16.mxu1 %vm5576_vm0, %v7775_v0  ;;  %v5255_v4 = vld [vmem:[#allocation2] sm:$0xff]   ;;  %v5258_v7 = vld [vmem:[#allocation2 + $0x18] sm:$0xff]   ;;  %v5276_v9 = vld [vmem:[#allocation4 + $0x28] sm:$0xff]  }
  0x27   :  { %4388 = vmatpush3.bf16.msra.mxu0 %v5252_v1  ;;  %v5259_v8 = vld [vmem:[#allocation2 + $0x20] sm:$0xff]   ;;  %v5260_v10 = vld [vmem:[#allocation2 + $0x28] sm:$0xff]   ;;  %v5261_v11 = vld [vmem:[#allocation2 + $0x30] sm:$0xff]  }
  0x28   :  { %4389 = vmatprep.subr.bf16.mxu0 %v7775_v0  ;;  %v5262_v12 = vld [vmem:[#allocation2 + $0x38] sm:$0xff]   ;;  %v5263_v13 = vld [vmem:[#allocation2 + $0x40] sm:$0xff]   ;;  %v5264_v14 = vld [vmem:[#allocation2 + $0x48] sm:$0xff]  }
  0x29   :  { %v5265_v15 = vld [vmem:[#allocation2 + $0x50] sm:$0xff]   ;;  %v5266_v16 = vld [vmem:[#allocation2 + $0x58] sm:$0xff]   ;;  %v5267_v17 = vld [vmem:[#allocation2 + $0x60] sm:$0xff]  }
  0x2a   :  { %v5280_v18 = vld [vmem:[#allocation4 + $0x18] sm:$0xff]   ;;  %v5281_v19 = vld [vmem:[#allocation4 + $0x10] sm:$0xff]   ;;  %v5268_v20 = vld [vmem:[#allocation2 + $0x68] sm:$0xff]  }
  0x2b   :  { %4390 = vmatpush3.bf16.msra.mxu0 %v5253_v2  ;;  %4494 = vmatpush3.bf16.msra.mxu1 %v5280_v18  ;;  %v5284_v21 = vld [vmem:[#allocation4 + $0x20] sm:$0xff]   ;;  %v5269_v22 = vld [vmem:[#allocation2 + $0x70] sm:$0xff]   ;;  %v5270_v23 = vld [vmem:[#allocation2 + $0x78] sm:$0xff]  }
  0x2c   :  { %4391 = vmatprep.subr.bf16.mxu0 %v7775_v0  ;;  %4495 = vmatprep.subr.bf16.mxu1 %v7775_v0  ;;  %v5271_v24 = vld [vmem:[#allocation2 + $0x80] sm:$0xff]   ;;  %v5272_v25 = vld [vmem:[#allocation2 + $0x88] sm:$0xff]   ;;  %v5273_v26 = vld [vmem:[#allocation2 + $0x90] sm:$0xff]  }
  0x2d   :  { %v5274_v27 = vld [vmem:[#allocation2 + $0x98] sm:$0xff]   ;;  %v5275_v28 = vld [vmem:[#allocation2 + $0xa0] sm:$0xff]   ;;  %v5277_v29 = vld [vmem:[#allocation2 + $0xa8] sm:$0xff]  }
  0x2e   :  { %v5278_v30 = vld [vmem:[#allocation2 + $0xb0] sm:$0xff]   ;;  %v5279_v31 = vld [vmem:[#allocation2 + $0xb8] sm:$0xff]   ;;  %v5282_v32 = vld [vmem:[#allocation2 + $0xc0] sm:$0xff]  }
  0x2f   :  { %4392 = vmatpush3.bf16.msra.mxu0 %v5254_v3  ;;  %4496 = vmatpush3.bf16.msra.mxu1 %v5281_v19  ;;  %v5743_v33 = vld [vmem:[%s7763_s2] ss:$0 sm:$0xff] }
  0x30   :  { %4653 = vmatprep.subr.bf16.mxu0 %v7775_v0  ;;  %4573 = vmatprep.subr.bf16.mxu1 %v7775_v0 }
  0x32   :  { %4394 = vmatmul.mubr.msk.bf16.vlgmr.msra.gmra.mxu0 %vm286_vm1, %v5255_v4 }
  0x33   :  { %4397 = vmatprep.mubr.msk.bf16.mxu0 %vm5576_vm0, %v7775_v0  ;;  %4654 = vmatpush3.bf16.msra.mxu0 %v5276_v9 }
  0x34   :  { %4655 = vmatprep.subr.bf16.mxu0 %v7775_v0 }
  0x37   :  { %4656 = vmatpush3.bf16.msra.mxu0 %v5284_v21 }
  0x38   :  { %4813 = vmatprep.subr.bf16.mxu0 %v7775_v0 }
  0x3a   :  { %4398 = vmatmul.mubr.msk.bf16.gmra.mxu0 %vm286_vm1, %v5256_v5 }
  0x3b   :  { %4401 = vmatprep.mubr.msk.bf16.mxu0 %vm5576_vm0, %v7775_v0 }
  0x42   :  { %4402 = vmatmul.mubr.msk.bf16.gmra.mxu0 %vm286_vm1, %v5257_v6 }
  0x43   :  { %4405 = vmatprep.mubr.msk.bf16.mxu0 %vm5576_vm0, %v7775_v0 }
  0x4a   :  { %4406 = vmatmul.mubr.msk.bf16.gmra.mxu0 %vm286_vm1, %v5258_v7 }
  0x4b   :  { %4409 = vmatprep.mubr.msk.bf16.mxu0 %vm5576_vm0, %v7775_v0 }
  0x52   :  { %4410 = vmatmul.mubr.msk.bf16.gmra.mxu0 %vm286_vm1, %v5259_v8 }
  0x53   :  { %4413 = vmatprep.mubr.msk.bf16.mxu0 %vm5576_vm0, %v7775_v0 }
  0x5a   :  { %4414 = vmatmul.mubr.msk.bf16.gmra.mxu0 %vm286_vm1, %v5260_v10 }
  0x5b   :  { %4417 = vmatprep.mubr.msk.bf16.mxu0 %vm5576_vm0, %v7775_v0 }
  0x62   :  { %4418 = vmatmul.mubr.msk.bf16.gmra.mxu0 %vm286_vm1, %v5261_v11 }
  0x63   :  { %4421 = vmatprep.mubr.msk.bf16.mxu0 %vm5576_vm0, %v7775_v0 }
  0x6a   :  { %4422 = vmatmul.mubr.msk.bf16.gmra.mxu0 %vm286_vm1, %v5262_v12 }
  0x6b   :  { %4425 = vmatprep.mubr.msk.bf16.mxu0 %vm5576_vm0, %v7775_v0 }
  0x72   :  { %4426 = vmatmul.mubr.msk.bf16.gmra.mxu0 %vm286_vm1, %v5263_v13 }
  0x73   :  { %4429 = vmatprep.mubr.msk.bf16.mxu0 %vm5576_vm0, %v7775_v0 }
  0x7a   :  { %4430 = vmatmul.mubr.msk.bf16.gmra.mxu0 %vm286_vm1, %v5264_v14 }
  0x7b   :  { %4433 = vmatprep.mubr.msk.bf16.mxu0 %vm5576_vm0, %v7775_v0 }
  0x82   :  { %4434 = vmatmul.mubr.msk.bf16.gmra.mxu0 %vm286_vm1, %v5265_v15 }
  0x83   :  { %4437 = vmatprep.mubr.msk.bf16.mxu0 %vm5576_vm0, %v7775_v0 }
  0x8a   :  { %4438 = vmatmul.mubr.msk.bf16.gmra.mxu0 %vm286_vm1, %v5266_v16 }
  0x8b   :  { %4441 = vmatprep.mubr.msk.bf16.mxu0 %vm5576_vm0, %v7775_v0 }
  0x92   :  { %4442 = vmatmul.mubr.msk.bf16.gmra.mxu0 %vm286_vm1, %v5267_v17 }
  0x93   :  { %4445 = vmatprep.mubr.msk.bf16.mxu0 %vm5576_vm0, %v7775_v0 }
  0x9a   :  { %4446 = vmatmul.mubr.msk.bf16.gmra.mxu0 %vm286_vm1, %v5268_v20 }
  0x9b   :  { %4449 = vmatprep.mubr.msk.bf16.mxu0 %vm5576_vm0, %v7775_v0 }
  0xa2   :  { %4450 = vmatmul.mubr.msk.bf16.gmra.mxu0 %vm286_vm1, %v5269_v22 }
  0xa3   :  { %4453 = vmatprep.mubr.msk.bf16.mxu0 %vm5576_vm0, %v7775_v0 }
  0xaa   :  { %4454 = vmatmul.mubr.msk.bf16.gmra.mxu0 %vm286_vm1, %v5270_v23 }
  0xab   :  { %4457 = vmatprep.mubr.msk.bf16.mxu0 %vm5576_vm0, %v7775_v0 }
  0xb2   :  { %4458 = vmatmul.mubr.msk.bf16.gmra.mxu0 %vm286_vm1, %v5271_v24 }
  0xb3   :  { %4461 = vmatprep.mubr.msk.bf16.mxu0 %vm5576_vm0, %v7775_v0 }
  0xba   :  { %4462 = vmatmul.mubr.msk.bf16.gmra.mxu0 %vm286_vm1, %v5272_v25 }
  0xbb   :  { %4465 = vmatprep.mubr.msk.bf16.mxu0 %vm5576_vm0, %v7775_v0 }
  0xc2   :  { %4466 = vmatmul.mubr.msk.bf16.gmra.mxu0 %vm286_vm1, %v5273_v26 }
  0xc3   :  { %4469 = vmatprep.mubr.msk.bf16.mxu0 %vm5576_vm0, %v7775_v0 }
  0xca   :  { %4470 = vmatmul.mubr.msk.bf16.gmra.mxu0 %vm286_vm1, %v5274_v27 }
  0xcb   :  { %4473 = vmatprep.mubr.msk.bf16.mxu0 %vm5576_vm0, %v7775_v0 }
  0xd2   :  { %4474 = vmatmul.mubr.msk.bf16.gmra.mxu0 %vm286_vm1, %v5275_v28  ;;  %v5283_v28 = vld [vmem:[#allocation4 + $0x8] sm:$0xff]  }
  0xd3   :  { %4477 = vmatprep.mubr.msk.bf16.mxu0 %vm5576_vm0, %v7775_v0 }
  0xda   :  { %4478 = vmatmul.mubr.msk.bf16.gmra.mxu0 %vm286_vm1, %v5277_v29 }
  0xdb   :  { %4481 = vmatprep.mubr.msk.bf16.mxu0 %vm5576_vm0, %v7775_v0 }
  0xe2   :  { %4482 = vmatmul.mubr.msk.bf16.gmra.mxu0 %vm286_vm1, %v5278_v30 }
  0xe3   :  { %4485 = vmatprep.mubr.msk.bf16.mxu0 %vm5576_vm0, %v7775_v0 }
  0xea   :  { %4486 = vmatmul.mubr.msk.bf16.gmra.mxu0 %vm286_vm1, %v5279_v31 }
  0xeb   :  { %4489 = vmatprep.mubr.msk.bf16.mxu0 %vm5576_vm0, %v7775_v0 }
  0xf2   :  { %v396_v34 = vpop.f32.mrf.mxu0  ;;  %4490 = vmatmul.mubr.msk.bf16.gmra.mxu0 %vm286_vm1, %v5282_v32 }
  0xf3   :  { %v397_v35 = vadd.f32 %v5743_v33, %v396_v34  ;;  %4657 = vmatprep.mubr.msk.bf16.mxu0 %vm5576_vm0, %v7775_v0 }
  0xf4   :  { %v4395_v36 = vpop.f32.mrf.mxu0 }
  0xf5   :  { %v645_v37 = vmin.f32 %v397_v35, 0.0  ;;  %vm595_vm2 = vcmp.gt.f32.partialorder %v397_v35, 0.0 }
  0xf6   :  { %v399_v38 = vpop.f32.mrf.mxu0 }
  0xf7   :  { %v695_v39 = vmul.f32 1.442695, %v645_v37  ;;  %v400_v40 = vadd.f32 %v5743_v33, %v399_v38  ;;  %v5285_v38 = vld [vmem:[#allocation4] sm:$0xff]  }
  0xf8   :  { %v4396_v41 = vpop.f32.mrf.mxu0 }
  0xf9   :  { %5312 = vpow2.f32 %v695_v39  ;;  %v646_v42 = vmin.f32 %v400_v40, 0.0  ;;  %vm596_vm3 = vcmp.gt.f32.partialorder %v400_v40, 0.0 }
  0xfa   :  { %v404_v43 = vpop.f32.mrf.mxu0 }
  0xfb   :  { %v697_v44 = vmul.f32 1.442695, %v646_v42  ;;  %v405_v45 = vadd.f32 %v5743_v33, %v404_v43 }
  0xfc   :  { %v4399_v46 = vpop.f32.mrf.mxu0 }
  0xfd   :  { %5314 = vpow2.f32 %v697_v44  ;;  %v647_v47 = vmin.f32 %v405_v45, 0.0  ;;  %vm597_vm4 = vcmp.gt.f32.partialorder %v405_v45, 0.0 }
  0xfe   :  { %v407_v48 = vpop.f32.mrf.mxu0 }
  0xff   :  { %v699_v49 = vmul.f32 1.442695, %v647_v47  ;;  %v408_v50 = vadd.f32 %v5743_v33, %v407_v48 }
 0x100   :  { %v4400_v51 = vpop.f32.mrf.mxu0 }
 0x101   :  { %5316 = vpow2.f32 %v699_v49  ;;  %v648_v52 = vmin.f32 %v408_v50, 0.0  ;;  %vm598_vm5 = vcmp.gt.f32.partialorder %v408_v50, 0.0 }
 0x102   :  { %v412_v53 = vpop.f32.mrf.mxu0 }
 0x103   :  { %v701_v54 = vmul.f32 1.442695, %v648_v52  ;;  %v5753_v55 = vadd.f32 %v5743_v33, %v412_v53 }
 0x104   :  { %v4403_v56 = vpop.f32.mrf.mxu0 }
 0x105   :  { %5318 = vpow2.f32 %v701_v54  ;;  %v649_v57 = vmin.f32 %v5753_v55, 0.0  ;;  %vm599_vm7 = vcmp.gt.f32.partialorder %v5753_v55, 0.0 }
 0x106   :  { %v5313_v58 = vpop.eup %5312  ;;  %v415_v59 = vpop.f32.mrf.mxu0 }
 0x107   :  { %v703_v60 = vmul.f32 1.442695, %v649_v57  ;;  %v5757_v61 = vadd.f32 %v5743_v33, %v415_v59  ;;  %v3843_v63 = vadd.f32 -1.0, %v5313_v58 }
 0x108   :  { %v4404_v62 = vpop.f32.mrf.mxu0 }
 0x109   :  { %5320 = vpow2.f32 %v703_v60  ;;  %v650_v1 = vmin.f32 %v5757_v61, 0.0  ;;  %v5763_v8 = vsel %vm595_vm2, %v397_v35, %v3843_v63  ;;  %vm600_vm8 = vcmp.gt.f32.partialorder %v5757_v61, 0.0 }
 0x10a   :  { %v5315_v2 = vpop.eup %5314  ;;  %v420_v3 = vpop.f32.mrf.mxu0 }
 0x10b   :  { %v3844_v4 = vadd.f32 -1.0, %v5315_v2  ;;  %v705_v5 = vmul.f32 1.442695, %v650_v1  ;;  %v5761_v6 = vadd.f32 %v5743_v33, %v420_v3 }
 0x10c   :  { %v4407_v7 = vpop.f32.mrf.mxu0 }
 0x10d   :  { %v5765_v9 = vsel %vm596_vm3, %v400_v40, %v3844_v4  ;;  %5322 = vpow2.f32 %v705_v5  ;;  %v651_v10 = vmin.f32 %v5761_v6, 0.0  ;;  %vm601_vm9 = vcmp.gt.f32.partialorder %v5761_v6, 0.0 }
 0x10e   :  { %v5317_v11 = vpop.eup %5316  ;;  %v895_v12 = vpack.c.bf16 %v5765_v9, %v5763_v8  ;;  %v423_v13 = vpop.f32.mrf.mxu0 }
 0x10f   :  { %v707_v14 = vmul.f32 1.442695, %v651_v10  ;;  %v5771_v15 = vadd.f32 %v5743_v33, %v423_v13  ;;  %v3845_v17 = vadd.f32 -1.0, %v5317_v11 }
 0x110   :  { %v4408_v16 = vpop.f32.mrf.mxu0 }
 0x111   :  { %5324 = vpow2.f32 %v707_v14  ;;  %v652_v18 = vmin.f32 %v5771_v15, 0.0  ;;  %v847_v25 = vsel %vm597_vm4, %v405_v45, %v3845_v17  ;;  %vm602_vm10 = vcmp.gt.f32.partialorder %v5771_v15, 0.0 }
 0x112   :  { %v5319_v19 = vpop.eup %5318  ;;  %v428_v20 = vpop.f32.mrf.mxu0 }
 0x113   :  { %v3846_v21 = vadd.f32 -1.0, %v5319_v19  ;;  %v709_v22 = vmul.f32 1.442695, %v652_v18  ;;  %v5775_v23 = vadd.f32 %v5743_v33, %v428_v20 }
 0x114   :  { %v4411_v24 = vpop.f32.mrf.mxu0 }
 0x115   :  { %v848_v26 = vsel %vm598_vm5, %v408_v50, %v3846_v21  ;;  %5326 = vpow2.f32 %v709_v22  ;;  %v653_v27 = vmin.f32 %v5775_v23, 0.0  ;;  %vm603_vm11 = vcmp.gt.f32.partialorder %v5775_v23, 0.0 }
 0x116   :  { %v5321_v29 = vpop.eup %5320  ;;  %v5778_v30 = vpack.c.bf16 %v848_v26, %v847_v25  ;;  %v431_v31 = vpop.f32.mrf.mxu0 }
 0x117   :  { %v711_v32 = vmul.f32 1.442695, %v653_v27  ;;  %v5781_v34 = vadd.f32 %v5743_v33, %v431_v31  ;;  %v3847_v36 = vadd.f32 -1.0, %v5321_v29 }
 0x118   :  { %v4412_v35 = vpop.f32.mrf.mxu0  ;;  %4498 = vmatmul.mubr.msk.bf16.vlgmr.msra.gmra.mxu1 %vm941_vm6, %v5778_v30 }
 0x119   :  { %5328 = vpow2.f32 %v711_v32  ;;  %v654_v37 = vmin.f32 %v5781_v34, 0.0  ;;  %4574 = vmatpush3.bf16.msra.mxu1 %v5283_v28  ;;  %4501 = vmatprep.mubr.msk.bf16.mxu1 %vm5576_vm0, %v7775_v0  ;;  %v849_v45 = vsel %vm599_vm7, %v5753_v55, %v3847_v36  ;;  %vm604_vm12 = vcmp.gt.f32.partialorder %v5781_v34, 0.0  ;;  %v5287_v28 = vld [vmem:[#allocation4 + $0x48] sm:$0xff]   ;;  %v5288_v35 = vld [vmem:[#allocation4 + $0x40] sm:$0xff]  }
 0x11a   :  { %v5323_v39 = vpop.eup %5322  ;;  %v436_v40 = vpop.f32.mrf.mxu0  ;;  %4575 = vmatprep.subr.bf16.mxu1 %v7775_v0 }
 0x11b   :  { %v3848_v41 = vadd.f32 -1.0, %v5323_v39  ;;  %v713_v42 = vmul.f32 1.442695, %v654_v37  ;;  %v5790_v43 = vadd.f32 %v5743_v33, %v436_v40 }
 0x11c   :  { %v4415_v44 = vpop.f32.mrf.mxu0 }
 0x11d   :  { %v850_v46 = vsel %vm600_vm8, %v5757_v61, %v3848_v41  ;;  %5330 = vpow2.f32 %v713_v42  ;;  %v655_v47 = vmin.f32 %v5790_v43, 0.0  ;;  %4576 = vmatpush3.bf16.msra.mxu1 %v5285_v38  ;;  %vm605_vm13 = vcmp.gt.f32.partialorder %v5790_v43, 0.0 }
 0x11e   :  { %v5325_v48 = vpop.eup %5324  ;;  %v5797_v49 = vpack.c.bf16 %v850_v46, %v849_v45  ;;  %v439_v50 = vpop.f32.mrf.mxu0  ;;  %4733 = vmatprep.subr.bf16.mxu1 %v7775_v0 }
 0x11f   :  { %v715_v51 = vmul.f32 1.442695, %v655_v47  ;;  %v5801_v52 = vadd.f32 %v5743_v33, %v439_v50  ;;  %v3849_v54 = vadd.f32 -1.0, %v5325_v48 }
 0x120   :  { %v4416_v53 = vpop.f32.mrf.mxu0  ;;  %4502 = vmatmul.mubr.msk.bf16.gmra.mxu1 %vm941_vm6, %v5797_v49  ;;  %4658 = vmatmul.mubr.msk.bf16.vlgmr.msra.gmra.mxu0 %vm941_vm6, %v5797_v49 }
 0x121   :  { %5332 = vpow2.f32 %v715_v51  ;;  %v656_v55 = vmin.f32 %v5801_v52, 0.0  ;;  %4505 = vmatprep.mubr.msk.bf16.mxu1 %vm5576_vm0, %v7775_v0  ;;  %4661 = vmatprep.mubr.msk.bf16.mxu0 %vm5576_vm0, %v7775_v0  ;;  %v851_v62 = vsel %vm601_vm9, %v5761_v6, %v3849_v54  ;;  %vm606_vm14 = vcmp.gt.f32.partialorder %v5801_v52, 0.0 }
 0x122   :  { %v5327_v56 = vpop.eup %5326  ;;  %v444_v57 = vpop.f32.mrf.mxu0  ;;  %4814 = vmatpush3.bf16.msra.mxu0 %v5287_v28 }
 0x123   :  { %v3850_v58 = vadd.f32 -1.0, %v5327_v56  ;;  %v717_v59 = vmul.f32 1.442695, %v656_v55  ;;  %v5813_v60 = vadd.f32 %v5743_v33, %v444_v57  ;;  %4815 = vmatprep.subr.bf16.mxu0 %v7775_v0 }
 0x124   :  { %v4419_v61 = vpop.f32.mrf.mxu0 }
 0x125   :  { %v852_v63 = vsel %vm602_vm10, %v5771_v15, %v3850_v58  ;;  %5334 = vpow2.f32 %v717_v59  ;;  %v657_v1 = vmin.f32 %v5813_v60, 0.0  ;;  %vm607_vm15 = vcmp.gt.f32.partialorder %v5813_v60, 0.0 }
 0x126   :  { %v5329_v2 = vpop.eup %5328  ;;  %v5820_v3 = vpack.c.bf16 %v852_v63, %v851_v62  ;;  %v447_v4 = vpop.f32.mrf.mxu0  ;;  %4816 = vmatpush3.bf16.msra.mxu0 %v5288_v35 }
 0x127   :  { %v719_v5 = vmul.f32 1.442695, %v657_v1  ;;  %v5823_v7 = vadd.f32 %v5743_v33, %v447_v4  ;;  %v3851_v6 = vadd.f32 -1.0, %v5329_v2  ;;  %4973 = vmatprep.subr.bf16.mxu0 %v7775_v0 }
 0x128   :  { %v4420_v10 = vpop.f32.mrf.mxu0  ;;  %4506 = vmatmul.mubr.msk.bf16.gmra.mxu1 %vm941_vm6, %v5820_v3  ;;  %4662 = vmatmul.mubr.msk.bf16.gmra.mxu0 %vm941_vm6, %v5820_v3 }
 0x129   :  { %5336 = vpow2.f32 %v719_v5  ;;  %v658_v11 = vmin.f32 %v5823_v7, 0.0  ;;  %4509 = vmatprep.mubr.msk.bf16.mxu1 %vm5576_vm0, %v7775_v0  ;;  %4665 = vmatprep.mubr.msk.bf16.mxu0 %vm5576_vm0, %v7775_v0  ;;  %v853_v19 = vsel %vm603_vm11, %v5775_v23, %v3851_v6  ;;  %vm608_vm1 = vcmp.gt.f32.partialorder %v5823_v7, 0.0 }
 0x12a   :  { %v5331_v13 = vpop.eup %5330  ;;  %v452_v14 = vpop.f32.mrf.mxu0 }
 0x12b   :  { %v3852_v15 = vadd.f32 -1.0, %v5331_v13  ;;  %v721_v16 = vmul.f32 1.442695, %v658_v11  ;;  %v5835_v17 = vadd.f32 %v5743_v33, %v452_v14 }
 0x12c   :  { %v4423_v18 = vpop.f32.mrf.mxu0 }
 0x12d   :  { %v854_v20 = vsel %vm604_vm12, %v5781_v34, %v3852_v15  ;;  %5338 = vpow2.f32 %v721_v16  ;;  %v659_v21 = vmin.f32 %v5835_v17, 0.0  ;;  %vm609_vm2 = vcmp.gt.f32.partialorder %v5835_v17, 0.0 }
 0x12e   :  { %v5333_v22 = vpop.eup %5332  ;;  %v5842_v24 = vpack.c.bf16 %v854_v20, %v853_v19  ;;  %v455_v25 = vpop.f32.mrf.mxu0 }
 0x12f   :  { %v723_v26 = vmul.f32 1.442695, %v659_v21  ;;  %v5845_v27 = vadd.f32 %v5743_v33, %v455_v25  ;;  %v3853_v23 = vadd.f32 -1.0, %v5333_v22 }
 0x130   :  { %v4424_v29 = vpop.f32.mrf.mxu0  ;;  %4510 = vmatmul.mubr.msk.bf16.gmra.mxu1 %vm941_vm6, %v5842_v24  ;;  %4666 = vmatmul.mubr.msk.bf16.gmra.mxu0 %vm941_vm6, %v5842_v24 }
 0x131   :  { %5340 = vpow2.f32 %v723_v26  ;;  %v660_v31 = vmin.f32 %v5845_v27, 0.0  ;;  %4513 = vmatprep.mubr.msk.bf16.mxu1 %vm5576_vm0, %v7775_v0  ;;  %4669 = vmatprep.mubr.msk.bf16.mxu0 %vm5576_vm0, %v7775_v0  ;;  %v855_v40 = vsel %vm605_vm13, %v5790_v43, %v3853_v23  ;;  %vm610_vm3 = vcmp.gt.f32.partialorder %v5845_v27, 0.0 }
 0x132   :  { %v5335_v32 = vpop.eup %5334  ;;  %v460_v34 = vpop.f32.mrf.mxu0 }
 0x133   :  { %v3854_v36 = vadd.f32 -1.0, %v5335_v32  ;;  %v725_v37 = vmul.f32 1.442695, %v660_v31  ;;  %v5857_v38 = vadd.f32 %v5743_v33, %v460_v34 }
 0x134   :  { %v4427_v39 = vpop.f32.mrf.mxu0 }
 0x135   :  { %v856_v41 = vsel %vm606_vm14, %v5801_v52, %v3854_v36  ;;  %5342 = vpow2.f32 %v725_v37  ;;  %v661_v42 = vmin.f32 %v5857_v38, 0.0  ;;  %vm611_vm4 = vcmp.gt.f32.partialorder %v5857_v38, 0.0 }
 0x136   :  { %v5337_v44 = vpop.eup %5336  ;;  %v5865_v45 = vpack.c.bf16 %v856_v41, %v855_v40  ;;  %v463_v46 = vpop.f32.mrf.mxu0 }
 0x137   :  { %v727_v47 = vmul.f32 1.442695, %v661_v42  ;;  %v5868_v48 = vadd.f32 %v5743_v33, %v463_v46  ;;  %v3855_v43 = vadd.f32 -1.0, %v5337_v44 }
 0x138   :  { %v4428_v50 = vpop.f32.mrf.mxu0  ;;  %4514 = vmatmul.mubr.msk.bf16.gmra.mxu1 %vm941_vm6, %v5865_v45  ;;  %4670 = vmatmul.mubr.msk.bf16.gmra.mxu0 %vm941_vm6, %v5865_v45 }
 0x139   :  { %5344 = vpow2.f32 %v727_v47  ;;  %v662_v51 = vmin.f32 %v5868_v48, 0.0  ;;  %4517 = vmatprep.mubr.msk.bf16.mxu1 %vm5576_vm0, %v7775_v0  ;;  %4673 = vmatprep.mubr.msk.bf16.mxu0 %vm5576_vm0, %v7775_v0  ;;  %v857_v58 = vsel %vm607_vm15, %v5813_v60, %v3855_v43  ;;  %vm612_vm5 = vcmp.gt.f32.partialorder %v5868_v48, 0.0 }
 0x13a   :  { %v5339_v52 = vpop.eup %5338  ;;  %v468_v53 = vpop.f32.mrf.mxu0 }
 0x13b   :  { %v3856_v54 = vadd.f32 -1.0, %v5339_v52  ;;  %v729_v55 = vmul.f32 1.442695, %v662_v51  ;;  %v5881_v56 = vadd.f32 %v5743_v33, %v468_v53 }
 0x13c   :  { %v4431_v57 = vpop.f32.mrf.mxu0 }
 0x13d   :  { %v858_v59 = vsel %vm608_vm1, %v5823_v7, %v3856_v54  ;;  %5346 = vpow2.f32 %v729_v55  ;;  %v663_v61 = vmin.f32 %v5881_v56, 0.0  ;;  %vm613_vm7 = vcmp.gt.f32.partialorder %v5881_v56, 0.0 }
 0x13e   :  { %v5341_v62 = vpop.eup %5340  ;;  %v5888_v63 = vpack.c.bf16 %v858_v59, %v857_v58  ;;  %v471_v1 = vpop.f32.mrf.mxu0 }
 0x13f   :  { %v731_v2 = vmul.f32 1.442695, %v663_v61  ;;  %v5891_v4 = vadd.f32 %v5743_v33, %v471_v1  ;;  %v3857_v60 = vadd.f32 -1.0, %v5341_v62 }
 0x140   :  { %v4432_v5 = vpop.f32.mrf.mxu0  ;;  %4518 = vmatmul.mubr.msk.bf16.gmra.mxu1 %vm941_vm6, %v5888_v63  ;;  %4674 = vmatmul.mubr.msk.bf16.gmra.mxu0 %vm941_vm6, %v5888_v63 }
 0x141   :  { %5348 = vpow2.f32 %v731_v2  ;;  %v664_v7 = vmin.f32 %v5891_v4, 0.0  ;;  %4521 = vmatprep.mubr.msk.bf16.mxu1 %vm5576_vm0, %v7775_v0  ;;  %4677 = vmatprep.mubr.msk.bf16.mxu0 %vm5576_vm0, %v7775_v0  ;;  %v859_v16 = vsel %vm609_vm2, %v5835_v17, %v3857_v60  ;;  %vm614_vm8 = vcmp.gt.f32.partialorder %v5891_v4, 0.0 }
 0x142   :  { %v5343_v10 = vpop.eup %5342  ;;  %v476_v6 = vpop.f32.mrf.mxu0 }
 0x143   :  { %v3858_v11 = vadd.f32 -1.0, %v5343_v10  ;;  %v733_v13 = vmul.f32 1.442695, %v664_v7  ;;  %v5903_v14 = vadd.f32 %v5743_v33, %v476_v6 }
 0x144   :  { %v4435_v15 = vpop.f32.mrf.mxu0 }
 0x145   :  { %v860_v18 = vsel %vm610_vm3, %v5845_v27, %v3858_v11  ;;  %5350 = vpow2.f32 %v733_v13  ;;  %v665_v19 = vmin.f32 %v5903_v14, 0.0  ;;  %vm615_vm9 = vcmp.gt.f32.partialorder %v5903_v14, 0.0 }
 0x146   :  { %v5345_v20 = vpop.eup %5344  ;;  %v5910_v21 = vpack.c.bf16 %v860_v18, %v859_v16  ;;  %v479_v22 = vpop.f32.mrf.mxu0 }
 0x147   :  { %v735_v25 = vmul.f32 1.442695, %v665_v19  ;;  %v5913_v26 = vadd.f32 %v5743_v33, %v479_v22  ;;  %v3859_v17 = vadd.f32 -1.0, %v5345_v20 }
 0x148   :  { %v4436_v28 = vpop.f32.mrf.mxu0  ;;  %4522 = vmatmul.mubr.msk.bf16.gmra.mxu1 %vm941_vm6, %v5910_v21  ;;  %4678 = vmatmul.mubr.msk.bf16.gmra.mxu0 %vm941_vm6, %v5910_v21 }
 0x149   :  { %5352 = vpow2.f32 %v735_v25  ;;  %v666_v27 = vmin.f32 %v5913_v26, 0.0  ;;  %4525 = vmatprep.mubr.msk.bf16.mxu1 %vm5576_vm0, %v7775_v0  ;;  %4681 = vmatprep.mubr.msk.bf16.mxu0 %vm5576_vm0, %v7775_v0  ;;  %v861_v36 = vsel %vm611_vm4, %v5857_v38, %v3859_v17  ;;  %vm616_vm10 = vcmp.gt.f32.partialorder %v5913_v26, 0.0 }
 0x14a   :  { %v5347_v29 = vpop.eup %5346  ;;  %v484_v23 = vpop.f32.mrf.mxu0 }
 0x14b   :  { %v3860_v31 = vadd.f32 -1.0, %v5347_v29  ;;  %v737_v32 = vmul.f32 1.442695, %v666_v27  ;;  %v5925_v34 = vadd.f32 %v5743_v33, %v484_v23 }
 0x14c   :  { %v4439_v35 = vpop.f32.mrf.mxu0 }
 0x14d   :  { %v862_v37 = vsel %vm612_vm5, %v5868_v48, %v3860_v31  ;;  %5354 = vpow2.f32 %v737_v32  ;;  %v667_v39 = vmin.f32 %v5925_v34, 0.0  ;;  %vm617_vm11 = vcmp.gt.f32.partialorder %v5925_v34, 0.0 }
 0x14e   :  { %v5349_v40 = vpop.eup %5348  ;;  %v5932_v41 = vpack.c.bf16 %v862_v37, %v861_v36  ;;  %v487_v42 = vpop.f32.mrf.mxu0 }
 0x14f   :  { %v739_v44 = vmul.f32 1.442695, %v667_v39  ;;  %v5935_v46 = vadd.f32 %v5743_v33, %v487_v42  ;;  %v3861_v38 = vadd.f32 -1.0, %v5349_v40 }
 0x150   :  { %v4440_v47 = vpop.f32.mrf.mxu0  ;;  %4526 = vmatmul.mubr.msk.bf16.gmra.mxu1 %vm941_vm6, %v5932_v41  ;;  %4682 = vmatmul.mubr.msk.bf16.gmra.mxu0 %vm941_vm6, %v5932_v41 }
 0x151   :  { %5356 = vpow2.f32 %v739_v44  ;;  %v668_v48 = vmin.f32 %v5935_v46, 0.0  ;;  %4529 = vmatprep.mubr.msk.bf16.mxu1 %vm5576_vm0, %v7775_v0  ;;  %4685 = vmatprep.mubr.msk.bf16.mxu0 %vm5576_vm0, %v7775_v0  ;;  %v863_v55 = vsel %vm613_vm7, %v5881_v56, %v3861_v38  ;;  %vm618_vm12 = vcmp.gt.f32.partialorder %v5935_v46, 0.0 }
 0x152   :  { %v5351_v50 = vpop.eup %5350  ;;  %v492_v43 = vpop.f32.mrf.mxu0 }
 0x153   :  { %v3862_v51 = vadd.f32 -1.0, %v5351_v50  ;;  %v741_v52 = vmul.f32 1.442695, %v668_v48  ;;  %v5947_v53 = vadd.f32 %v5743_v33, %v492_v43 }
 0x154   :  { %v4443_v54 = vpop.f32.mrf.mxu0 }
 0x155   :  { %v864_v57 = vsel %vm614_vm8, %v5891_v4, %v3862_v51  ;;  %5358 = vpow2.f32 %v741_v52  ;;  %v669_v58 = vmin.f32 %v5947_v53, 0.0  ;;  %vm619_vm13 = vcmp.gt.f32.partialorder %v5947_v53, 0.0 }
 0x156   :  { %v5353_v59 = vpop.eup %5352  ;;  %v5954_v61 = vpack.c.bf16 %v864_v57, %v863_v55  ;;  %v495_v62 = vpop.f32.mrf.mxu0 }
 0x157   :  { %v743_v1 = vmul.f32 1.442695, %v669_v58  ;;  %v5957_v2 = vadd.f32 %v5743_v33, %v495_v62  ;;  %v3863_v56 = vadd.f32 -1.0, %v5353_v59 }
 0x158   :  { %v4444_v5 = vpop.f32.mrf.mxu0  ;;  %4530 = vmatmul.mubr.msk.bf16.gmra.mxu1 %vm941_vm6, %v5954_v61  ;;  %4686 = vmatmul.mubr.msk.bf16.gmra.mxu0 %vm941_vm6, %v5954_v61 }
 0x159   :  { %5360 = vpow2.f32 %v743_v1  ;;  %v670_v4 = vmin.f32 %v5957_v2, 0.0  ;;  %4533 = vmatprep.mubr.msk.bf16.mxu1 %vm5576_vm0, %v7775_v0  ;;  %4689 = vmatprep.mubr.msk.bf16.mxu0 %vm5576_vm0, %v7775_v0  ;;  %v865_v15 = vsel %vm615_vm9, %v5903_v14, %v3863_v56  ;;  %vm620_vm14 = vcmp.gt.f32.partialorder %v5957_v2, 0.0 }
 0x15a   :  { %v5355_v60 = vpop.eup %5354  ;;  %v500_v7 = vpop.f32.mrf.mxu0 }
 0x15b   :  { %v3864_v10 = vadd.f32 -1.0, %v5355_v60  ;;  %v745_v6 = vmul.f32 1.442695, %v670_v4  ;;  %v5969_v11 = vadd.f32 %v5743_v33, %v500_v7 }
 0x15c   :  { %v4447_v13 = vpop.f32.mrf.mxu0 }
 0x15d   :  { %v866_v16 = vsel %vm616_vm10, %v5913_v26, %v3864_v10  ;;  %5362 = vpow2.f32 %v745_v6  ;;  %v671_v18 = vmin.f32 %v5969_v11, 0.0  ;;  %vm621_vm15 = vcmp.gt.f32.partialorder %v5969_v11, 0.0 }
 0x15e   :  { %v5357_v19 = vpop.eup %5356  ;;  %v5976_v20 = vpack.c.bf16 %v866_v16, %v865_v15  ;;  %v503_v22 = vpop.f32.mrf.mxu0 }
 0x15f   :  { %v747_v25 = vmul.f32 1.442695, %v671_v18  ;;  %v5979_v28 = vadd.f32 %v5743_v33, %v503_v22  ;;  %v3865_v14 = vadd.f32 -1.0, %v5357_v19 }
 0x160   :  { %v4448_v17 = vpop.f32.mrf.mxu0  ;;  %4534 = vmatmul.mubr.msk.bf16.gmra.mxu1 %vm941_vm6, %v5976_v20  ;;  %4690 = vmatmul.mubr.msk.bf16.gmra.mxu0 %vm941_vm6, %v5976_v20 }
 0x161   :  { %5364 = vpow2.f32 %v747_v25  ;;  %v672_v26 = vmin.f32 %v5979_v28, 0.0  ;;  %4537 = vmatprep.mubr.msk.bf16.mxu1 %vm5576_vm0, %v7775_v0  ;;  %4693 = vmatprep.mubr.msk.bf16.mxu0 %vm5576_vm0, %v7775_v0  ;;  %v867_v36 = vsel %vm617_vm11, %v5925_v34, %v3865_v14  ;;  %vm622_vm1 = vcmp.gt.f32.partialorder %v5979_v28, 0.0 }
 0x162   :  { %v5359_v27 = vpop.eup %5358  ;;  %v508_v29 = vpop.f32.mrf.mxu0 }
 0x163   :  { %v3866_v23 = vadd.f32 -1.0, %v5359_v27  ;;  %v749_v31 = vmul.f32 1.442695, %v672_v26  ;;  %v5991_v32 = vadd.f32 %v5743_v33, %v508_v29 }
 0x164   :  { %v4451_v35 = vpop.f32.mrf.mxu0 }
 0x165   :  { %v868_v37 = vsel %vm618_vm12, %v5935_v46, %v3866_v23  ;;  %5366 = vpow2.f32 %v749_v31  ;;  %v673_v39 = vmin.f32 %v5991_v32, 0.0  ;;  %vm623_vm2 = vcmp.gt.f32.partialorder %v5991_v32, 0.0 }
 0x166   :  { %v5361_v40 = vpop.eup %5360  ;;  %v5998_v42 = vpack.c.bf16 %v868_v37, %v867_v36  ;;  %v511_v44 = vpop.f32.mrf.mxu0 }
 0x167   :  { %v751_v47 = vmul.f32 1.442695, %v673_v39  ;;  %v6001_v38 = vadd.f32 %v5743_v33, %v511_v44  ;;  %v3867_v34 = vadd.f32 -1.0, %v5361_v40 }
 0x168   :  { %v4452_v48 = vpop.f32.mrf.mxu0  ;;  %4538 = vmatmul.mubr.msk.bf16.gmra.mxu1 %vm941_vm6, %v5998_v42  ;;  %4694 = vmatmul.mubr.msk.bf16.gmra.mxu0 %vm941_vm6, %v5998_v42 }
 0x169   :  { %5368 = vpow2.f32 %v751_v47  ;;  %v674_v46 = vmin.f32 %v6001_v38, 0.0  ;;  %4541 = vmatprep.mubr.msk.bf16.mxu1 %vm5576_vm0, %v7775_v0  ;;  %4697 = vmatprep.mubr.msk.bf16.mxu0 %vm5576_vm0, %v7775_v0  ;;  %v869_v57 = vsel %vm619_vm13, %v5947_v53, %v3867_v34  ;;  %vm624_vm3 = vcmp.gt.f32.partialorder %v6001_v38, 0.0 }
 0x16a   :  { %v5363_v50 = vpop.eup %5362  ;;  %v516_v43 = vpop.f32.mrf.mxu0 }
 0x16b   :  { %v3868_v51 = vadd.f32 -1.0, %v5363_v50  ;;  %v753_v52 = vmul.f32 1.442695, %v674_v46  ;;  %v6013_v54 = vadd.f32 %v5743_v33, %v516_v43 }
 0x16c   :  { %v4455_v55 = vpop.f32.mrf.mxu0 }
 0x16d   :  { %v870_v58 = vsel %vm620_vm14, %v5957_v2, %v3868_v51  ;;  %5370 = vpow2.f32 %v753_v52  ;;  %v675_v59 = vmin.f32 %v6013_v54, 0.0  ;;  %vm625_vm4 = vcmp.gt.f32.partialorder %v6013_v54, 0.0 }
 0x16e   :  { %v5365_v62 = vpop.eup %5364  ;;  %v6020_v1 = vpack.c.bf16 %v870_v58, %v869_v57  ;;  %v519_v5 = vpop.f32.mrf.mxu0 }
 0x16f   :  { %v755_v56 = vmul.f32 1.442695, %v675_v59  ;;  %v6023_v4 = vadd.f32 %v5743_v33, %v519_v5  ;;  %v3869_v53 = vadd.f32 -1.0, %v5365_v62 }
 0x170   :  { %v4456_v60 = vpop.f32.mrf.mxu0  ;;  %4542 = vmatmul.mubr.msk.bf16.gmra.mxu1 %vm941_vm6, %v6020_v1  ;;  %4698 = vmatmul.mubr.msk.bf16.gmra.mxu0 %vm941_vm6, %v6020_v1 }
 0x171   :  { %5372 = vpow2.f32 %v755_v56  ;;  %v676_v2 = vmin.f32 %v6023_v4, 0.0  ;;  %4545 = vmatprep.mubr.msk.bf16.mxu1 %vm5576_vm0, %v7775_v0  ;;  %4701 = vmatprep.mubr.msk.bf16.mxu0 %vm5576_vm0, %v7775_v0  ;;  %v871_v18 = vsel %vm621_vm15, %v5969_v11, %v3869_v53  ;;  %vm626_vm5 = vcmp.gt.f32.partialorder %v6023_v4, 0.0 }
 0x172   :  { %v5367_v7 = vpop.eup %5366  ;;  %v524_v10 = vpop.f32.mrf.mxu0 }
 0x173   :  { %v3870_v6 = vadd.f32 -1.0, %v5367_v7  ;;  %v757_v13 = vmul.f32 1.442695, %v676_v2  ;;  %v6035_v15 = vadd.f32 %v5743_v33, %v524_v10 }
 0x174   :  { %v4459_v16 = vpop.f32.mrf.mxu0 }
 0x175   :  { %v872_v19 = vsel %vm622_vm1, %v5979_v28, %v3870_v6  ;;  %5374 = vpow2.f32 %v757_v13  ;;  %v677_v22 = vmin.f32 %v6035_v15, 0.0  ;;  %vm627_vm7 = vcmp.gt.f32.partialorder %v6035_v15, 0.0 }
 0x176   :  { %v5369_v25 = vpop.eup %5368  ;;  %v6042_v17 = vpack.c.bf16 %v872_v19, %v871_v18  ;;  %v527_v14 = vpop.f32.mrf.mxu0 }
 0x177   :  { %v759_v26 = vmul.f32 1.442695, %v677_v22  ;;  %v6045_v27 = vadd.f32 %v5743_v33, %v527_v14  ;;  %v3871_v11 = vadd.f32 -1.0, %v5369_v25 }
 0x178   :  { %v4460_v29 = vpop.f32.mrf.mxu0  ;;  %4546 = vmatmul.mubr.msk.bf16.gmra.mxu1 %vm941_vm6, %v6042_v17  ;;  %4702 = vmatmul.mubr.msk.bf16.gmra.mxu0 %vm941_vm6, %v6042_v17 }
 0x179   :  { %5376 = vpow2.f32 %v759_v26  ;;  %v678_v28 = vmin.f32 %v6045_v27, 0.0  ;;  %4549 = vmatprep.mubr.msk.bf16.mxu1 %vm5576_vm0, %v7775_v0  ;;  %4705 = vmatprep.mubr.msk.bf16.mxu0 %vm5576_vm0, %v7775_v0  ;;  %v873_v40 = vsel %vm623_vm2, %v5991_v32, %v3871_v11  ;;  %vm628_vm8 = vcmp.gt.f32.partialorder %v6045_v27, 0.0 }
 0x17a   :  { %v5371_v23 = vpop.eup %5370  ;;  %v532_v31 = vpop.f32.mrf.mxu0 }
 0x17b   :  { %v3872_v35 = vadd.f32 -1.0, %v5371_v23  ;;  %v761_v36 = vmul.f32 1.442695, %v678_v28  ;;  %v6057_v37 = vadd.f32 %v5743_v33, %v532_v31 }
 0x17c   :  { %v4463_v39 = vpop.f32.mrf.mxu0 }
 0x17d   :  { %v874_v44 = vsel %vm624_vm3, %v6001_v38, %v3872_v35  ;;  %5378 = vpow2.f32 %v761_v36  ;;  %v679_v47 = vmin.f32 %v6057_v37, 0.0  ;;  %vm629_vm9 = vcmp.gt.f32.partialorder %v6057_v37, 0.0 }
 0x17e   :  { %v5373_v48 = vpop.eup %5372  ;;  %v6064_v34 = vpack.c.bf16 %v874_v44, %v873_v40  ;;  %v535_v46 = vpop.f32.mrf.mxu0 }
 0x17f   :  { %v763_v50 = vmul.f32 1.442695, %v679_v47  ;;  %v6067_v43 = vadd.f32 %v5743_v33, %v535_v46  ;;  %v3873_v32 = vadd.f32 -1.0, %v5373_v48 }
 0x180   :  { %v4464_v51 = vpop.f32.mrf.mxu0  ;;  %4550 = vmatmul.mubr.msk.bf16.gmra.mxu1 %vm941_vm6, %v6064_v34  ;;  %4706 = vmatmul.mubr.msk.bf16.gmra.mxu0 %vm941_vm6, %v6064_v34 }
 0x181   :  { %5380 = vpow2.f32 %v763_v50  ;;  %v680_v38 = vmin.f32 %v6067_v43, 0.0  ;;  %4553 = vmatprep.mubr.msk.bf16.mxu1 %vm5576_vm0, %v7775_v0  ;;  %4709 = vmatprep.mubr.msk.bf16.mxu0 %vm5576_vm0, %v7775_v0  ;;  %v875_v5 = vsel %vm625_vm4, %v6013_v54, %v3873_v32  ;;  %vm630_vm10 = vcmp.gt.f32.partialorder %v6067_v43, 0.0 }
 0x182   :  { %v5375_v52 = vpop.eup %5374  ;;  %v540_v55 = vpop.f32.mrf.mxu0 }
 0x183   :  { %v3874_v57 = vadd.f32 -1.0, %v5375_v52  ;;  %v765_v58 = vmul.f32 1.442695, %v680_v38  ;;  %v6079_v59 = vadd.f32 %v5743_v33, %v540_v55 }
 0x184   :  { %v4467_v62 = vpop.f32.mrf.mxu0 }
 0x185   :  { %v876_v56 = vsel %vm626_vm5, %v6023_v4, %v3874_v57  ;;  %5382 = vpow2.f32 %v765_v58  ;;  %v681_v60 = vmin.f32 %v6079_v59, 0.0  ;;  %vm631_vm11 = vcmp.gt.f32.partialorder %v6079_v59, 0.0 }
 0x186   :  { %v5377_v53 = vpop.eup %5376  ;;  %v6086_v2 = vpack.c.bf16 %v876_v56, %v875_v5  ;;  %v543_v7 = vpop.f32.mrf.mxu0 }
 0x187   :  { %v767_v10 = vmul.f32 1.442695, %v681_v60  ;;  %v6089_v6 = vadd.f32 %v5743_v33, %v543_v7  ;;  %v3875_v54 = vadd.f32 -1.0, %v5377_v53 }
 0x188   :  { %v4468_v13 = vpop.f32.mrf.mxu0  ;;  %4554 = vmatmul.mubr.msk.bf16.gmra.mxu1 %vm941_vm6, %v6086_v2  ;;  %4710 = vmatmul.mubr.msk.bf16.gmra.mxu0 %vm941_vm6, %v6086_v2 }
 0x189   :  { %5384 = vpow2.f32 %v767_v10  ;;  %v682_v4 = vmin.f32 %v6089_v6, 0.0  ;;  %4557 = vmatprep.mubr.msk.bf16.mxu1 %vm5576_vm0, %v7775_v0  ;;  %4713 = vmatprep.mubr.msk.bf16.mxu0 %vm5576_vm0, %v7775_v0  ;;  %v877_v26 = vsel %vm627_vm7, %v6035_v15, %v3875_v54  ;;  %vm632_vm12 = vcmp.gt.f32.partialorder %v6089_v6, 0.0 }
 0x18a   :  { %v5379_v16 = vpop.eup %5378  ;;  %v548_v18 = vpop.f32.mrf.mxu0 }
 0x18b   :  { %v3876_v19 = vadd.f32 -1.0, %v5379_v16  ;;  %v769_v22 = vmul.f32 1.442695, %v682_v4  ;;  %v6101_v25 = vadd.f32 %v5743_v33, %v548_v18 }
 0x18c   :  { %v4471_v14 = vpop.f32.mrf.mxu0 }
 0x18d   :  { %v878_v29 = vsel %vm628_vm8, %v6045_v27, %v3876_v19  ;;  %5386 = vpow2.f32 %v769_v22  ;;  %v683_v11 = vmin.f32 %v6101_v25, 0.0  ;;  %vm633_vm13 = vcmp.gt.f32.partialorder %v6101_v25, 0.0 }
 0x18e   :  { %v5381_v28 = vpop.eup %5380  ;;  %v6108_v23 = vpack.c.bf16 %v878_v29, %v877_v26  ;;  %v551_v31 = vpop.f32.mrf.mxu0 }
 0x18f   :  { %v771_v35 = vmul.f32 1.442695, %v683_v11  ;;  %v6111_v36 = vadd.f32 %v5743_v33, %v551_v31  ;;  %v3877_v15 = vadd.f32 -1.0, %v5381_v28 }
 0x190   :  { %v4472_v39 = vpop.f32.mrf.mxu0  ;;  %4558 = vmatmul.mubr.msk.bf16.gmra.mxu1 %vm941_vm6, %v6108_v23  ;;  %4714 = vmatmul.mubr.msk.bf16.gmra.mxu0 %vm941_vm6, %v6108_v23 }
 0x191   :  { %5388 = vpow2.f32 %v771_v35  ;;  %v684_v27 = vmin.f32 %v6111_v36, 0.0  ;;  %4561 = vmatprep.mubr.msk.bf16.mxu1 %vm5576_vm0, %v7775_v0  ;;  %4717 = vmatprep.mubr.msk.bf16.mxu0 %vm5576_vm0, %v7775_v0  ;;  %v879_v51 = vsel %vm629_vm9, %v6057_v37, %v3877_v15  ;;  %vm634_vm14 = vcmp.gt.f32.partialorder %v6111_v36, 0.0 }
 0x192   :  { %v5383_v40 = vpop.eup %5382  ;;  %v556_v44 = vpop.f32.mrf.mxu0 }
 0x193   :  { %v3878_v47 = vadd.f32 -1.0, %v5383_v40  ;;  %v773_v48 = vmul.f32 1.442695, %v684_v27  ;;  %v6123_v46 = vadd.f32 %v5743_v33, %v556_v44 }
 0x194   :  { %v4475_v50 = vpop.f32.mrf.mxu0 }
 0x195   :  { %v880_v32 = vsel %vm630_vm10, %v6067_v43, %v3878_v47  ;;  %5390 = vpow2.f32 %v773_v48  ;;  %v685_v38 = vmin.f32 %v6123_v46, 0.0  ;;  %vm635_vm15 = vcmp.gt.f32.partialorder %v6123_v46, 0.0 }
 0x196   :  { %v5385_v52 = vpop.eup %5384  ;;  %v6130_v55 = vpack.c.bf16 %v880_v32, %v879_v51  ;;  %v559_v57 = vpop.f32.mrf.mxu0 }
 0x197   :  { %v775_v58 = vmul.f32 1.442695, %v685_v38  ;;  %v6133_v62 = vadd.f32 %v5743_v33, %v559_v57  ;;  %v3879_v5 = vadd.f32 -1.0, %v5385_v52 }
 0x198   :  { %4562 = vmatmul.mubr.msk.bf16.gmra.mxu1 %vm941_vm6, %v6130_v55  ;;  %4718 = vmatmul.mubr.msk.bf16.gmra.mxu0 %vm941_vm6, %v6130_v55  ;;  %v4476_v37 = vpop.f32.mrf.mxu0 }
 0x199   :  { %5392 = vpow2.f32 %v775_v58  ;;  %v686_v43 = vmin.f32 %v6133_v62, 0.0  ;;  %4565 = vmatprep.mubr.msk.bf16.mxu1 %vm5576_vm0, %v7775_v0  ;;  %4721 = vmatprep.mubr.msk.bf16.mxu0 %vm5576_vm0, %v7775_v0  ;;  %v881_v54 = vsel %vm631_vm11, %v6079_v59, %v3879_v5  ;;  %vm636_vm1 = vcmp.gt.f32.partialorder %v6133_v62, 0.0 }
 0x19a   :  { %v5387_v56 = vpop.eup %5386  ;;  %v564_v60 = vpop.f32.mrf.mxu0 }
 0x19b   :  { %v3880_v53 = vadd.f32 -1.0, %v5387_v56  ;;  %v777_v7 = vmul.f32 1.442695, %v686_v43  ;;  %v6145_v10 = vadd.f32 %v5743_v33, %v564_v60  ;;  %v6157_v33 = vld [vmem:[%s7763_s2] ss:$0 sm:$0xff] }
 0x19c   :  { %v4479_v13 = vpop.f32.mrf.mxu0 }
 0x19d   :  { %v882_v4 = vsel %vm632_vm12, %v6089_v6, %v3880_v53  ;;  %5394 = vpow2.f32 %v777_v7  ;;  %v687_v16 = vmin.f32 %v6145_v10, 0.0  ;;  %v5286_v53 = vld [vmem:[#allocation4 + $0x38] sm:$0xff]   ;;  %vm637_vm2 = vcmp.gt.f32.partialorder %v6145_v10, 0.0 }
 0x19e   :  { %v5389_v18 = vpop.eup %5388  ;;  %v6152_v19 = vpack.c.bf16 %v882_v4, %v881_v54  ;;  %v567_v22 = vpop.f32.mrf.mxu0 }
 0x19f   :  { %v779_v14 = vmul.f32 1.442695, %v687_v16  ;;  %v6160_v26 = vadd.f32 %v6157_v33, %v567_v22  ;;  %v3881_v6 = vadd.f32 -1.0, %v5389_v18 }
 0x1a0   :  { %4566 = vmatmul.mubr.msk.bf16.gmra.mxu1 %vm941_vm6, %v6152_v19  ;;  %4722 = vmatmul.mubr.msk.bf16.gmra.mxu0 %vm941_vm6, %v6152_v19  ;;  %v4480_v59 = vpop.f32.mrf.mxu0 }
 0x1a1   :  { %4569 = vmatprep.mubr.msk.bf16.mxu1 %vm5576_vm0, %v7775_v0  ;;  %4725 = vmatprep.mubr.msk.bf16.mxu0 %vm5576_vm0, %v7775_v0  ;;  %5396 = vpow2.f32 %v779_v14  ;;  %v688_v29 = vmin.f32 %v6160_v26, 0.0  ;;  %v883_v27 = vsel %vm633_vm13, %v6101_v25, %v3881_v6  ;;  %v5289_v14 = vld [vmem:[#allocation4 + $0x30] sm:$0xff]   ;;  %vm638_vm3 = vcmp.gt.f32.partialorder %v6160_v26, 0.0 }
 0x1a2   :  { %v5391_v11 = vpop.eup %5390  ;;  %v572_v28 = vpop.f32.mrf.mxu0 }
 0x1a3   :  { %v3882_v31 = vadd.f32 -1.0, %v5391_v11  ;;  %v781_v35 = vmul.f32 1.442695, %v688_v29  ;;  %v6172_v39 = vadd.f32 %v6157_v33, %v572_v28 }
 0x1a4   :  { %v4483_v15 = vpop.f32.mrf.mxu0 }
 0x1a5   :  { %v884_v40 = vsel %vm634_vm14, %v6111_v36, %v3882_v31  ;;  %5398 = vpow2.f32 %v781_v35  ;;  %v689_v44 = vmin.f32 %v6172_v39, 0.0  ;;  %vm639_vm4 = vcmp.gt.f32.partialorder %v6172_v39, 0.0 }
 0x1a6   :  { %v5393_v47 = vpop.eup %5392  ;;  %v6179_v48 = vpack.c.bf16 %v884_v40, %v883_v27  ;;  %v575_v50 = vpop.f32.mrf.mxu0 }
 0x1a7   :  { %v3883_v51 = vadd.f32 -1.0, %v5393_v47  ;;  %v783_v32 = vmul.f32 1.442695, %v689_v44  ;;  %v6182_v38 = vadd.f32 %v6157_v33, %v575_v50 }
 0x1a8   :  { %4570 = vmatmul.mubr.msk.bf16.gmra.mxu1 %vm941_vm6, %v6179_v48  ;;  %4726 = vmatmul.mubr.msk.bf16.gmra.mxu0 %vm941_vm6, %v6179_v48  ;;  %v4484_v25 = vpop.f32.mrf.mxu0 }
 0x1a9   :  { %4577 = vmatprep.mubr.msk.bf16.mxu1 %vm5576_vm0, %v7775_v0  ;;  %4729 = vmatprep.mubr.msk.bf16.mxu0 %vm5576_vm0, %v7775_v0  ;;  %5400 = vpow2.f32 %v783_v32  ;;  %v690_v36 = vmin.f32 %v6182_v38, 0.0  ;;  %v885_v58 = vsel %vm635_vm15, %v6123_v46, %v3883_v51  ;;  %vm640_vm5 = vcmp.gt.f32.partialorder %v6182_v38, 0.0 }
 0x1aa   :  { %v5395_v52 = vpop.eup %5394  ;;  %v580_v57 = vpop.f32.mrf.mxu0 }
 0x1ab   :  { %v3884_v37 = vadd.f32 -1.0, %v5395_v52  ;;  %v785_v5 = vmul.f32 1.442695, %v690_v36  ;;  %v6197_v43 = vadd.f32 %v6157_v33, %v580_v57 }
 0x1ac   :  { %v4487_v56 = vpop.f32.mrf.mxu0 }
 0x1ad   :  { %v886_v60 = vsel %vm636_vm1, %v6133_v62, %v3884_v37  ;;  %5402 = vpow2.f32 %v785_v5  ;;  %v691_v7 = vmin.f32 %v6197_v43, 0.0  ;;  %vm641_vm7 = vcmp.gt.f32.partialorder %v6197_v43, 0.0  ;;  %v5291_v56 = vld [vmem:[#allocation4 + $0x68] sm:$0xff]  }
 0x1ae   :  { %v5397_v13 = vpop.eup %5396  ;;  %v6201_v54 = vpack.c.bf16 %v886_v60, %v885_v58  ;;  %v583_v4 = vpop.f32.mrf.mxu0 }
 0x1af   :  { %v3885_v16 = vadd.f32 -1.0, %v5397_v13  ;;  %v787_v18 = vmul.f32 1.442695, %v691_v7  ;;  %v584_v46 = vadd.f32 %v6157_v33, %v583_v4  ;;  %v5292_v7 = vld [vmem:[#allocation4 + $0x60] sm:$0xff]  }
 0x1b0   :  { %4578 = vmatmul.mubr.msk.bf16.vlgmr.msra.gmra.mxu1 %vm941_vm6, %v895_v12  ;;  %4730 = vmatmul.mubr.msk.bf16.gmra.mxu0 %vm941_vm6, %v6201_v54  ;;  %v4488_v62 = vpop.f32.mrf.mxu0 }
 0x1b1   :  { %4734 = vmatpush3.bf16.msra.mxu1 %v5286_v53  ;;  %4581 = vmatprep.mubr.msk.bf16.mxu1 %vm5576_vm0, %v7775_v0  ;;  %5404 = vpow2.f32 %v787_v18  ;;  %v692_v22 = vmin.f32 %v584_v46, 0.0  ;;  %v887_v9 = vsel %vm637_vm2, %v6145_v10, %v3885_v16  ;;  %vm642_vm8 = vcmp.gt.f32.partialorder %v584_v46, 0.0 }
 0x1b2   :  { %v5399_v59 = vpop.eup %5398  ;;  %4817 = vmatprep.mubr.msk.bf16.mxu0 %vm5576_vm0, %v7775_v0  ;;  %v588_v8 = vpop.f32.mrf.mxu0  ;;  %4735 = vmatprep.subr.bf16.mxu1 %v7775_v0 }
 0x1b3   :  { %v3886_v12 = vadd.f32 -1.0, %v5399_v59  ;;  %v789_v6 = vmul.f32 1.442695, %v692_v22  ;;  %v589_v29 = vadd.f32 %v6157_v33, %v588_v8 }
 0x1b4   :  { %v4491_v11 = vpop.f32.mrf.mxu0 }
 0x1b5   :  { %v888_v28 = vsel %vm638_vm3, %v6160_v26, %v3886_v12  ;;  %5406 = vpow2.f32 %v789_v6  ;;  %v693_v31 = vmin.f32 %v589_v29, 0.0  ;;  %4736 = vmatpush3.bf16.msra.mxu1 %v5289_v14  ;;  %vm643_vm9 = vcmp.gt.f32.partialorder %v589_v29, 0.0 }
 0x1b6   :  { %v5401_v35 = vpop.eup %5400  ;;  %v6220_v15 = vpack.c.bf16 %v888_v28, %v887_v9  ;;  %v591_v27 = vpop.f32.mrf.mxu0  ;;  %4893 = vmatprep.subr.bf16.mxu1 %v7775_v0 }
 0x1b7   :  { %v3887_v40 = vadd.f32 -1.0, %v5401_v35  ;;  %v791_v44 = vmul.f32 1.442695, %v693_v31  ;;  %v592_v10 = vadd.f32 %v6157_v33, %v591_v27 }
 0x1b8   :  { %4582 = vmatmul.mubr.msk.bf16.gmra.mxu1 %vm941_vm6, %v5778_v30  ;;  %4818 = vmatmul.mubr.msk.bf16.vlgmr.msra.gmra.mxu0 %vm941_vm6, %v5842_v24  ;;  %v4492_v26 = vpop.f32.mrf.mxu0 }
 0x1b9   :  { %4585 = vmatprep.mubr.msk.bf16.mxu1 %vm5576_vm0, %v7775_v0  ;;  %4821 = vmatprep.mubr.msk.bf16.mxu0 %vm5576_vm0, %v7775_v0  ;;  %5408 = vpow2.f32 %v791_v44  ;;  %v694_v47 = vmin.f32 %v592_v10, 0.0  ;;  %v889_v33 = vsel %vm639_vm4, %v6172_v39, %v3887_v40  ;;  %vm644_vm10 = vcmp.gt.f32.partialorder %v592_v10, 0.0 }
 0x1ba   :  { %v5403_v50 = vpop.eup %5402  ;;  %4974 = vmatpush3.bf16.msra.mxu0 %v5291_v56 }
 0x1bb   :  { %v3888_v30 = vadd.f32 -1.0, %v5403_v50  ;;  %v793_v51 = vmul.f32 1.442695, %v694_v47  ;;  %4975 = vmatprep.subr.bf16.mxu0 %v7775_v0 }
 0x1bd   :  { %v890_v32 = vsel %vm640_vm5, %v6182_v38, %v3888_v30  ;;  %5410 = vpow2.f32 %v793_v51 }
 0x1be   :  { %v5405_v25 = vpop.eup %5404  ;;  %v6236_v36 = vpack.c.bf16 %v890_v32, %v889_v33  ;;  %4976 = vmatpush3.bf16.msra.mxu0 %v5292_v7 }
 0x1bf   :  { %v3889_v52 = vadd.f32 -1.0, %v5405_v25  ;;  %5085 = vmatprep.subr.bf16.mxu0 %v7775_v0 }
 0x1c0   :  { %7777 = vst [vmem:[#allocation9_spill] sm:$0xff] %v6236_v36  ;;  %4586 = vmatmul.mubr.msk.bf16.gmra.mxu1 %vm941_vm6, %v5797_v49  ;;  %4822 = vmatmul.mubr.msk.bf16.gmra.mxu0 %vm941_vm6, %v5865_v45 }
 0x1c1   :  { %4589 = vmatprep.mubr.msk.bf16.mxu1 %vm5576_vm0, %v7775_v0  ;;  %4825 = vmatprep.mubr.msk.bf16.mxu0 %vm5576_vm0, %v7775_v0  ;;  %v891_v38 = vsel %vm641_vm7, %v6197_v43, %v3889_v52 }
 0x1c2   :  { %v5407_v39 = vpop.eup %5406 }
 0x1c3   :  { %v3890_v57 = vadd.f32 -1.0, %v5407_v39 }
 0x1c5   :  { %v892_v58 = vsel %vm642_vm8, %v584_v46, %v3890_v57 }
 0x1c6   :  { %v5409_v37 = vpop.eup %5408  ;;  %v6248_v5 = vpack.c.bf16 %v892_v58, %v891_v38 }
 0x1c7   :  { %v3891_v49 = vadd.f32 -1.0, %v5409_v37 }
 0x1c8   :  { %7778 = vst [vmem:[#allocation10_spill] sm:$0xff] %v6248_v5  ;;  %4590 = vmatmul.mubr.msk.bf16.gmra.mxu1 %vm941_vm6, %v5820_v3  ;;  %4826 = vmatmul.mubr.msk.bf16.gmra.mxu0 %vm941_vm6, %v5888_v63 }
 0x1c9   :  { %4593 = vmatprep.mubr.msk.bf16.mxu1 %vm5576_vm0, %v7775_v0  ;;  %4829 = vmatprep.mubr.msk.bf16.mxu0 %vm5576_vm0, %v7775_v0  ;;  %v6258_v60 = vsel %vm643_vm9, %v589_v29, %v3891_v49 }
 0x1ca   :  { %v5411_v43 = vpop.eup %5410 }
 0x1cb   :  { %v3892_v53 = vadd.f32 -1.0, %v5411_v43 }
 0x1cd   :  { %v6261_v13 = vsel %vm644_vm10, %v592_v10, %v3892_v53 }
 0x1d0   :  { %4594 = vmatmul.mubr.msk.bf16.gmra.mxu1 %vm941_vm6, %v5842_v24  ;;  %4830 = vmatmul.mubr.msk.bf16.gmra.mxu0 %vm941_vm6, %v5910_v21 }
 0x1d1   :  { %4597 = vmatprep.mubr.msk.bf16.mxu1 %vm5576_vm0, %v7775_v0  ;;  %4833 = vmatprep.mubr.msk.bf16.mxu0 %vm5576_vm0, %v7775_v0 }
 0x1d8   :  { %v6274_v16 = vpop.f32.mrf.mxu1  ;;  %4598 = vmatmul.mubr.msk.bf16.gmra.mxu1 %vm941_vm6, %v5865_v45  ;;  %4834 = vmatmul.mubr.msk.bf16.gmra.mxu0 %vm941_vm6, %v5932_v41 }
 0x1d9   :  { %4601 = vmatprep.mubr.msk.bf16.mxu1 %vm5576_vm0, %v7775_v0  ;;  %4837 = vmatprep.mubr.msk.bf16.mxu0 %vm5576_vm0, %v7775_v0 }
 0x1da   :  { %v4499_v18 = vpop.f32.mrf.mxu1 }
 0x1dc   :  { %v6284_v46 = vpop.f32.mrf.mxu1 }
 0x1de   :  { %v4500_v62 = vpop.f32.mrf.mxu1 }
 0x1e0   :  { %v6286_v22 = vpop.f32.mrf.mxu1  ;;  %4602 = vmatmul.mubr.msk.bf16.gmra.mxu1 %vm941_vm6, %v5888_v63  ;;  %v6290_v14 = vpop.f32.mrf.mxu0  ;;  %4838 = vmatmul.mubr.msk.bf16.gmra.mxu0 %vm941_vm6, %v5954_v61 }
 0x1e1   :  { %4605 = vmatprep.mubr.msk.bf16.mxu1 %vm5576_vm0, %v7775_v0  ;;  %4841 = vmatprep.mubr.msk.bf16.mxu0 %vm5576_vm0, %v7775_v0 }
 0x1e2   :  { %v4503_v59 = vpop.f32.mrf.mxu1  ;;  %v4659_v8 = vpop.f32.mrf.mxu0 }
 0x1e4   :  { %v6298_v9 = vpop.f32.mrf.mxu1  ;;  %v6300_v12 = vpop.f32.mrf.mxu0 }
 0x1e6   :  { %v4504_v6 = vpop.f32.mrf.mxu1  ;;  %v4660_v29 = vpop.f32.mrf.mxu0 }
 0x1e8   :  { %v6302_v11 = vpop.f32.mrf.mxu1  ;;  %4606 = vmatmul.mubr.msk.bf16.gmra.mxu1 %vm941_vm6, %v5910_v21  ;;  %v6306_v28 = vpop.f32.mrf.mxu0  ;;  %4842 = vmatmul.mubr.msk.bf16.gmra.mxu0 %vm941_vm6, %v5976_v20 }
 0x1e9   :  { %4609 = vmatprep.mubr.msk.bf16.mxu1 %vm5576_vm0, %v7775_v0  ;;  %4845 = vmatprep.mubr.msk.bf16.mxu0 %vm5576_vm0, %v7775_v0 }
 0x1ea   :  { %v4507_v31 = vpop.f32.mrf.mxu1  ;;  %v4663_v35 = vpop.f32.mrf.mxu0 }
 0x1ec   :  { %v6314_v27 = vpop.f32.mrf.mxu1  ;;  %v6316_v40 = vpop.f32.mrf.mxu0 }
 0x1ee   :  { %v4508_v44 = vpop.f32.mrf.mxu1  ;;  %v4664_v10 = vpop.f32.mrf.mxu0 }
 0x1f0   :  { %v6318_v26 = vpop.f32.mrf.mxu1  ;;  %4610 = vmatmul.mubr.msk.bf16.gmra.mxu1 %vm941_vm6, %v5932_v41  ;;  %v6322_v47 = vpop.f32.mrf.mxu0  ;;  %4846 = vmatmul.mubr.msk.bf16.gmra.mxu0 %vm941_vm6, %v5998_v42 }
 0x1f1   :  { %4613 = vmatprep.mubr.msk.bf16.mxu1 %vm5576_vm0, %v7775_v0  ;;  %4849 = vmatprep.mubr.msk.bf16.mxu0 %vm5576_vm0, %v7775_v0 }
 0x1f2   :  { %v4511_v50 = vpop.f32.mrf.mxu1  ;;  %v4667_v33 = vpop.f32.mrf.mxu0 }
 0x1f4   :  { %v6330_v30 = vpop.f32.mrf.mxu1  ;;  %v6332_v51 = vpop.f32.mrf.mxu0 }
 0x1f6   :  { %v4512_v32 = vpop.f32.mrf.mxu1  ;;  %v4668_v25 = vpop.f32.mrf.mxu0 }
 0x1f8   :  { %v6334_v52 = vpop.f32.mrf.mxu1  ;;  %4614 = vmatmul.mubr.msk.bf16.gmra.mxu1 %vm941_vm6, %v5954_v61  ;;  %v6338_v39 = vpop.f32.mrf.mxu0  ;;  %4850 = vmatmul.mubr.msk.bf16.gmra.mxu0 %vm941_vm6, %v6020_v1 }
 0x1f9   :  { %4617 = vmatprep.mubr.msk.bf16.mxu1 %vm5576_vm0, %v7775_v0  ;;  %4853 = vmatprep.mubr.msk.bf16.mxu0 %vm5576_vm0, %v7775_v0 }
 0x1fa   :  { %v4515_v38 = vpop.f32.mrf.mxu1  ;;  %v4671_v57 = vpop.f32.mrf.mxu0 }
 0x1fc   :  { %v6346_v58 = vpop.f32.mrf.mxu1  ;;  %v6348_v37 = vpop.f32.mrf.mxu0 }
 0x1fe   :  { %v4516_v49 = vpop.f32.mrf.mxu1  ;;  %v4672_v56 = vpop.f32.mrf.mxu0 }
 0x200   :  { %v6350_v43 = vpop.f32.mrf.mxu1  ;;  %4618 = vmatmul.mubr.msk.bf16.gmra.mxu1 %vm941_vm6, %v5976_v20  ;;  %v6354_v53 = vpop.f32.mrf.mxu0  ;;  %4854 = vmatmul.mubr.msk.bf16.gmra.mxu0 %vm941_vm6, %v6042_v17 }
 0x201   :  { %4621 = vmatprep.mubr.msk.bf16.mxu1 %vm5576_vm0, %v7775_v0  ;;  %4857 = vmatprep.mubr.msk.bf16.mxu0 %vm5576_vm0, %v7775_v0 }
 0x202   :  { %v4519_v7 = vpop.f32.mrf.mxu1  ;;  %v4675_v18 = vpop.f32.mrf.mxu0 }
 0x204   :  { %v6362_v62 = vpop.f32.mrf.mxu1  ;;  %v6364_v59 = vpop.f32.mrf.mxu0 }
 0x206   :  { %v4520_v8 = vpop.f32.mrf.mxu1  ;;  %v4676_v6 = vpop.f32.mrf.mxu0 }
 0x208   :  { %v6366_v29 = vpop.f32.mrf.mxu1  ;;  %4622 = vmatmul.mubr.msk.bf16.gmra.mxu1 %vm941_vm6, %v5998_v42  ;;  %v6370_v31 = vpop.f32.mrf.mxu0  ;;  %4858 = vmatmul.mubr.msk.bf16.gmra.mxu0 %vm941_vm6, %v6064_v34 }
 0x209   :  { %7779 = vst [vmem:[#allocation11_spill] sm:$0xff] %v6366_v29  ;;  %7780 = vst [vmem:[#allocation12_spill] sm:$0xff] %v6370_v31  ;;  %4625 = vmatprep.mubr.msk.bf16.mxu1 %vm5576_vm0, %v7775_v0  ;;  %4861 = vmatprep.mubr.msk.bf16.mxu0 %vm5576_vm0, %v7775_v0 }
 0x20a   :  { %v4523_v35 = vpop.f32.mrf.mxu1  ;;  %v4679_v44 = vpop.f32.mrf.mxu0 }
 0x20c   :  { %v6378_v10 = vpop.f32.mrf.mxu1  ;;  %v6380_v50 = vpop.f32.mrf.mxu0 }
 0x20d   :  { %7781 = vst [vmem:[#allocation13_spill] sm:$0xff] %v6378_v10  ;;  %7782 = vst [vmem:[#allocation14_spill] sm:$0xff] %v6380_v50 }
 0x20e   :  { %v4524_v33 = vpop.f32.mrf.mxu1  ;;  %v4680_v32 = vpop.f32.mrf.mxu0 }
 0x210   :  { %v6382_v25 = vpop.f32.mrf.mxu1  ;;  %4626 = vmatmul.mubr.msk.bf16.gmra.mxu1 %vm941_vm6, %v6020_v1  ;;  %v6386_v38 = vpop.f32.mrf.mxu0  ;;  %4862 = vmatmul.mubr.msk.bf16.gmra.mxu0 %vm941_vm6, %v6086_v2 }
 0x211   :  { %7783 = vst [vmem:[#allocation15_spill] sm:$0xff] %v6382_v25  ;;  %7784 = vst [vmem:[#allocation16_spill] sm:$0xff] %v6386_v38  ;;  %4629 = vmatprep.mubr.msk.bf16.mxu1 %vm5576_vm0, %v7775_v0  ;;  %4865 = vmatprep.mubr.msk.bf16.mxu0 %vm5576_vm0, %v7775_v0 }
 0x212   :  { %v4527_v57 = vpop.f32.mrf.mxu1  ;;  %v4683_v49 = vpop.f32.mrf.mxu0 }
 0x214   :  { %v6394_v56 = vpop.f32.mrf.mxu1  ;;  %v6396_v7 = vpop.f32.mrf.mxu0 }
 0x215   :  { %7785 = vst [vmem:[#allocation17_spill] sm:$0xff] %v6394_v56  ;;  %7786 = vst [vmem:[#allocation18_spill] sm:$0xff] %v6396_v7 }
 0x216   :  { %v4528_v18 = vpop.f32.mrf.mxu1  ;;  %v4684_v8 = vpop.f32.mrf.mxu0 }
 0x218   :  { %v6398_v6 = vpop.f32.mrf.mxu1  ;;  %4630 = vmatmul.mubr.msk.bf16.gmra.mxu1 %vm941_vm6, %v6042_v17  ;;  %v6402_v35 = vpop.f32.mrf.mxu0  ;;  %4866 = vmatmul.mubr.msk.bf16.gmra.mxu0 %vm941_vm6, %v6108_v23 }
 0x219   :  { %7787 = vst [vmem:[#allocation19_spill] sm:$0xff] %v6398_v6  ;;  %7788 = vst [vmem:[#allocation20_spill] sm:$0xff] %v6402_v35  ;;  %4633 = vmatprep.mubr.msk.bf16.mxu1 %vm5576_vm0, %v7775_v0  ;;  %4869 = vmatprep.mubr.msk.bf16.mxu0 %vm5576_vm0, %v7775_v0 }
 0x21a   :  { %v4531_v44 = vpop.f32.mrf.mxu1  ;;  %v4687_v33 = vpop.f32.mrf.mxu0 }
 0x21c   :  { %v6410_v32 = vpop.f32.mrf.mxu1  ;;  %v6412_v57 = vpop.f32.mrf.mxu0 }
 0x21d   :  { %7789 = vst [vmem:[#allocation21_spill] sm:$0xff] %v6410_v32  ;;  %7790 = vst [vmem:[#allocation22_spill] sm:$0xff] %v6412_v57 }
 0x21e   :  { %v4532_v49 = vpop.f32.mrf.mxu1  ;;  %v4688_v18 = vpop.f32.mrf.mxu0 }
 0x220   :  { %v6414_v8 = vpop.f32.mrf.mxu1  ;;  %4634 = vmatmul.mubr.msk.bf16.gmra.mxu1 %vm941_vm6, %v6064_v34  ;;  %v6418_v4 = vpop.f32.mrf.mxu0  ;;  %4870 = vmatmul.mubr.msk.bf16.gmra.mxu0 %vm941_vm6, %v6130_v55 }
 0x221   :  { %7791 = vst [vmem:[#allocation23_spill] sm:$0xff] %v6414_v8  ;;  %7792 = vst [vmem:[#allocation24_spill] sm:$0xff] %v6418_v4  ;;  %4637 = vmatprep.mubr.msk.bf16.mxu1 %vm5576_vm0, %v7775_v0  ;;  %4873 = vmatprep.mubr.msk.bf16.mxu0 %vm5576_vm0, %v7775_v0 }
 0x222   :  { %v4535_v44 = vpop.f32.mrf.mxu1  ;;  %v4691_v33 = vpop.f32.mrf.mxu0 }
 0x224   :  { %v6426_v49 = vpop.f32.mrf.mxu1  ;;  %v6428_v18 = vpop.f32.mrf.mxu0 }
 0x225   :  { %7793 = vst [vmem:[#allocation25_spill] sm:$0xff] %v6426_v49  ;;  %7794 = vst [vmem:[#allocation26_spill] sm:$0xff] %v6428_v18 }
 0x226   :  { %v4536_v8 = vpop.f32.mrf.mxu1  ;;  %v4692_v32 = vpop.f32.mrf.mxu0 }
 0x228   :  { %v6430_v57 = vpop.f32.mrf.mxu1  ;;  %4638 = vmatmul.mubr.msk.bf16.gmra.mxu1 %vm941_vm6, %v6086_v2  ;;  %v6434_v4 = vpop.f32.mrf.mxu0  ;;  %4874 = vmatmul.mubr.msk.bf16.gmra.mxu0 %vm941_vm6, %v6152_v19 }
 0x229   :  { %7795 = vst [vmem:[#allocation27_spill] sm:$0xff] %v6430_v57  ;;  %7796 = vst [vmem:[#allocation28_spill] sm:$0xff] %v6434_v4  ;;  %4641 = vmatprep.mubr.msk.bf16.mxu1 %vm5576_vm0, %v7775_v0  ;;  %4877 = vmatprep.mubr.msk.bf16.mxu0 %vm5576_vm0, %v7775_v0 }
 0x22a   :  { %v4539_v44 = vpop.f32.mrf.mxu1  ;;  %v4695_v33 = vpop.f32.mrf.mxu0 }
 0x22c   :  { %v6442_v8 = vpop.f32.mrf.mxu1  ;;  %v6444_v32 = vpop.f32.mrf.mxu0 }
 0x22d   :  { %7797 = vst [vmem:[#allocation29_spill] sm:$0xff] %v6442_v8  ;;  %7798 = vst [vmem:[#allocation30_spill] sm:$0xff] %v6444_v32 }
 0x22e   :  { %v4540_v57 = vpop.f32.mrf.mxu1  ;;  %v4696_v49 = vpop.f32.mrf.mxu0 }
 0x230   :  { %v6446_v18 = vpop.f32.mrf.mxu1  ;;  %4642 = vmatmul.mubr.msk.bf16.gmra.mxu1 %vm941_vm6, %v6108_v23  ;;  %v6450_v4 = vpop.f32.mrf.mxu0  ;;  %4878 = vmatmul.mubr.msk.bf16.gmra.mxu0 %vm941_vm6, %v6179_v48 }
 0x231   :  { %7799 = vst [vmem:[#allocation31_spill] sm:$0xff] %v6446_v18  ;;  %7800 = vst [vmem:[#allocation32_spill] sm:$0xff] %v6450_v4  ;;  %4645 = vmatprep.mubr.msk.bf16.mxu1 %vm5576_vm0, %v7775_v0  ;;  %4881 = vmatprep.mubr.msk.bf16.mxu0 %vm5576_vm0, %v7775_v0 }
 0x232   :  { %v4543_v44 = vpop.f32.mrf.mxu1  ;;  %v4699_v33 = vpop.f32.mrf.mxu0 }
 0x234   :  { %v6458_v57 = vpop.f32.mrf.mxu1  ;;  %v6460_v49 = vpop.f32.mrf.mxu0 }
 0x235   :  { %7801 = vst [vmem:[#allocation33_spill] sm:$0xff] %v6458_v57  ;;  %7802 = vst [vmem:[#allocation34_spill] sm:$0xff] %v6460_v49 }
 0x236   :  { %v4544_v18 = vpop.f32.mrf.mxu1  ;;  %v4700_v8 = vpop.f32.mrf.mxu0 }
 0x238   :  { %v6462_v32 = vpop.f32.mrf.mxu1  ;;  %4646 = vmatmul.mubr.msk.bf16.gmra.mxu1 %vm941_vm6, %v6130_v55  ;;  %v6466_v4 = vpop.f32.mrf.mxu0  ;;  %4882 = vmatmul.mubr.msk.bf16.gmra.mxu0 %vm941_vm6, %v6201_v54 }
 0x239   :  { %7803 = vst [vmem:[#allocation35_spill] sm:$0xff] %v6462_v32  ;;  %7804 = vst [vmem:[#allocation36_spill] sm:$0xff] %v6466_v4  ;;  %4649 = vmatprep.mubr.msk.bf16.mxu1 %vm5576_vm0, %v7775_v0  ;;  %4885 = vmatprep.mubr.msk.bf16.mxu0 %vm5576_vm0, %v7775_v0 }
 0x23a   :  { %v4547_v44 = vpop.f32.mrf.mxu1  ;;  %v4703_v33 = vpop.f32.mrf.mxu0 }
 0x23c   :  { %v6474_v18 = vpop.f32.mrf.mxu1  ;;  %v6476_v8 = vpop.f32.mrf.mxu0 }
 0x23d   :  { %7805 = vst [vmem:[#allocation37_spill] sm:$0xff] %v6474_v18  ;;  %7806 = vst [vmem:[#allocation38_spill] sm:$0xff] %v6476_v8 }
 0x23e   :  { %v4548_v32 = vpop.f32.mrf.mxu1  ;;  %v4704_v57 = vpop.f32.mrf.mxu0 }
 0x240   :  { %v6478_v49 = vpop.f32.mrf.mxu1  ;;  %4650 = vmatmul.mubr.msk.bf16.gmra.mxu1 %vm941_vm6, %v6152_v19  ;;  %v6482_v4 = vpop.f32.mrf.mxu0  ;;  %4886 = vmatmul.mubr.msk.bf16.gmra.mxu0 %vm941_vm6, %v6220_v15 }
 0x241   :  { %7807 = vst [vmem:[#allocation39_spill] sm:$0xff] %v6478_v49  ;;  %7808 = vst [vmem:[#allocation40_spill] sm:$0xff] %v6482_v4  ;;  %4737 = vmatprep.mubr.msk.bf16.mxu1 %vm5576_vm0, %v7775_v0  ;;  %4889 = vmatprep.mubr.msk.bf16.mxu0 %vm5576_vm0, %v7775_v0  ;;  %v5290_v49 = vld [vmem:[#allocation4 + $0x58] sm:$0xff]  }
 0x242   :  { %v4551_v44 = vpop.f32.mrf.mxu1  ;;  %v4707_v33 = vpop.f32.mrf.mxu0 }
 0x243   :  { %v5293_v44 = vld [vmem:[#allocation4 + $0x50] sm:$0xff]  }
 0x244   :  { %v6490_v32 = vpop.f32.mrf.mxu1  ;;  %v6492_v57 = vpop.f32.mrf.mxu0 }
 0x245   :  { %7809 = vst [vmem:[#allocation41_spill] sm:$0xff] %v6490_v32  ;;  %7810 = vst [vmem:[#allocation42_spill] sm:$0xff] %v6492_v57 }
 0x246   :  { %v4552_v18 = vpop.f32.mrf.mxu1  ;;  %v4708_v8 = vpop.f32.mrf.mxu0 }
 0x248   :  { %v6494_v6 = vpop.f32.mrf.mxu1  ;;  %v6496_v4 = vpop.f32.mrf.mxu0  ;;  %4738 = vmatmul.mubr.msk.bf16.vlgmr.msra.gmra.mxu1 %vm941_vm6, %v5820_v3  ;;  %4890 = vmatmul.mubr.msk.bf16.gmra.mxu0 %vm941_vm6, %v6236_v36 }
 0x249   :  { %7811 = vst [vmem:[#allocation43_spill] sm:$0xff] %v6494_v6  ;;  %7812 = vst [vmem:[#allocation44_spill] sm:$0xff] %v6496_v4  ;;  %4894 = vmatpush3.bf16.msra.mxu1 %v5290_v49  ;;  %4741 = vmatprep.mubr.msk.bf16.mxu1 %vm5576_vm0, %v7775_v0 }
 0x24a   :  { %v4555_v33 = vpop.f32.mrf.mxu1  ;;  %v4711_v32 = vpop.f32.mrf.mxu0  ;;  %4977 = vmatprep.mubr.msk.bf16.mxu0 %vm5576_vm0, %v7775_v0  ;;  %4895 = vmatprep.subr.bf16.mxu1 %v7775_v0 }
 0x24c   :  { %v6507_v18 = vpop.f32.mrf.mxu1  ;;  %v6509_v8 = vpop.f32.mrf.mxu0 }
 0x24d   :  { %7813 = vst [vmem:[#allocation45_spill] sm:$0xff] %v6507_v18  ;;  %7814 = vst [vmem:[#allocation46_spill] sm:$0xff] %v6509_v8  ;;  %4896 = vmatpush3.bf16.msra.mxu1 %v5293_v44 }
 0x24e   :  { %v4556_v3 = vpop.f32.mrf.mxu1  ;;  %v4712_v6 = vpop.f32.mrf.mxu0  ;;  %5053 = vmatprep.subr.bf16.mxu1 %v7775_v0 }
 0x250   :  { %v6512_v49 = vpop.f32.mrf.mxu1  ;;  %v6514_v4 = vpop.f32.mrf.mxu0  ;;  %4742 = vmatmul.mubr.msk.bf16.gmra.mxu1 %vm941_vm6, %v5842_v24  ;;  %4978 = vmatmul.mubr.msk.bf16.vlgmr.msra.gmra.mxu0 %vm941_vm6, %v5888_v63 }
 0x251   :  { %7815 = vst [vmem:[#allocation47_spill] sm:$0xff] %v6512_v49  ;;  %7816 = vst [vmem:[#allocation48_spill] sm:$0xff] %v6514_v4  ;;  %4745 = vmatprep.mubr.msk.bf16.mxu1 %vm5576_vm0, %v7775_v0  ;;  %4981 = vmatprep.mubr.msk.bf16.mxu0 %vm5576_vm0, %v7775_v0 }
 0x252   :  { %v4559_v32 = vpop.f32.mrf.mxu1  ;;  %v4715_v6 = vpop.f32.mrf.mxu0 }
 0x254   :  { %v6524_v44 = vpop.f32.mrf.mxu1  ;;  %v6526_v33 = vpop.f32.mrf.mxu0 }
 0x255   :  { %7817 = vst [vmem:[#allocation49_spill] sm:$0xff] %v6524_v44  ;;  %7818 = vst [vmem:[#allocation50_spill] sm:$0xff] %v6526_v33 }
 0x256   :  { %v4560_v3 = vpop.f32.mrf.mxu1  ;;  %v4716_v49 = vpop.f32.mrf.mxu0 }
 0x258   :  { %v6528_v4 = vpop.f32.mrf.mxu1  ;;  %v6530_v24 = vpop.f32.mrf.mxu0  ;;  %4746 = vmatmul.mubr.msk.bf16.gmra.mxu1 %vm941_vm6, %v5865_v45  ;;  %4982 = vmatmul.mubr.msk.bf16.gmra.mxu0 %vm941_vm6, %v5910_v21 }
 0x259   :  { %7819 = vst [vmem:[#allocation51_spill] sm:$0xff] %v6528_v4  ;;  %7820 = vst [vmem:[#allocation52_spill] sm:$0xff] %v6530_v24  ;;  %4749 = vmatprep.mubr.msk.bf16.mxu1 %vm5576_vm0, %v7775_v0  ;;  %4985 = vmatprep.mubr.msk.bf16.mxu0 %vm5576_vm0, %v7775_v0 }
 0x25a   :  { %v4563_v32 = vpop.f32.mrf.mxu1  ;;  %v4719_v6 = vpop.f32.mrf.mxu0 }
 0x25c   :  { %v6540_v3 = vpop.f32.mrf.mxu1  ;;  %v6542_v49 = vpop.f32.mrf.mxu0 }
 0x25d   :  { %7821 = vst [vmem:[#allocation53_spill] sm:$0xff] %v6540_v3  ;;  %7822 = vst [vmem:[#allocation54_spill] sm:$0xff] %v6542_v49 }
 0x25e   :  { %v4564_v4 = vpop.f32.mrf.mxu1  ;;  %v4720_v24 = vpop.f32.mrf.mxu0 }
 0x260   :  { %v6544_v44 = vpop.f32.mrf.mxu1  ;;  %v6546_v33 = vpop.f32.mrf.mxu0  ;;  %4750 = vmatmul.mubr.msk.bf16.gmra.mxu1 %vm941_vm6, %v5888_v63  ;;  %4986 = vmatmul.mubr.msk.bf16.gmra.mxu0 %vm941_vm6, %v5932_v41 }
 0x261   :  { %7823 = vst [vmem:[#allocation55_spill] sm:$0xff] %v6544_v44  ;;  %7824 = vst [vmem:[#allocation56_spill] sm:$0xff] %v6546_v33  ;;  %4753 = vmatprep.mubr.msk.bf16.mxu1 %vm5576_vm0, %v7775_v0  ;;  %4989 = vmatprep.mubr.msk.bf16.mxu0 %vm5576_vm0, %v7775_v0 }
 0x262   :  { %v4567_v32 = vpop.f32.mrf.mxu1  ;;  %v4723_v6 = vpop.f32.mrf.mxu0 }
 0x264   :  { %v6556_v4 = vpop.f32.mrf.mxu1  ;;  %v6558_v24 = vpop.f32.mrf.mxu0 }
 0x265   :  { %7825 = vst [vmem:[#allocation57_spill] sm:$0xff] %v6556_v4  ;;  %7826 = vst [vmem:[#allocation58_spill] sm:$0xff] %v6558_v24 }
 0x266   :  { %v4568_v44 = vpop.f32.mrf.mxu1  ;;  %v4724_v33 = vpop.f32.mrf.mxu0 }
 0x268   :  { %v6560_v3 = vpop.f32.mrf.mxu1  ;;  %v6562_v49 = vpop.f32.mrf.mxu0  ;;  %4754 = vmatmul.mubr.msk.bf16.gmra.mxu1 %vm941_vm6, %v5910_v21  ;;  %4990 = vmatmul.mubr.msk.bf16.gmra.mxu0 %vm941_vm6, %v5954_v61 }
 0x269   :  { %7827 = vst [vmem:[#allocation59_spill] sm:$0xff] %v6560_v3  ;;  %7828 = vst [vmem:[#allocation60_spill] sm:$0xff] %v6562_v49  ;;  %4757 = vmatprep.mubr.msk.bf16.mxu1 %vm5576_vm0, %v7775_v0  ;;  %4993 = vmatprep.mubr.msk.bf16.mxu0 %vm5576_vm0, %v7775_v0 }
 0x26a   :  { %v4571_v32 = vpop.f32.mrf.mxu1  ;;  %v4727_v6 = vpop.f32.mrf.mxu0 }
 0x26c   :  { %v6572_v44 = vpop.f32.mrf.mxu1  ;;  %v6574_v33 = vpop.f32.mrf.mxu0 }
 0x26d   :  { %7829 = vst [vmem:[#allocation61_spill] sm:$0xff] %v6572_v44  ;;  %7830 = vst [vmem:[#allocation62_spill] sm:$0xff] %v6574_v33 }
 0x26e   :  { %v4572_v3 = vpop.f32.mrf.mxu1  ;;  %v4728_v49 = vpop.f32.mrf.mxu0 }
 0x270   :  { %v6576_v4 = vpop.f32.mrf.mxu1  ;;  %v6578_v24 = vpop.f32.mrf.mxu0  ;;  %4758 = vmatmul.mubr.msk.bf16.gmra.mxu1 %vm941_vm6, %v5932_v41  ;;  %4994 = vmatmul.mubr.msk.bf16.gmra.mxu0 %vm941_vm6, %v5976_v20 }
 0x271   :  { %7831 = vst [vmem:[#allocation63_spill] sm:$0xff] %v6578_v24  ;;  %4761 = vmatprep.mubr.msk.bf16.mxu1 %vm5576_vm0, %v7775_v0  ;;  %4997 = vmatprep.mubr.msk.bf16.mxu0 %vm5576_vm0, %v7775_v0 }
 0x272   :  { %v4579_v32 = vpop.f32.mrf.mxu1  ;;  %v4731_v6 = vpop.f32.mrf.mxu0 }
 0x274   :  { %v6588_v3 = vpop.f32.mrf.mxu1  ;;  %v6590_v49 = vpop.f32.mrf.mxu0 }
 0x275   :  { %7832 = vst [vmem:[#allocation64_spill] sm:$0xff] %v6590_v49 }
 0x276   :  { %v4580_v44 = vpop.f32.mrf.mxu1  ;;  %v4732_v24 = vpop.f32.mrf.mxu0 }
 0x278   :  { %v6592_v33 = vpop.f32.mrf.mxu1  ;;  %4762 = vmatmul.mubr.msk.bf16.gmra.mxu1 %vm941_vm6, %v5954_v61  ;;  %v6596_v18 = vpop.f32.mrf.mxu0  ;;  %4998 = vmatmul.mubr.msk.bf16.gmra.mxu0 %vm941_vm6, %v5998_v42 }
 0x279   :  { %7833 = vst [vmem:[#allocation65_spill] sm:$0xff] %v6596_v18  ;;  %4765 = vmatprep.mubr.msk.bf16.mxu1 %vm5576_vm0, %v7775_v0  ;;  %5001 = vmatprep.mubr.msk.bf16.mxu0 %vm5576_vm0, %v7775_v0 }
 0x27a   :  { %v4583_v32 = vpop.f32.mrf.mxu1  ;;  %v4819_v6 = vpop.f32.mrf.mxu0 }
 0x27c   :  { %v6604_v44 = vpop.f32.mrf.mxu1  ;;  %v6606_v24 = vpop.f32.mrf.mxu0 }
 0x27d   :  { %7834 = vst [vmem:[#allocation66_spill] sm:$0xff] %v6606_v24 }
 0x27e   :  { %v4584_v49 = vpop.f32.mrf.mxu1  ;;  %v4820_v8 = vpop.f32.mrf.mxu0 }
 0x280   :  { %v6608_v57 = vpop.f32.mrf.mxu1  ;;  %4766 = vmatmul.mubr.msk.bf16.gmra.mxu1 %vm941_vm6, %v5976_v20  ;;  %v6612_v18 = vpop.f32.mrf.mxu0  ;;  %5002 = vmatmul.mubr.msk.bf16.gmra.mxu0 %vm941_vm6, %v6020_v1 }
 0x281   :  { %7835 = vst [vmem:[#allocation67_spill] sm:$0xff] %v6612_v18  ;;  %4769 = vmatprep.mubr.msk.bf16.mxu1 %vm5576_vm0, %v7775_v0  ;;  %5005 = vmatprep.mubr.msk.bf16.mxu0 %vm5576_vm0, %v7775_v0 }
 0x282   :  { %v4587_v32 = vpop.f32.mrf.mxu1  ;;  %v4823_v6 = vpop.f32.mrf.mxu0 }
 0x284   :  { %v6620_v49 = vpop.f32.mrf.mxu1  ;;  %v6622_v8 = vpop.f32.mrf.mxu0 }
 0x285   :  { %7836 = vst [vmem:[#allocation68_spill] sm:$0xff] %v6622_v8 }
 0x286   :  { %v4588_v24 = vpop.f32.mrf.mxu1  ;;  %v4824_v35 = vpop.f32.mrf.mxu0 }
 0x288   :  { %v6624_v56 = vpop.f32.mrf.mxu1  ;;  %4770 = vmatmul.mubr.msk.bf16.gmra.mxu1 %vm941_vm6, %v5998_v42  ;;  %v6628_v18 = vpop.f32.mrf.mxu0  ;;  %5006 = vmatmul.mubr.msk.bf16.gmra.mxu0 %vm941_vm6, %v6042_v17 }
 0x289   :  { %7837 = vst [vmem:[#allocation69_spill] sm:$0xff] %v6628_v18  ;;  %4773 = vmatprep.mubr.msk.bf16.mxu1 %vm5576_vm0, %v7775_v0  ;;  %5009 = vmatprep.mubr.msk.bf16.mxu0 %vm5576_vm0, %v7775_v0 }
 0x28a   :  { %v4591_v32 = vpop.f32.mrf.mxu1  ;;  %v4827_v6 = vpop.f32.mrf.mxu0 }
 0x28c   :  { %v6636_v24 = vpop.f32.mrf.mxu1  ;;  %v6638_v35 = vpop.f32.mrf.mxu0 }
 0x28d   :  { %7838 = vst [vmem:[#allocation70_spill] sm:$0xff] %v6638_v35 }
 0x28e   :  { %v4592_v8 = vpop.f32.mrf.mxu1  ;;  %v4828_v7 = vpop.f32.mrf.mxu0 }
 0x290   :  { %v6640_v25 = vpop.f32.mrf.mxu1  ;;  %4774 = vmatmul.mubr.msk.bf16.gmra.mxu1 %vm941_vm6, %v6020_v1  ;;  %v6644_v18 = vpop.f32.mrf.mxu0  ;;  %5010 = vmatmul.mubr.msk.bf16.gmra.mxu0 %vm941_vm6, %v6064_v34 }
 0x291   :  { %7839 = vst [vmem:[#allocation71_spill] sm:$0xff] %v6644_v18  ;;  %4777 = vmatprep.mubr.msk.bf16.mxu1 %vm5576_vm0, %v7775_v0  ;;  %5013 = vmatprep.mubr.msk.bf16.mxu0 %vm5576_vm0, %v7775_v0 }
 0x292   :  { %v4595_v32 = vpop.f32.mrf.mxu1  ;;  %v4831_v6 = vpop.f32.mrf.mxu0 }
 0x294   :  { %v6652_v8 = vpop.f32.mrf.mxu1  ;;  %v6654_v7 = vpop.f32.mrf.mxu0 }
 0x295   :  { %7840 = vst [vmem:[#allocation72_spill] sm:$0xff] %v6654_v7 }
 0x296   :  { %v4596_v35 = vpop.f32.mrf.mxu1  ;;  %v4832_v38 = vpop.f32.mrf.mxu0 }
 0x298   :  { %v6656_v10 = vpop.f32.mrf.mxu1  ;;  %4778 = vmatmul.mubr.msk.bf16.gmra.mxu1 %vm941_vm6, %v6042_v17  ;;  %v6660_v18 = vpop.f32.mrf.mxu0  ;;  %5014 = vmatmul.mubr.msk.bf16.gmra.mxu0 %vm941_vm6, %v6086_v2 }
 0x299   :  { %7841 = vst [vmem:[#allocation73_spill] sm:$0xff] %v6660_v18  ;;  %4781 = vmatprep.mubr.msk.bf16.mxu1 %vm5576_vm0, %v7775_v0  ;;  %5017 = vmatprep.mubr.msk.bf16.mxu0 %vm5576_vm0, %v7775_v0 }
 0x29a   :  { %v4599_v32 = vpop.f32.mrf.mxu1  ;;  %v4835_v6 = vpop.f32.mrf.mxu0 }
 0x29c   :  { %v6668_v35 = vpop.f32.mrf.mxu1  ;;  %v6670_v38 = vpop.f32.mrf.mxu0 }
 0x29d   :  { %7842 = vst [vmem:[#allocation74_spill] sm:$0xff] %v6670_v38 }
 0x29e   :  { %v4600_v7 = vpop.f32.mrf.mxu1  ;;  %v4836_v50 = vpop.f32.mrf.mxu0 }
 0x2a0   :  { %v6672_v29 = vpop.f32.mrf.mxu1  ;;  %4782 = vmatmul.mubr.msk.bf16.gmra.mxu1 %vm941_vm6, %v6064_v34  ;;  %v6676_v18 = vpop.f32.mrf.mxu0  ;;  %5018 = vmatmul.mubr.msk.bf16.gmra.mxu0 %vm941_vm6, %v6108_v23 }
 0x2a1   :  { %7843 = vst [vmem:[#allocation75_spill] sm:$0xff] %v6672_v29  ;;  %7844 = vst [vmem:[#allocation76_spill] sm:$0xff] %v6676_v18  ;;  %4785 = vmatprep.mubr.msk.bf16.mxu1 %vm5576_vm0, %v7775_v0  ;;  %5021 = vmatprep.mubr.msk.bf16.mxu0 %vm5576_vm0, %v7775_v0 }
 0x2a2   :  { %v4603_v32 = vpop.f32.mrf.mxu1  ;;  %v4839_v6 = vpop.f32.mrf.mxu0 }
 0x2a4   :  { %v6684_v7 = vpop.f32.mrf.mxu1  ;;  %v6686_v50 = vpop.f32.mrf.mxu0 }
 0x2a5   :  { %7845 = vst [vmem:[#allocation77_spill] sm:$0xff] %v6684_v7  ;;  %7846 = vst [vmem:[#allocation78_spill] sm:$0xff] %v6686_v50 }
 0x2a6   :  { %v4604_v38 = vpop.f32.mrf.mxu1  ;;  %v4840_v29 = vpop.f32.mrf.mxu0 }
 0x2a8   :  { %v6688_v31 = vpop.f32.mrf.mxu1  ;;  %4786 = vmatmul.mubr.msk.bf16.gmra.mxu1 %vm941_vm6, %v6086_v2  ;;  %v6692_v18 = vpop.f32.mrf.mxu0  ;;  %5022 = vmatmul.mubr.msk.bf16.gmra.mxu0 %vm941_vm6, %v6130_v55 }
 0x2a9   :  { %7847 = vst [vmem:[#allocation79_spill] sm:$0xff] %v6688_v31  ;;  %7848 = vst [vmem:[#allocation80_spill] sm:$0xff] %v6692_v18  ;;  %4789 = vmatprep.mubr.msk.bf16.mxu1 %vm5576_vm0, %v7775_v0  ;;  %5025 = vmatprep.mubr.msk.bf16.mxu0 %vm5576_vm0, %v7775_v0 }
 0x2aa   :  { %v4607_v32 = vpop.f32.mrf.mxu1  ;;  %v4843_v6 = vpop.f32.mrf.mxu0 }
 0x2ac   :  { %v6700_v38 = vpop.f32.mrf.mxu1  ;;  %v6702_v29 = vpop.f32.mrf.mxu0 }
 0x2ad   :  { %7849 = vst [vmem:[#allocation81_spill] sm:$0xff] %v6700_v38  ;;  %7850 = vst [vmem:[#allocation82_spill] sm:$0xff] %v6702_v29 }
 0x2ae   :  { %v4608_v50 = vpop.f32.mrf.mxu1  ;;  %v4844_v31 = vpop.f32.mrf.mxu0 }
 0x2b0   :  { %v6704_v7 = vpop.f32.mrf.mxu1  ;;  %4790 = vmatmul.mubr.msk.bf16.gmra.mxu1 %vm941_vm6, %v6108_v23  ;;  %v6708_v18 = vpop.f32.mrf.mxu0  ;;  %5026 = vmatmul.mubr.msk.bf16.gmra.mxu0 %vm941_vm6, %v6152_v19 }
 0x2b1   :  { %7851 = vst [vmem:[#allocation83_spill] sm:$0xff] %v6704_v7  ;;  %7852 = vst [vmem:[#allocation84_spill] sm:$0xff] %v6708_v18  ;;  %4793 = vmatprep.mubr.msk.bf16.mxu1 %vm5576_vm0, %v7775_v0  ;;  %5029 = vmatprep.mubr.msk.bf16.mxu0 %vm5576_vm0, %v7775_v0 }
 0x2b2   :  { %v4611_v32 = vpop.f32.mrf.mxu1  ;;  %v4847_v6 = vpop.f32.mrf.mxu0 }
 0x2b4   :  { %v6716_v50 = vpop.f32.mrf.mxu1  ;;  %v6718_v31 = vpop.f32.mrf.mxu0 }
 0x2b5   :  { %7853 = vst [vmem:[#allocation85_spill] sm:$0xff] %v6716_v50  ;;  %7854 = vst [vmem:[#allocation86_spill] sm:$0xff] %v6718_v31 }
 0x2b6   :  { %v4612_v29 = vpop.f32.mrf.mxu1  ;;  %v4848_v7 = vpop.f32.mrf.mxu0 }
 0x2b8   :  { %v6720_v38 = vpop.f32.mrf.mxu1  ;;  %4794 = vmatmul.mubr.msk.bf16.gmra.mxu1 %vm941_vm6, %v6130_v55  ;;  %v6724_v18 = vpop.f32.mrf.mxu0  ;;  %5030 = vmatmul.mubr.msk.bf16.gmra.mxu0 %vm941_vm6, %v6179_v48 }
 0x2b9   :  { %7855 = vst [vmem:[#allocation87_spill] sm:$0xff] %v6720_v38  ;;  %7856 = vst [vmem:[#allocation88_spill] sm:$0xff] %v6724_v18  ;;  %4797 = vmatprep.mubr.msk.bf16.mxu1 %vm5576_vm0, %v7775_v0  ;;  %5033 = vmatprep.mubr.msk.bf16.mxu0 %vm5576_vm0, %v7775_v0 }
 0x2ba   :  { %v4615_v32 = vpop.f32.mrf.mxu1  ;;  %v4851_v6 = vpop.f32.mrf.mxu0 }
 0x2bc   :  { %v6732_v29 = vpop.f32.mrf.mxu1  ;;  %v6734_v7 = vpop.f32.mrf.mxu0 }
 0x2bd   :  { %7857 = vst [vmem:[#allocation89_spill] sm:$0xff] %v6732_v29  ;;  %7858 = vst [vmem:[#allocation90_spill] sm:$0xff] %v6734_v7 }
 0x2be   :  { %v4616_v31 = vpop.f32.mrf.mxu1  ;;  %v4852_v38 = vpop.f32.mrf.mxu0 }
 0x2c0   :  { %v6736_v50 = vpop.f32.mrf.mxu1  ;;  %4798 = vmatmul.mubr.msk.bf16.gmra.mxu1 %vm941_vm6, %v6152_v19  ;;  %v6740_v18 = vpop.f32.mrf.mxu0  ;;  %5034 = vmatmul.mubr.msk.bf16.gmra.mxu0 %vm941_vm6, %v6201_v54 }
 0x2c1   :  { %7859 = vst [vmem:[#allocation91_spill] sm:$0xff] %v6736_v50  ;;  %7860 = vst [vmem:[#allocation92_spill] sm:$0xff] %v6740_v18  ;;  %4801 = vmatprep.mubr.msk.bf16.mxu1 %vm5576_vm0, %v7775_v0  ;;  %5037 = vmatprep.mubr.msk.bf16.mxu0 %vm5576_vm0, %v7775_v0 }
 0x2c2   :  { %v4619_v32 = vpop.f32.mrf.mxu1  ;;  %v4855_v6 = vpop.f32.mrf.mxu0 }
 0x2c4   :  { %v6748_v31 = vpop.f32.mrf.mxu1  ;;  %v6750_v38 = vpop.f32.mrf.mxu0 }
 0x2c5   :  { %7861 = vst [vmem:[#allocation93_spill] sm:$0xff] %v6748_v31  ;;  %7862 = vst [vmem:[#allocation94_spill] sm:$0xff] %v6750_v38 }
 0x2c6   :  { %v4620_v7 = vpop.f32.mrf.mxu1  ;;  %v4856_v50 = vpop.f32.mrf.mxu0 }
 0x2c8   :  { %v6752_v29 = vpop.f32.mrf.mxu1  ;;  %4802 = vmatmul.mubr.msk.bf16.gmra.mxu1 %vm941_vm6, %v6179_v48  ;;  %v6756_v18 = vpop.f32.mrf.mxu0  ;;  %5038 = vmatmul.mubr.msk.bf16.gmra.mxu0 %vm941_vm6, %v6220_v15 }
 0x2c9   :  { %7863 = vst [vmem:[#allocation95_spill] sm:$0xff] %v6752_v29  ;;  %7864 = vst [vmem:[#allocation96_spill] sm:$0xff] %v6756_v18  ;;  %4805 = vmatprep.mubr.msk.bf16.mxu1 %vm5576_vm0, %v7775_v0  ;;  %5041 = vmatprep.mubr.msk.bf16.mxu0 %vm5576_vm0, %v7775_v0 }
 0x2ca   :  { %v4623_v32 = vpop.f32.mrf.mxu1  ;;  %v4859_v6 = vpop.f32.mrf.mxu0 }
 0x2cc   :  { %v6764_v7 = vpop.f32.mrf.mxu1  ;;  %v6766_v50 = vpop.f32.mrf.mxu0 }
 0x2cd   :  { %7865 = vst [vmem:[#allocation97_spill] sm:$0xff] %v6764_v7  ;;  %7866 = vst [vmem:[#allocation98_spill] sm:$0xff] %v6766_v50 }
 0x2ce   :  { %v4624_v38 = vpop.f32.mrf.mxu1  ;;  %v4860_v29 = vpop.f32.mrf.mxu0 }
 0x2d0   :  { %v6768_v31 = vpop.f32.mrf.mxu1  ;;  %4806 = vmatmul.mubr.msk.bf16.gmra.mxu1 %vm941_vm6, %v6201_v54  ;;  %v6772_v18 = vpop.f32.mrf.mxu0  ;;  %5042 = vmatmul.mubr.msk.bf16.gmra.mxu0 %vm941_vm6, %v6236_v36 }
 0x2d1   :  { %7867 = vst [vmem:[#allocation99_spill] sm:$0xff] %v6768_v31  ;;  %7868 = vst [vmem:[#allocation100_spill] sm:$0xff] %v6772_v18  ;;  %4809 = vmatprep.mubr.msk.bf16.mxu1 %vm5576_vm0, %v7775_v0  ;;  %5045 = vmatprep.mubr.msk.bf16.mxu0 %vm5576_vm0, %v7775_v0 }
 0x2d2   :  { %v4627_v32 = vpop.f32.mrf.mxu1  ;;  %v4863_v6 = vpop.f32.mrf.mxu0 }
 0x2d4   :  { %v6780_v38 = vpop.f32.mrf.mxu1  ;;  %v6782_v29 = vpop.f32.mrf.mxu0 }
 0x2d5   :  { %7869 = vst [vmem:[#allocation101_spill] sm:$0xff] %v6780_v38  ;;  %7870 = vst [vmem:[#allocation102_spill] sm:$0xff] %v6782_v29  ;;  %v5294_v29 = vld [vmem:[#allocation6 + $0x18] sm:$0xff]  }
 0x2d6   :  { %v4628_v50 = vpop.f32.mrf.mxu1  ;;  %v4864_v31 = vpop.f32.mrf.mxu0 }
 0x2d8   :  { %v6784_v7 = vpop.f32.mrf.mxu1  ;;  %4810 = vmatmul.mubr.msk.bf16.gmra.mxu1 %vm941_vm6, %v6220_v15  ;;  %v6788_v18 = vpop.f32.mrf.mxu0  ;;  %5046 = vmatmul.mubr.msk.bf16.gmra.mxu0 %vm941_vm6, %v6248_v5  ;;  %v7875_v5 = vpack.c.bf16 %v6261_v13, %v6258_v60 }
 0x2d9   :  { %7871 = vst [vmem:[#allocation103_spill] sm:$0xff] %v6784_v7  ;;  %7872 = vst [vmem:[#allocation104_spill] sm:$0xff] %v6788_v18  ;;  %4897 = vmatprep.mubr.msk.bf16.mxu1 %vm5576_vm0, %v7775_v0  ;;  %5049 = vmatprep.mubr.msk.bf16.mxu0 %vm5576_vm0, %v7775_v0 }
 0x2da   :  { %v4631_v32 = vpop.f32.mrf.mxu1  ;;  %v4867_v6 = vpop.f32.mrf.mxu0 }
 0x2dc   :  { %v6796_v50 = vpop.f32.mrf.mxu1  ;;  %v6798_v31 = vpop.f32.mrf.mxu0 }
 0x2dd   :  { %7873 = vst [vmem:[#allocation105_spill] sm:$0xff] %v6798_v31 }
 0x2de   :  { %v4632_v7 = vpop.f32.mrf.mxu1  ;;  %v4868_v36 = vpop.f32.mrf.mxu0 }
 0x2e0   :  { %v6800_v38 = vpop.f32.mrf.mxu1  ;;  %v6802_v18 = vpop.f32.mrf.mxu0  ;;  %4898 = vmatmul.mubr.msk.bf16.vlgmr.msra.gmra.mxu1 %vm941_vm6, %v5865_v45  ;;  %5050 = vmatmul.mubr.msk.bf16.gmra.mxu0 %vm941_vm6, %v7875_v5 }
 0x2e1   :  { %7874 = vst [vmem:[#allocation106_spill] sm:$0xff] %v6802_v18  ;;  %4901 = vmatprep.mubr.msk.bf16.mxu1 %vm5576_vm0, %v7775_v0  ;;  %5054 = vmatpush3.bf16.msra.mxu1 %v5294_v29 }
 0x2e2   :  { %v4635_v32 = vpop.f32.mrf.mxu1  ;;  %v4871_v6 = vpop.f32.mrf.mxu0  ;;  %5055 = vmatprep.subr.bf16.mxu1 %v7775_v0  ;;  %5089 = vmatprep.mubr.msk.bf16.mxu0 %vm5576_vm0, %v7775_v0 }
 0x2e4   :  { %v6815_v36 = vpop.f32.mrf.mxu1  ;;  %v6817_v7 = vpop.f32.mrf.mxu0 }
 0x2e5   :  { %7876 = vst [vmem:[#allocation107_spill] sm:$0xff] %v6817_v7 }
 0x2e6   :  { %v4636_v45 = vpop.f32.mrf.mxu1  ;;  %v4872_v18 = vpop.f32.mrf.mxu0 }
 0x2e8   :  { %v6819_v60 = vpop.f32.mrf.mxu1  ;;  %v6821_v5 = vpop.f32.mrf.mxu0  ;;  %4902 = vmatmul.mubr.msk.bf16.gmra.mxu1 %vm941_vm6, %v5888_v63 }
 0x2e9   :  { %7877 = vst [vmem:[#allocation108_spill] sm:$0xff] %v6821_v5  ;;  %4905 = vmatprep.mubr.msk.bf16.mxu1 %vm5576_vm0, %v7775_v0 }
 0x2ea   :  { %v4639_v13 = vpop.f32.mrf.mxu1  ;;  %v4875_v29 = vpop.f32.mrf.mxu0 }
 0x2ec   :  { %v6827_v32 = vpop.f32.mrf.mxu1  ;;  %v6829_v6 = vpop.f32.mrf.mxu0 }
 0x2ed   :  { %7878 = vst [vmem:[#allocation109_spill] sm:$0xff] %v6827_v32  ;;  %7879 = vst [vmem:[#allocation110_spill] sm:$0xff] %v6829_v6 }
 0x2ee   :  { %v4640_v31 = vpop.f32.mrf.mxu1  ;;  %v4876_v7 = vpop.f32.mrf.mxu0 }
 0x2f0   :  { %v6831_v45 = vpop.f32.mrf.mxu1  ;;  %v6833_v18 = vpop.f32.mrf.mxu0  ;;  %4906 = vmatmul.mubr.msk.bf16.gmra.mxu1 %vm941_vm6, %v5910_v21  ;;  %v5295_v21 = vld [vmem:[#allocation6 + $0x8] sm:$0xff]  }
 0x2f1   :  { %7880 = vst [vmem:[#allocation111_spill] sm:$0xff] %v6833_v18  ;;  %4909 = vmatprep.mubr.msk.bf16.mxu1 %vm5576_vm0, %v7775_v0  ;;  %5086 = vmatpush3.bf16.msra.mxu0 %v5295_v21  ;;  %v1234_v21 = vadd.f32 %v6576_v4, %v6274_v16 }
 0x2f2   :  { %v4643_v63 = vpop.f32.mrf.mxu1  ;;  %v4879_v5 = vpop.f32.mrf.mxu0  ;;  %5087 = vmatprep.subr.bf16.mxu0 %v7775_v0 }
 0x2f4   :  { %v6839_v13 = vpop.f32.mrf.mxu1  ;;  %v6841_v29 = vpop.f32.mrf.mxu0 }
 0x2f5   :  { %7881 = vst [vmem:[#allocation112_spill] sm:$0xff] %v6839_v13  ;;  %7882 = vst [vmem:[#allocation113_spill] sm:$0xff] %v6841_v29 }
 0x2f6   :  { %v4644_v32 = vpop.f32.mrf.mxu1  ;;  %v4880_v6 = vpop.f32.mrf.mxu0 }
 0x2f8   :  { %v6843_v31 = vpop.f32.mrf.mxu1  ;;  %v6845_v7 = vpop.f32.mrf.mxu0  ;;  %4910 = vmatmul.mubr.msk.bf16.gmra.mxu1 %vm941_vm6, %v5932_v41 }
 0x2f9   :  { %7883 = vst [vmem:[#allocation114_spill] sm:$0xff] %v6845_v7  ;;  %4913 = vmatprep.mubr.msk.bf16.mxu1 %vm5576_vm0, %v7775_v0 }
 0x2fa   :  { %v4647_v18 = vpop.f32.mrf.mxu1  ;;  %v4883_v63 = vpop.f32.mrf.mxu0 }
 0x2fc   :  { %v6851_v5 = vpop.f32.mrf.mxu1  ;;  %v6853_v13 = vpop.f32.mrf.mxu0 }
 0x2fd   :  { %7884 = vst [vmem:[#allocation115_spill] sm:$0xff] %v6851_v5  ;;  %7885 = vst [vmem:[#allocation116_spill] sm:$0xff] %v6853_v13 }
 0x2fe   :  { %v4648_v32 = vpop.f32.mrf.mxu1  ;;  %v4884_v6 = vpop.f32.mrf.mxu0 }
 0x300   :  { %v6856_v29 = vpop.f32.mrf.mxu1  ;;  %v6858_v7 = vpop.f32.mrf.mxu0  ;;  %4914 = vmatmul.mubr.msk.bf16.gmra.mxu1 %vm941_vm6, %v5954_v61 }
 0x301   :  { %7886 = vst [vmem:[#allocation117_spill] sm:$0xff] %v6856_v29  ;;  %7887 = vst [vmem:[#allocation118_spill] sm:$0xff] %v6858_v7  ;;  %4917 = vmatprep.mubr.msk.bf16.mxu1 %vm5576_vm0, %v7775_v0  ;;  %v1237_v7 = vadd.f32 %v6588_v3, %v6284_v46  ;;  %v1589_v29 = vadd.f32 %v6290_v14, %v1234_v21 }
 0x302   :  { %v4651_v41 = vpop.f32.mrf.mxu1  ;;  %v4887_v18 = vpop.f32.mrf.mxu0 }
 0x303   :  { %v1242_v18 = vadd.f32 %v6592_v33, %v6286_v22  ;;  %v1590_v46 = vadd.f32 %v6300_v12, %v1237_v7 }
 0x304   :  { %v6866_v63 = vpop.f32.mrf.mxu1  ;;  %v6868_v13 = vpop.f32.mrf.mxu0 }
 0x305   :  { %7888 = vst [vmem:[#allocation119_spill] sm:$0xff] %v6868_v13 }
 0x306   :  { %v4652_v32 = vpop.f32.mrf.mxu1  ;;  %v4888_v6 = vpop.f32.mrf.mxu0 }
 0x308   :  { %v1681_v61 = vpop.f32.mrf.mxu1  ;;  %v6873_v5 = vpop.f32.mrf.mxu0  ;;  %4918 = vmatmul.mubr.msk.bf16.gmra.mxu1 %vm941_vm6, %v5976_v20  ;;  %v5296_v20 = vld [vmem:[#allocation6 + $0x10] sm:$0xff]  }
 0x309   :  { %7889 = vst [vmem:[#allocation120_spill] sm:$0xff] %v6873_v5  ;;  %v6877_v41 = vadd.f32 %v1681_v61, %v1589_v29  ;;  %4921 = vmatprep.mubr.msk.bf16.mxu1 %vm5576_vm0, %v7775_v0  ;;  %v1245_v29 = vadd.f32 %v6604_v44, %v6298_v9  ;;  %v1591_v61 = vadd.f32 %v6306_v28, %v1242_v18  ;;  %v7924_v5 = vld [vmem:[#allocation32_spill] sm:$0xff] }
 0x30a   :  { %v4739_v16 = vpop.f32.mrf.mxu1  ;;  %v4891_v4 = vpop.f32.mrf.mxu0  ;;  %5056 = vmatpush3.bf16.msra.mxu1 %v5296_v20  ;;  %v1250_v9 = vadd.f32 %v6608_v57, %v6302_v11 }
 0x30b   :  { %5117 = vmatprep.subr.bf16.mxu1 %v7775_v0  ;;  %v1592_v28 = vadd.f32 %v6316_v40, %v1245_v29  ;;  %v1258_v29 = vadd.f32 %v6624_v56, %v6318_v26 }
 0x30c   :  { %v1684_v3 = vpop.f32.mrf.mxu1  ;;  %v6884_v14 = vpop.f32.mrf.mxu0 }
 0x30d   :  { %7890 = vst [vmem:[#allocation121_spill] sm:$0xff] %v6884_v14  ;;  %v6886_v21 = vadd.f32 %v1684_v3, %v1590_v46  ;;  %v1253_v3 = vadd.f32 %v6620_v49, %v6314_v27  ;;  %v7922_v14 = vld [vmem:[#allocation29_spill] sm:$0xff] }
 0x30e   :  { %v4740_v32 = vpop.f32.mrf.mxu1  ;;  %v4892_v6 = vpop.f32.mrf.mxu0 }
 0x30f   :  { %v1593_v32 = vadd.f32 %v6322_v47, %v1250_v9  ;;  %v1594_v27 = vadd.f32 %v6332_v51, %v1253_v3  ;;  %v1269_v3 = vadd.f32 %v6652_v8, %v6346_v58 }
 0x310   :  { %v1689_v16 = vpop.f32.mrf.mxu1  ;;  %4922 = vmatmul.mubr.msk.bf16.gmra.mxu1 %vm941_vm6, %v5998_v42  ;;  %v6893_v22 = vpop.f32.mrf.mxu0 }
 0x311   :  { %v6895_v12 = vadd.f32 %v1689_v16, %v1591_v61  ;;  %4925 = vmatprep.mubr.msk.bf16.mxu1 %vm5576_vm0, %v7775_v0  ;;  %v1598_v58 = vadd.f32 %v6364_v59, %v1269_v3  ;;  %v7896_v3 = vld [vmem:[#allocation77_spill] sm:$0xff] }
 0x312   :  { %v4743_v33 = vpop.f32.mrf.mxu1  ;;  %v4979_v7 = vpop.f32.mrf.mxu0 }
 0x313   :  { %v1261_v33 = vadd.f32 %v6636_v24, %v6330_v30  ;;  %v1595_v7 = vadd.f32 %v6338_v39, %v1258_v29 }
 0x314   :  { %v1692_v44 = vpop.f32.mrf.mxu1  ;;  %v6903_v4 = vpop.f32.mrf.mxu0 }
 0x315   :  { %v6905_v42 = vadd.f32 %v1692_v44, %v1592_v28  ;;  %v1266_v44 = vadd.f32 %v6640_v25, %v6334_v52  ;;  %v1596_v30 = vadd.f32 %v6348_v37, %v1261_v33 }
 0x316   :  { %v4744_v18 = vpop.f32.mrf.mxu1  ;;  %v4980_v46 = vpop.f32.mrf.mxu0 }
 0x318   :  { %v1697_v6 = vpop.f32.mrf.mxu1  ;;  %4926 = vmatmul.mubr.msk.bf16.gmra.mxu1 %vm941_vm6, %v6020_v1  ;;  %v6912_v20 = vpop.f32.mrf.mxu0 }
 0x319   :  { %v6914_v11 = vadd.f32 %v1697_v6, %v1593_v32  ;;  %4929 = vmatprep.mubr.msk.bf16.mxu1 %vm5576_vm0, %v7775_v0  ;;  %v1597_v32 = vadd.f32 %v6354_v53, %v1266_v44  ;;  %v7894_v44 = vld [vmem:[#allocation14_spill] sm:$0xff] }
 0x31a   :  { %v4747_v40 = vpop.f32.mrf.mxu1  ;;  %v4983_v57 = vpop.f32.mrf.mxu0 }
 0x31b   :  { %v1274_v57 = vadd.f32 %v6656_v10, %v6350_v43 }
 0x31c   :  { %v1700_v49 = vpop.f32.mrf.mxu1  ;;  %v6921_v47 = vpop.f32.mrf.mxu0 }
 0x31d   :  { %v6923_v61 = vadd.f32 %v1700_v49, %v1594_v27  ;;  %v1277_v49 = vadd.f32 %v6668_v35, %v6362_v62 }
 0x31e   :  { %v4748_v1 = vpop.f32.mrf.mxu1  ;;  %v4984_v16 = vpop.f32.mrf.mxu0 }
 0x31f   :  { %v7891_v1 = vld [vmem:[#allocation12_spill] sm:$0xff]  ;;  %v1600_v62 = vadd.f32 %v7894_v44, %v1277_v49  ;;  %v7899_v49 = vld [vmem:[#allocation79_spill] sm:$0xff]  ;;  %v7901_v44 = vld [vmem:[#allocation17_spill] sm:$0xff] }
 0x320   :  { %v1705_v9 = vpop.f32.mrf.mxu1  ;;  %4930 = vmatmul.mubr.msk.bf16.gmra.mxu1 %vm941_vm6, %v6042_v17  ;;  %v6930_v28 = vpop.f32.mrf.mxu0  ;;  %v1599_v16 = vadd.f32 %v7891_v1, %v1274_v57 }
 0x321   :  { %v6932_v26 = vadd.f32 %v1705_v9, %v1595_v7  ;;  %4933 = vmatprep.mubr.msk.bf16.mxu1 %vm5576_vm0, %v7775_v0  ;;  %v7892_v9 = vld [vmem:[#allocation11_spill] sm:$0xff] }
 0x322   :  { %v4751_v51 = vpop.f32.mrf.mxu1  ;;  %v4987_v56 = vpop.f32.mrf.mxu0 }
 0x323   :  { %v7893_v51 = vld [vmem:[#allocation75_spill] sm:$0xff] }
 0x324   :  { %v1708_v24 = vpop.f32.mrf.mxu1  ;;  %v6939_v39 = vpop.f32.mrf.mxu0  ;;  %v1282_v56 = vadd.f32 %v7893_v51, %v7892_v9 }
 0x325   :  { %v6941_v18 = vadd.f32 %v1708_v24, %v1596_v30 }
 0x326   :  { %v4752_v17 = vpop.f32.mrf.mxu1  ;;  %v4988_v46 = vpop.f32.mrf.mxu0 }
 0x327   :  { %v7895_v46 = vld [vmem:[#allocation13_spill] sm:$0xff] }
 0x328   :  { %v1713_v6 = vpop.f32.mrf.mxu1  ;;  %4934 = vmatmul.mubr.msk.bf16.gmra.mxu1 %vm941_vm6, %v6064_v34  ;;  %v6948_v40 = vpop.f32.mrf.mxu0 }
 0x329   :  { %v6950_v52 = vadd.f32 %v1713_v6, %v1597_v32  ;;  %4937 = vmatprep.mubr.msk.bf16.mxu1 %vm5576_vm0, %v7775_v0  ;;  %v1285_v32 = vadd.f32 %v7896_v3, %v7895_v46  ;;  %v7897_v6 = vld [vmem:[#allocation16_spill] sm:$0xff] }
 0x32a   :  { %v4755_v37 = vpop.f32.mrf.mxu1  ;;  %v4991_v25 = vpop.f32.mrf.mxu0 }
 0x32b   :  { %v1601_v37 = vadd.f32 %v7897_v6, %v1282_v56  ;;  %v5297_v56 = vld [vmem:[#allocation6] sm:$0xff]  }
 0x32c   :  { %v1716_v8 = vpop.f32.mrf.mxu1  ;;  %v6957_v53 = vpop.f32.mrf.mxu0  ;;  %5088 = vmatpush3.bf16.msra.mxu0 %v5297_v56 }
 0x32d   :  { %v6959_v29 = vadd.f32 %v1716_v8, %v1598_v58  ;;  %5149 = vmatprep.subr.bf16.mxu0 %v7775_v0 }
 0x32e   :  { %v4756_v34 = vpop.f32.mrf.mxu1  ;;  %v4992_v27 = vpop.f32.mrf.mxu0 }
 0x32f   :  { %v7898_v27 = vld [vmem:[#allocation15_spill] sm:$0xff] }
 0x330   :  { %v1721_v33 = vpop.f32.mrf.mxu1  ;;  %4938 = vmatmul.mubr.msk.bf16.gmra.mxu1 %vm941_vm6, %v6086_v2  ;;  %v6966_v7 = vpop.f32.mrf.mxu0  ;;  %v1290_v1 = vadd.f32 %v7899_v49, %v7898_v27  ;;  %v7906_v27 = vld [vmem:[#allocation22_spill] sm:$0xff] }
 0x331   :  { %v6968_v43 = vadd.f32 %v1721_v33, %v1599_v16  ;;  %4941 = vmatprep.mubr.msk.bf16.mxu1 %vm5576_vm0, %v7775_v0  ;;  %v7900_v16 = vld [vmem:[#allocation18_spill] sm:$0xff] }
 0x332   :  { %v4759_v59 = vpop.f32.mrf.mxu1  ;;  %v4995_v10 = vpop.f32.mrf.mxu0  ;;  %v1602_v33 = vadd.f32 %v7900_v16, %v1285_v32 }
 0x334   :  { %v1724_v35 = vpop.f32.mrf.mxu1  ;;  %v6975_v30 = vpop.f32.mrf.mxu0 }
 0x335   :  { %v6977_v24 = vadd.f32 %v1724_v35, %v1600_v62  ;;  %v7902_v62 = vld [vmem:[#allocation81_spill] sm:$0xff] }
 0x336   :  { %v4760_v2 = vpop.f32.mrf.mxu1  ;;  %v4996_v17 = vpop.f32.mrf.mxu0  ;;  %v1293_v35 = vadd.f32 %v7902_v62, %v7901_v44  ;;  %v7909_v44 = vld [vmem:[#allocation24_spill] sm:$0xff] }
 0x337   :  { %v7903_v2 = vld [vmem:[#allocation20_spill] sm:$0xff] }
 0x338   :  { %v1729_v25 = vpop.f32.mrf.mxu1  ;;  %4942 = vmatmul.mubr.msk.bf16.gmra.mxu1 %vm941_vm6, %v6108_v23  ;;  %v6984_v57 = vpop.f32.mrf.mxu0  ;;  %v1603_v17 = vadd.f32 %v7903_v2, %v1290_v1  ;;  %v1604_v49 = vadd.f32 %v7906_v27, %v1293_v35  ;;  %v7912_v27 = vld [vmem:[#allocation26_spill] sm:$0xff] }
 0x339   :  { %v6986_v58 = vadd.f32 %v1729_v25, %v1601_v37  ;;  %4945 = vmatprep.mubr.msk.bf16.mxu1 %vm5576_vm0, %v7775_v0  ;;  %v7904_v25 = vld [vmem:[#allocation19_spill] sm:$0xff] }
 0x33a   :  { %v4763_v8 = vpop.f32.mrf.mxu1  ;;  %v4999_v34 = vpop.f32.mrf.mxu0 }
 0x33b   :  { %v7905_v8 = vld [vmem:[#allocation83_spill] sm:$0xff] }
 0x33c   :  { %v1732_v59 = vpop.f32.mrf.mxu1  ;;  %v6993_v10 = vpop.f32.mrf.mxu0  ;;  %v1298_v34 = vadd.f32 %v7905_v8, %v7904_v25  ;;  %v7911_v25 = vld [vmem:[#allocation87_spill] sm:$0xff] }
 0x33d   :  { %v6995_v9 = vadd.f32 %v1732_v59, %v1602_v33 }
 0x33e   :  { %v4764_v23 = vpop.f32.mrf.mxu1  ;;  %v5000_v51 = vpop.f32.mrf.mxu0  ;;  %v1605_v62 = vadd.f32 %v7909_v44, %v1298_v34 }
 0x33f   :  { %v7907_v23 = vld [vmem:[#allocation21_spill] sm:$0xff] }
 0x340   :  { %v1737_v46 = vpop.f32.mrf.mxu1  ;;  %4946 = vmatmul.mubr.msk.bf16.gmra.mxu1 %vm941_vm6, %v6130_v55  ;;  %v7002_v3 = vpop.f32.mrf.mxu0  ;;  %v7908_v51 = vld [vmem:[#allocation85_spill] sm:$0xff] }
 0x341   :  { %v7004_v32 = vadd.f32 %v1737_v46, %v1603_v17  ;;  %4949 = vmatprep.mubr.msk.bf16.mxu1 %vm5576_vm0, %v7775_v0  ;;  %v1301_v56 = vadd.f32 %v7908_v51, %v7907_v23  ;;  %v7913_v23 = vld [vmem:[#allocation25_spill] sm:$0xff] }
 0x342   :  { %v4767_v6 = vpop.f32.mrf.mxu1  ;;  %v5003_v37 = vpop.f32.mrf.mxu0  ;;  %v7914_v51 = vld [vmem:[#allocation89_spill] sm:$0xff] }
 0x343   :  { %v7910_v37 = vld [vmem:[#allocation23_spill] sm:$0xff]  ;;  %v1309_v44 = vadd.f32 %v7914_v51, %v7913_v23 }
 0x344   :  { %v1740_v1 = vpop.f32.mrf.mxu1  ;;  %v7012_v16 = vpop.f32.mrf.mxu0  ;;  %v1306_v8 = vadd.f32 %v7911_v25, %v7910_v37 }
 0x345   :  { %v7014_v55 = vadd.f32 %v1740_v1, %v1604_v49  ;;  %v1606_v49 = vadd.f32 %v7912_v27, %v1301_v56  ;;  %v7917_v56 = vmov 0.0   ;;  %v7918_v27 = vld [vmem:[#allocation27_spill] sm:$0xff] }
 0x346   :  { %v4768_v33 = vpop.f32.mrf.mxu1  ;;  %v5004_v59 = vpop.f32.mrf.mxu0 }
 0x348   :  { %v1745_v2 = vpop.f32.mrf.mxu1  ;;  %4950 = vmatmul.mubr.msk.bf16.gmra.mxu1 %vm941_vm6, %v6152_v19  ;;  %v7021_v17 = vpop.f32.mrf.mxu0 }
 0x349   :  { %v7023_v46 = vadd.f32 %v1745_v2, %v1605_v62  ;;  %4953 = vmatprep.mubr.msk.bf16.mxu1 %vm5576_vm0, %v7775_v0  ;;  %v7915_v62 = vld [vmem:[#allocation28_spill] sm:$0xff] }
 0x34a   :  { %v4771_v35 = vpop.f32.mrf.mxu1  ;;  %v5007_v6 = vpop.f32.mrf.mxu0  ;;  %v1607_v2 = vadd.f32 %v7915_v62, %v1306_v8 }
 0x34c   :  { %v1748_v1 = vpop.f32.mrf.mxu1  ;;  %v7030_v34 = vpop.f32.mrf.mxu0 }
 0x34d   :  { %v7032_v33 = vadd.f32 %v1748_v1, %v1606_v49  ;;  %v7919_v49 = vld [vmem:[#allocation91_spill] sm:$0xff] }
 0x34e   :  { %v4772_v19 = vpop.f32.mrf.mxu1  ;;  %v5008_v59 = vpop.f32.mrf.mxu0  ;;  %v1314_v1 = vadd.f32 %v7919_v49, %v7918_v27  ;;  %v7927_v49 = vld [vmem:[#allocation31_spill] sm:$0xff] }
 0x34f   :  { %v7920_v19 = vld [vmem:[#allocation30_spill] sm:$0xff] }
 0x350   :  { %v1753_v0 = vpop.f32.mrf.mxu1  ;;  %4954 = vmatmul.mubr.msk.bf16.gmra.mxu1 %vm941_vm6, %v6179_v48  ;;  %v7039_v35 = vpop.f32.mrf.mxu0  ;;  %v1608_v59 = vadd.f32 %v7920_v19, %v1309_v44  ;;  %v1609_v13 = vadd.f32 %v7924_v5, %v1314_v1  ;;  %v7928_v19 = vld [vmem:[#allocation95_spill] sm:$0xff] }
 0x351   :  { %v7041_v6 = vadd.f32 %v1753_v0, %v1607_v2  ;;  %4957 = vmatprep.mubr.msk.bf16.mxu1 %vm5576_vm0, %v7917_v56  ;;  %v7923_v0 = vld [vmem:[#allocation93_spill] sm:$0xff] }
 0x352   :  { %v4775_v37 = vpop.f32.mrf.mxu1  ;;  %v5011_v25 = vpop.f32.mrf.mxu0  ;;  %v1317_v2 = vadd.f32 %v7923_v0, %v7922_v14  ;;  %v7931_v0 = vld [vmem:[#allocation33_spill] sm:$0xff] }
 0x353   :  { %7916 = vst [vmem:[#allocation12_spill] sm:$0xff] %v7041_v6 }
 0x354   :  { %v1756_v23 = vpop.f32.mrf.mxu1  ;;  %v7048_v8 = vpop.f32.mrf.mxu0 }
 0x355   :  { %v7050_v51 = vadd.f32 %v1756_v23, %v1608_v59  ;;  %v1322_v59 = vadd.f32 %v7928_v19, %v7927_v49  ;;  %v7929_v23 = vld [vmem:[#allocation34_spill] sm:$0xff]  ;;  %v7936_v19 = vld [vmem:[#allocation35_spill] sm:$0xff] }
 0x356   :  { %v4776_v48 = vpop.f32.mrf.mxu1  ;;  %v5012_v62 = vpop.f32.mrf.mxu0  ;;  %v1610_v14 = vadd.f32 %v7929_v23, %v1317_v2  ;;  %v7937_v23 = vld [vmem:[#allocation99_spill] sm:$0xff] }
 0x357   :  { %7921 = vst [vmem:[#allocation11_spill] sm:$0xff] %v7050_v51 }
 0x358   :  { %v1761_v6 = vpop.f32.mrf.mxu1  ;;  %4958 = vmatmul.mubr.msk.bf16.gmra.mxu1 %vm941_vm6, %v6201_v54  ;;  %v7057_v37 = vpop.f32.mrf.mxu0 }
 0x359   :  { %7925 = vst [vmem:[#allocation75_spill] sm:$0xff] %v7057_v37  ;;  %v7059_v25 = vadd.f32 %v1761_v6, %v1609_v13  ;;  %4961 = vmatprep.mubr.msk.bf16.mxu1 %vm5576_vm0, %v7917_v56  ;;  %v7932_v13 = vld [vmem:[#allocation97_spill] sm:$0xff] }
 0x35a   :  { %v4779_v44 = vpop.f32.mrf.mxu1  ;;  %v5015_v27 = vpop.f32.mrf.mxu0  ;;  %v1325_v6 = vadd.f32 %v7932_v13, %v7931_v0  ;;  %v7940_v13 = vld [vmem:[#allocation37_spill] sm:$0xff] }
 0x35b   :  { %7926 = vst [vmem:[#allocation14_spill] sm:$0xff] %v7059_v25  ;;  %v7933_v25 = vld [vmem:[#allocation36_spill] sm:$0xff] }
 0x35c   :  { %v1764_v48 = vpop.f32.mrf.mxu1  ;;  %v7066_v5 = vpop.f32.mrf.mxu0  ;;  %v1611_v51 = vadd.f32 %v7933_v25, %v1322_v59 }
 0x35d   :  { %v7068_v1 = vadd.f32 %v1764_v48, %v1610_v14  ;;  %v1330_v14 = vadd.f32 %v7937_v23, %v7936_v19  ;;  %v7938_v48 = vld [vmem:[#allocation38_spill] sm:$0xff] }
 0x35e   :  { %v4780_v54 = vpop.f32.mrf.mxu1  ;;  %v5016_v62 = vpop.f32.mrf.mxu0 }
 0x35f   :  { %7930 = vst [vmem:[#allocation13_spill] sm:$0xff] %v7068_v1  ;;  %v1612_v54 = vadd.f32 %v7938_v48, %v1325_v6  ;;  %v7946_v48 = vld [vmem:[#allocation39_spill] sm:$0xff] }
 0x360   :  { %v1769_v37 = vpop.f32.mrf.mxu1  ;;  %4962 = vmatmul.mubr.msk.bf16.gmra.mxu1 %vm941_vm6, %v6220_v15  ;;  %v7075_v44 = vpop.f32.mrf.mxu0 }
 0x361   :  { %7934 = vst [vmem:[#allocation77_spill] sm:$0xff] %v7075_v44  ;;  %v7077_v27 = vadd.f32 %v1769_v37, %v1611_v51  ;;  %4965 = vmatprep.mubr.msk.bf16.mxu1 %vm5576_vm0, %v7917_v56  ;;  %v7941_v51 = vld [vmem:[#allocation101_spill] sm:$0xff] }
 0x362   :  { %v4783_v2 = vpop.f32.mrf.mxu1  ;;  %v5019_v49 = vpop.f32.mrf.mxu0  ;;  %v1333_v37 = vadd.f32 %v7941_v51, %v7940_v13 }
 0x363   :  { %7935 = vst [vmem:[#allocation16_spill] sm:$0xff] %v7077_v27  ;;  %v7942_v27 = vld [vmem:[#allocation40_spill] sm:$0xff]  ;;  %v7943_v2 = vld [vmem:[#allocation9_spill] sm:$0xff] }
 0x364   :  { %v1772_v62 = vpop.f32.mrf.mxu1  ;;  %v7084_v25 = vpop.f32.mrf.mxu0  ;;  %v1613_v44 = vadd.f32 %v7942_v27, %v1330_v14 }
 0x365   :  { %v7086_v59 = vadd.f32 %v1772_v62, %v1612_v54  ;;  %v7947_v54 = vld [vmem:[#allocation103_spill] sm:$0xff] }
 0x366   :  { %v4784_v15 = vpop.f32.mrf.mxu1  ;;  %v5020_v0 = vpop.f32.mrf.mxu0  ;;  %v1338_v62 = vadd.f32 %v7947_v54, %v7946_v48 }
 0x367   :  { %7939 = vst [vmem:[#allocation15_spill] sm:$0xff] %v7086_v59  ;;  %v7948_v15 = vld [vmem:[#allocation42_spill] sm:$0xff]  ;;  %v7950_v59 = vld [vmem:[#allocation41_spill] sm:$0xff] }
 0x368   :  { %v1777_v1 = vpop.f32.mrf.mxu1  ;;  %4966 = vmatmul.mubr.msk.bf16.gmra.mxu1 %vm941_vm6, %v7943_v2  ;;  %v7093_v49 = vpop.f32.mrf.mxu0  ;;  %v1614_v0 = vadd.f32 %v7948_v15, %v1333_v37  ;;  %v7954_v15 = vld [vmem:[#allocation43_spill] sm:$0xff] }
 0x369   :  { %7944 = vst [vmem:[#allocation79_spill] sm:$0xff] %v7093_v49  ;;  %v7095_v19 = vadd.f32 %v1777_v1, %v1613_v44  ;;  %4969 = vmatprep.mubr.msk.bf16.mxu1 %vm5576_vm0, %v7917_v56  ;;  %v1341_v1 = vadd.f32 %v6796_v50, %v7950_v59  ;;  %v7951_v44 = vld [vmem:[#allocation44_spill] sm:$0xff] }
 0x36a   :  { %v4787_v6 = vpop.f32.mrf.mxu1  ;;  %v5023_v23 = vpop.f32.mrf.mxu0 }
 0x36b   :  { %7945 = vst [vmem:[#allocation18_spill] sm:$0xff] %v7095_v19  ;;  %v1615_v19 = vadd.f32 %v7951_v44, %v1338_v62  ;;  %v7952_v6 = vld [vmem:[#allocation10_spill] sm:$0xff] }
 0x36c   :  { %v1780_v13 = vpop.f32.mrf.mxu1  ;;  %v7102_v27 = vpop.f32.mrf.mxu0 }
 0x36d   :  { %v7104_v14 = vadd.f32 %v1780_v13, %v1614_v0  ;;  %v1346_v0 = vadd.f32 %v6800_v38, %v7954_v15  ;;  %v7955_v13 = vld [vmem:[#allocation46_spill] sm:$0xff] }
 0x36e   :  { %v4788_v51 = vpop.f32.mrf.mxu1  ;;  %v5024_v2 = vpop.f32.mrf.mxu0  ;;  %v1616_v50 = vadd.f32 %v7955_v13, %v1341_v1  ;;  %v7961_v1 = vld [vmem:[#allocation47_spill] sm:$0xff] }
 0x36f   :  { %7949 = vst [vmem:[#allocation17_spill] sm:$0xff] %v7104_v14  ;;  %v1354_v13 = vadd.f32 %v6819_v60, %v7961_v1 }
 0x370   :  { %v1785_v49 = vpop.f32.mrf.mxu1  ;;  %4970 = vmatmul.mubr.msk.bf16.gmra.mxu1 %vm941_vm6, %v7952_v6  ;;  %v7111_v23 = vpop.f32.mrf.mxu0  ;;  %v7958_v6 = vld [vmem:[#allocation45_spill] sm:$0xff] }
 0x371   :  { %v7113_v48 = vadd.f32 %v1785_v49, %v1615_v19  ;;  %5057 = vmatprep.mubr.msk.bf16.mxu1 %vm5576_vm0, %v7917_v56  ;;  %v1349_v49 = vadd.f32 %v6815_v36, %v7958_v6  ;;  %v7959_v19 = vld [vmem:[#allocation48_spill] sm:$0xff] }
 0x372   :  { %v4791_v37 = vpop.f32.mrf.mxu1  ;;  %v5027_v54 = vpop.f32.mrf.mxu0 }
 0x373   :  { %7953 = vst [vmem:[#allocation81_spill] sm:$0xff] %v7113_v48  ;;  %v1617_v48 = vadd.f32 %v7959_v19, %v1346_v0  ;;  %v7965_v0 = vld [vmem:[#allocation49_spill] sm:$0xff] }
 0x374   :  { %v1788_v59 = vpop.f32.mrf.mxu1  ;;  %v7120_v62 = vpop.f32.mrf.mxu0  ;;  %v7966_v19 = vld [vmem:[#allocation109_spill] sm:$0xff] }
 0x375   :  { %7956 = vst [vmem:[#allocation20_spill] sm:$0xff] %v7120_v62  ;;  %v7122_v51 = vadd.f32 %v1788_v59, %v1616_v50  ;;  %v7962_v62 = vld [vmem:[#allocation50_spill] sm:$0xff] }
 0x376   :  { %v4792_v2 = vpop.f32.mrf.mxu1  ;;  %v5028_v44 = vpop.f32.mrf.mxu0  ;;  %v1618_v50 = vadd.f32 %v7962_v62, %v1349_v49  ;;  %v7970_v62 = vld [vmem:[#allocation51_spill] sm:$0xff] }
 0x377   :  { %7957 = vst [vmem:[#allocation19_spill] sm:$0xff] %v7122_v51  ;;  %v1357_v51 = vadd.f32 %v7966_v19, %v7965_v0  ;;  %v1362_v49 = vadd.f32 %v6831_v45, %v7970_v62 }
 0x378   :  { %v1793_v14 = vpop.f32.mrf.mxu1  ;;  %v7127_v37 = vpop.f32.mrf.mxu0 }
 0x379   :  { %7960 = vst [vmem:[#allocation83_spill] sm:$0xff] %v7127_v37  ;;  %v7129_v54 = vadd.f32 %v1793_v14, %v1617_v48  ;;  %v7967_v37 = vld [vmem:[#allocation52_spill] sm:$0xff] }
 0x37a   :  { %v4795_v38 = vpop.f32.mrf.mxu1  ;;  %v5031_v15 = vpop.f32.mrf.mxu0  ;;  %v1619_v14 = vadd.f32 %v7967_v37, %v1354_v13  ;;  %v7973_v37 = vld [vmem:[#allocation53_spill] sm:$0xff]  ;;  %v7974_v13 = vld [vmem:[#allocation112_spill] sm:$0xff] }
 0x37c   :  { %v1796_v59 = vpop.f32.mrf.mxu1  ;;  %v7134_v2 = vpop.f32.mrf.mxu0 }
 0x37d   :  { %7963 = vst [vmem:[#allocation22_spill] sm:$0xff] %v7134_v2  ;;  %v7136_v44 = vadd.f32 %v1796_v59, %v1618_v50  ;;  %v7971_v2 = vld [vmem:[#allocation54_spill] sm:$0xff] }
 0x37e   :  { %v4796_v36 = vpop.f32.mrf.mxu1  ;;  %v5032_v6 = vpop.f32.mrf.mxu0  ;;  %v1620_v50 = vadd.f32 %v7971_v2, %v1357_v51  ;;  %v7978_v51 = vld [vmem:[#allocation55_spill] sm:$0xff] }
 0x37f   :  { %7964 = vst [vmem:[#allocation21_spill] sm:$0xff] %v7136_v44  ;;  %v1365_v44 = vadd.f32 %v7974_v13, %v7973_v37  ;;  %v1370_v2 = vadd.f32 %v6843_v31, %v7978_v51 }
 0x380   :  { %v1801_v48 = vpop.f32.mrf.mxu1  ;;  %v7141_v38 = vpop.f32.mrf.mxu0 }
 0x381   :  { %7968 = vst [vmem:[#allocation85_spill] sm:$0xff] %v7141_v38  ;;  %v7143_v15 = vadd.f32 %v1801_v48, %v1619_v14  ;;  %v7975_v38 = vld [vmem:[#allocation56_spill] sm:$0xff] }
 0x382   :  { %v4799_v60 = vpop.f32.mrf.mxu1  ;;  %v5035_v1 = vpop.f32.mrf.mxu0  ;;  %v1621_v14 = vadd.f32 %v7975_v38, %v1362_v49  ;;  %v7982_v38 = vld [vmem:[#allocation57_spill] sm:$0xff]  ;;  %v7983_v49 = vld [vmem:[#allocation115_spill] sm:$0xff] }
 0x383   :  { %7969 = vst [vmem:[#allocation24_spill] sm:$0xff] %v7143_v15  ;;  %v7979_v15 = vld [vmem:[#allocation58_spill] sm:$0xff] }
 0x384   :  { %v1804_v59 = vpop.f32.mrf.mxu1  ;;  %v7148_v36 = vpop.f32.mrf.mxu0 }
 0x385   :  { %v7150_v6 = vadd.f32 %v1804_v59, %v1620_v50  ;;  %v1622_v50 = vadd.f32 %v7979_v15, %v1365_v44  ;;  %v7986_v44 = vld [vmem:[#allocation59_spill] sm:$0xff]  ;;  %v7987_v15 = vld [vmem:[#allocation117_spill] sm:$0xff] }
 0x386   :  { %v4800_v0 = vpop.f32.mrf.mxu1  ;;  %v5036_v19 = vpop.f32.mrf.mxu0 }
 0x387   :  { %7972 = vst [vmem:[#allocation23_spill] sm:$0xff] %v7150_v6  ;;  %v1373_v6 = vadd.f32 %v7983_v49, %v7982_v38 }
 0x388   :  { %v1809_v48 = vpop.f32.mrf.mxu1  ;;  %v7155_v60 = vpop.f32.mrf.mxu0 }
 0x389   :  { %7976 = vst [vmem:[#allocation87_spill] sm:$0xff] %v7155_v60  ;;  %v7157_v1 = vadd.f32 %v1809_v48, %v1621_v14  ;;  %v7984_v60 = vld [vmem:[#allocation60_spill] sm:$0xff] }
 0x38a   :  { %v4803_v45 = vpop.f32.mrf.mxu1  ;;  %v5039_v62 = vpop.f32.mrf.mxu0  ;;  %v1623_v14 = vadd.f32 %v7984_v60, %v1370_v2  ;;  %v7990_v60 = vld [vmem:[#allocation61_spill] sm:$0xff] }
 0x38b   :  { %7977 = vst [vmem:[#allocation26_spill] sm:$0xff] %v7157_v1  ;;  %v1378_v1 = vadd.f32 %v7987_v15, %v7986_v44  ;;  %v1381_v2 = vadd.f32 %v6866_v63, %v7990_v60  ;;  %v7994_v63 = vld [vmem:[#allocation65_spill] sm:$0xff] }
 0x38c   :  { %v1812_v59 = vpop.f32.mrf.mxu1  ;;  %v7162_v0 = vpop.f32.mrf.mxu0 }
 0x38d   :  { %7980 = vst [vmem:[#allocation25_spill] sm:$0xff] %v7162_v0  ;;  %v7164_v19 = vadd.f32 %v1812_v59, %v1622_v50  ;;  %v7988_v0 = vld [vmem:[#allocation62_spill] sm:$0xff] }
 0x38e   :  { %v4804_v37 = vpop.f32.mrf.mxu1  ;;  %v5040_v13 = vpop.f32.mrf.mxu0  ;;  %v1624_v50 = vadd.f32 %v7988_v0, %v1373_v6  ;;  %v7992_v6 = vld [vmem:[#allocation64_spill] sm:$0xff] }
 0x38f   :  { %7981 = vst [vmem:[#allocation89_spill] sm:$0xff] %v7164_v19  ;;  %v7991_v19 = vld [vmem:[#allocation63_spill] sm:$0xff]  ;;  %v1626_v0 = vadd.f32 %v7992_v6, %v1381_v2 }
 0x390   :  { %v1817_v48 = vpop.f32.mrf.mxu1  ;;  %v7169_v45 = vpop.f32.mrf.mxu0 }
 0x391   :  { %v7171_v62 = vadd.f32 %v1817_v48, %v1623_v14  ;;  %v1625_v14 = vadd.f32 %v7991_v19, %v1378_v1 }
 0x392   :  { %v4807_v31 = vpop.f32.mrf.mxu1  ;;  %v5043_v51 = vpop.f32.mrf.mxu0 }
 0x393   :  { %7985 = vst [vmem:[#allocation28_spill] sm:$0xff] %v7171_v62 }
 0x394   :  { %v1820_v59 = vpop.f32.mrf.mxu1  ;;  %v7176_v37 = vpop.f32.mrf.mxu0 }
 0x395   :  { %7989 = vst [vmem:[#allocation27_spill] sm:$0xff] %v7176_v37  ;;  %v7178_v13 = vadd.f32 %v1820_v59, %v1624_v50 }
 0x396   :  { %v4808_v38 = vpop.f32.mrf.mxu1  ;;  %v5044_v49 = vpop.f32.mrf.mxu0 }
 0x397   :  { %v2075_v49 = vadd.f32 %v7994_v63, %v6877_v41 }
 0x398   :  { %v1825_v48 = vpop.f32.mrf.mxu1  ;;  %v7183_v31 = vpop.f32.mrf.mxu0 }
 0x399   :  { %v7185_v51 = vadd.f32 %v1825_v48, %v1625_v14  ;;  %v7199_v14 = vld [vmem:[%s7765_s4] ss:$0 sm:$0xff] }
 0x39a   :  { %v4811_v44 = vpop.f32.mrf.mxu1  ;;  %v5047_v15 = vpop.f32.mrf.mxu0 }
 0x39c   :  { %v1828_v62 = vpop.f32.mrf.mxu1  ;;  %v7188_v37 = vpop.f32.mrf.mxu0 }
 0x39d   :  { %v7190_v50 = vadd.f32 %v1828_v62, %v1626_v0  ;;  %v7995_v62 = vld [vmem:[#allocation66_spill] sm:$0xff] }
 0x39e   :  { %v4812_v59 = vpop.f32.mrf.mxu1  ;;  %v5048_v38 = vpop.f32.mrf.mxu0  ;;  %v2076_v15 = vadd.f32 %v7995_v62, %v6886_v21 }
 0x39f   :  { %7993 = vst [vmem:[#allocation91_spill] sm:$0xff] %v7190_v50 }
 0x3a0   :  { %v2167_v1 = vpop.f32.mrf.mxu1  ;;  %v7194_v19 = vpop.f32.mrf.mxu0 }
 0x3a1   :  { %v2318_v60 = vadd.f32 %v2167_v1, %v2075_v49 }
 0x3a2   :  { %v4899_v2 = vpop.f32.mrf.mxu1  ;;  %v5051_v48 = vpop.f32.mrf.mxu0 }
 0x3a3   :  { %v2561_v44 = vadd.f32 %v6893_v22, %v2318_v60  ;;  %v7997_v2 = vld [vmem:[#allocation67_spill] sm:$0xff] }
 0x3a4   :  { %v2170_v6 = vpop.f32.mrf.mxu1  ;;  %v7204_v0 = vpop.f32.mrf.mxu0  ;;  %v2077_v48 = vadd.f32 %v7997_v2, %v6895_v12 }
 0x3a5   :  { %7996 = vst [vmem:[#allocation30_spill] sm:$0xff] %v7204_v0  ;;  %v7207_v41 = vadd.f32 %v7199_v14, %v2561_v44  ;;  %v2319_v59 = vadd.f32 %v2170_v6, %v2076_v15  ;;  %v7998_v15 = vld [vmem:[#allocation68_spill] sm:$0xff] }
 0x3a6   :  { %v4900_v38 = vpop.f32.mrf.mxu1  ;;  %v5052_v63 = vpop.f32.mrf.mxu0  ;;  %v2078_v6 = vadd.f32 %v7998_v15, %v6905_v42 }
 0x3a7   :  { %v2682_v49 = vmin.f32 %v7207_v41, 0.0  ;;  %v2562_v1 = vadd.f32 %v6903_v4, %v2319_v59  ;;  %vm2644_vm11 = vcmp.gt.f32.partialorder %v7207_v41, 0.0 }
 0x3a8   :  { %v2175_v22 = vpop.f32.mrf.mxu1 }
 0x3a9   :  { %v2720_v60 = vmul.f32 1.442695, %v2682_v49  ;;  %v2607_v21 = vadd.f32 %v7199_v14, %v2562_v1  ;;  %v2320_v62 = vadd.f32 %v2175_v22, %v2077_v48 }
 0x3aa   :  { %v4903_v50 = vpop.f32.mrf.mxu1 }
 0x3ab   :  { %5412 = vpow2.f32 %v2720_v60  ;;  %v2683_v0 = vmin.f32 %v2607_v21, 0.0  ;;  %v2563_v44 = vadd.f32 %v6912_v20, %v2320_v62  ;;  %v7999_v50 = vld [vmem:[#allocation69_spill] sm:$0xff]  ;;  %vm2645_vm12 = vcmp.gt.f32.partialorder %v2607_v21, 0.0 }
 0x3ac   :  { %v2178_v38 = vpop.f32.mrf.mxu1  ;;  %v2079_v2 = vadd.f32 %v7999_v50, %v6914_v11 }
 0x3ad   :  { %v2722_v63 = vmul.f32 1.442695, %v2683_v0  ;;  %v7218_v4 = vadd.f32 %v7199_v14, %v2563_v44  ;;  %v2321_v59 = vadd.f32 %v2178_v38, %v2078_v6  ;;  %v8000_v44 = vld [vmem:[#allocation70_spill] sm:$0xff] }
 0x3ae   :  { %v4904_v12 = vpop.f32.mrf.mxu1  ;;  %v2080_v15 = vadd.f32 %v8000_v44, %v6923_v61 }
 0x3af   :  { %5414 = vpow2.f32 %v2722_v63  ;;  %v2684_v49 = vmin.f32 %v7218_v4, 0.0  ;;  %v2564_v1 = vadd.f32 %v6921_v47, %v2321_v59  ;;  %vm2646_vm13 = vcmp.gt.f32.partialorder %v7218_v4, 0.0 }
 0x3b0   :  { %v2183_v48 = vpop.f32.mrf.mxu1 }
 0x3b1   :  { %v2724_v20 = vmul.f32 1.442695, %v2684_v49  ;;  %v7225_v22 = vadd.f32 %v7199_v14, %v2564_v1  ;;  %v2322_v42 = vadd.f32 %v2183_v48, %v2079_v2  ;;  %v8001_v49 = vld [vmem:[#allocation71_spill] sm:$0xff] }
 0x3b2   :  { %v4907_v0 = vpop.f32.mrf.mxu1  ;;  %v2081_v1 = vadd.f32 %v8001_v49, %v6932_v26 }
 0x3b3   :  { %5416 = vpow2.f32 %v2724_v20  ;;  %v2685_v60 = vmin.f32 %v7225_v22, 0.0  ;;  %v2565_v62 = vadd.f32 %v6930_v28, %v2322_v42  ;;  %vm2647_vm14 = vcmp.gt.f32.partialorder %v7225_v22, 0.0 }
 0x3b4   :  { %v2186_v6 = vpop.f32.mrf.mxu1 }
 0x3b5   :  { %v2726_v47 = vmul.f32 1.442695, %v2685_v60  ;;  %v7232_v38 = vadd.f32 %v7199_v14, %v2565_v62  ;;  %v2323_v11 = vadd.f32 %v2186_v6, %v2080_v15  ;;  %v8002_v60 = vld [vmem:[#allocation72_spill] sm:$0xff] }
 0x3b6   :  { %v4908_v63 = vpop.f32.mrf.mxu1  ;;  %v2082_v62 = vadd.f32 %v8002_v60, %v6941_v18 }
 0x3b7   :  { %5418 = vpow2.f32 %v2726_v47  ;;  %v2686_v59 = vmin.f32 %v7232_v38, 0.0  ;;  %v2566_v12 = vadd.f32 %v6939_v39, %v2323_v11  ;;  %vm2648_vm15 = vcmp.gt.f32.partialorder %v7232_v38, 0.0 }
 0x3b8   :  { %v5413_v50 = vpop.eup %5412  ;;  %v2191_v28 = vpop.f32.mrf.mxu1 }
 0x3b9   :  { %v2728_v2 = vmul.f32 1.442695, %v2686_v59  ;;  %v7239_v61 = vadd.f32 %v7199_v14, %v2566_v12  ;;  %v2324_v48 = vadd.f32 %v2191_v28, %v2081_v1  ;;  %v4041_v42 = vadd.f32 -1.0, %v5413_v50  ;;  %v8003_v59 = vld [vmem:[#allocation73_spill] sm:$0xff]  ;;  %v5300_v1 = vld [vmem:[#allocation6 + $0x38] sm:$0xff]  }
 0x3ba   :  { %v4911_v20 = vpop.f32.mrf.mxu1  ;;  %v2083_v12 = vadd.f32 %v8003_v59, %v6950_v52 }
 0x3bb   :  { %5420 = vpow2.f32 %v2728_v2  ;;  %v2687_v0 = vmin.f32 %v7239_v61, 0.0  ;;  %v2567_v39 = vadd.f32 %v6948_v40, %v2324_v48  ;;  %v2834_v49 = vsel %vm2644_vm11, %v7207_v41, %v4041_v42 }
 0x3bc   :  { %v5415_v44 = vpop.eup %5414  ;;  %v2194_v15 = vpop.f32.mrf.mxu1  ;;  %vm2649_vm1 = vcmp.gt.f32.partialorder %v7239_v61, 0.0 }
 0x3bd   :  { %v4042_v26 = vadd.f32 -1.0, %v5415_v44  ;;  %v2730_v6 = vmul.f32 1.442695, %v2687_v0  ;;  %v2325_v47 = vadd.f32 %v2194_v15, %v2082_v62  ;;  %v7247_v11 = vadd.f32 %v7199_v14, %v2567_v39  ;;  %v5301_v44 = vld [vmem:[#allocation6 + $0x30] sm:$0xff]  }
 0x3be   :  { %v4912_v63 = vpop.f32.mrf.mxu1 }
 0x3bf   :  { %v2835_v18 = vsel %vm2645_vm12, %v2607_v21, %v4042_v26  ;;  %5422 = vpow2.f32 %v2730_v6  ;;  %v2568_v40 = vadd.f32 %v6957_v53, %v2325_v47  ;;  %v2688_v2 = vmin.f32 %v7247_v11, 0.0  ;;  %v8004_v53 = vld [vmem:[#allocation74_spill] sm:$0xff] }
 0x3c0   :  { %v5417_v50 = vpop.eup %5416  ;;  %v2872_v28 = vpack.c.bf16 %v2835_v18, %v2834_v49  ;;  %v2199_v48 = vpop.f32.mrf.mxu1  ;;  %v2084_v42 = vadd.f32 %v8004_v53, %v6959_v29  ;;  %vm2650_vm2 = vcmp.gt.f32.partialorder %v7247_v11, 0.0 }
 0x3c1   :  { %v7255_v20 = vadd.f32 %v7199_v14, %v2568_v40  ;;  %v2326_v0 = vadd.f32 %v2199_v48, %v2083_v12  ;;  %v2732_v60 = vmul.f32 1.442695, %v2688_v2  ;;  %v4043_v52 = vadd.f32 -1.0, %v5417_v50 }
 0x3c2   :  { %v4915_v62 = vpop.f32.mrf.mxu1  ;;  %5090 = vmatmul.mubr.msk.bf16.vlgmr.msra.gmra.mxu0 %vm941_vm6, %v2872_v28 }
 0x3c3   :  { %v2689_v41 = vmin.f32 %v7255_v20, 0.0  ;;  %v2569_v21 = vadd.f32 %v6966_v7, %v2326_v0  ;;  %5093 = vmatprep.mubr.msk.bf16.mxu0 %vm5576_vm0, %v7917_v56  ;;  %5150 = vmatpush3.bf16.msra.mxu0 %v5300_v1  ;;  %5424 = vpow2.f32 %v2732_v60  ;;  %v8005_v7 = vld [vmem:[#allocation76_spill] sm:$0xff]  ;;  %v2836_v12 = vsel %vm2646_vm13, %v7218_v4, %v4043_v52  ;;  %v8006_v60 = vld [vmem:[#allocation78_spill] sm:$0xff] }
 0x3c4   :  { %v5419_v39 = vpop.eup %5418  ;;  %v2202_v15 = vpop.f32.mrf.mxu1  ;;  %5151 = vmatprep.subr.bf16.mxu0 %v7917_v56  ;;  %v2085_v59 = vadd.f32 %v8005_v7, %v6968_v43  ;;  %v2086_v62 = vadd.f32 %v8006_v60, %v6977_v24  ;;  %v8007_v24 = vld [vmem:[#allocation80_spill] sm:$0xff]  ;;  %vm2651_vm3 = vcmp.gt.f32.partialorder %v7255_v20, 0.0 }
 0x3c5   :  { %v4044_v26 = vadd.f32 -1.0, %v5419_v39  ;;  %v2734_v6 = vmul.f32 1.442695, %v2689_v41  ;;  %v7266_v47 = vadd.f32 %v7199_v14, %v2569_v21  ;;  %v2327_v63 = vadd.f32 %v2202_v15, %v2084_v42 }
 0x3c6   :  { %v4916_v29 = vpop.f32.mrf.mxu1  ;;  %v2087_v39 = vadd.f32 %v8007_v24, %v6986_v58  ;;  %v8008_v58 = vld [vmem:[#allocation82_spill] sm:$0xff] }
 0x3c7   :  { %v2837_v49 = vsel %vm2647_vm14, %v7225_v22, %v4044_v26  ;;  %5426 = vpow2.f32 %v2734_v6  ;;  %v2690_v18 = vmin.f32 %v7266_v47, 0.0  ;;  %5152 = vmatpush3.bf16.msra.mxu0 %v5301_v44  ;;  %v2570_v50 = vadd.f32 %v6975_v30, %v2327_v63 }
 0x3c8   :  { %v5421_v40 = vpop.eup %5420  ;;  %v2873_v1 = vpack.c.bf16 %v2837_v49, %v2836_v12  ;;  %v2207_v28 = vpop.f32.mrf.mxu1  ;;  %5213 = vmatprep.subr.bf16.mxu0 %v7917_v56  ;;  %vm2652_vm4 = vcmp.gt.f32.partialorder %v7266_v47, 0.0 }
 0x3c9   :  { %v2736_v2 = vmul.f32 1.442695, %v2690_v18  ;;  %v2328_v48 = vadd.f32 %v2207_v28, %v2085_v59  ;;  %v7278_v0 = vadd.f32 %v7199_v14, %v2570_v50  ;;  %v4045_v4 = vadd.f32 -1.0, %v5421_v40 }
 0x3ca   :  { %v4919_v43 = vpop.f32.mrf.mxu1  ;;  %5094 = vmatmul.mubr.msk.bf16.gmra.mxu0 %vm941_vm6, %v2873_v1 }
 0x3cb   :  { %v2571_v22 = vadd.f32 %v6984_v57, %v2328_v48  ;;  %5097 = vmatprep.mubr.msk.bf16.mxu0 %vm5576_vm0, %v7917_v56  ;;  %5428 = vpow2.f32 %v2736_v2  ;;  %v2691_v52 = vmin.f32 %v7278_v0, 0.0  ;;  %v2838_v15 = vsel %vm2648_vm15, %v7232_v38, %v4045_v4 }
 0x3cc   :  { %v5423_v30 = vpop.eup %5422  ;;  %v2210_v41 = vpop.f32.mrf.mxu1  ;;  %v2088_v38 = vadd.f32 %v8008_v58, %v6995_v9  ;;  %vm2653_vm5 = vcmp.gt.f32.partialorder %v7278_v0, 0.0 }
 0x3cd   :  { %v4046_v21 = vadd.f32 -1.0, %v5423_v30  ;;  %v7288_v53 = vadd.f32 %v7199_v14, %v2571_v22  ;;  %v2329_v42 = vadd.f32 %v2210_v41, %v2086_v62  ;;  %v2738_v57 = vmul.f32 1.442695, %v2691_v52  ;;  %v8009_v22 = vld [vmem:[#allocation84_spill] sm:$0xff] }
 0x3ce   :  { %v4920_v44 = vpop.f32.mrf.mxu1  ;;  %v2089_v60 = vadd.f32 %v8009_v22, %v7004_v32  ;;  %v5298_v52 = vld [vmem:[#allocation6 + $0x28] sm:$0xff]  }
 0x3cf   :  { %v2839_v26 = vsel %vm2649_vm1, %v7239_v61, %v4046_v21  ;;  %v2692_v6 = vmin.f32 %v7288_v53, 0.0  ;;  %v2572_v63 = vadd.f32 %v6993_v10, %v2329_v42  ;;  %5430 = vpow2.f32 %v2738_v57 }
 0x3d0   :  { %v2874_v29 = vpack.c.bf16 %v2839_v26, %v2838_v15  ;;  %v2215_v7 = vpop.f32.mrf.mxu1  ;;  %v5425_v59 = vpop.eup %5424  ;;  %vm2654_vm7 = vcmp.gt.f32.partialorder %v7288_v53, 0.0 }
 0x3d1   :  { %v2740_v12 = vmul.f32 1.442695, %v2692_v6  ;;  %v7299_v49 = vadd.f32 %v7199_v14, %v2572_v63  ;;  %v2330_v18 = vadd.f32 %v2215_v7, %v2087_v39  ;;  %v4047_v61 = vadd.f32 -1.0, %v5425_v59 }
 0x3d2   :  { %v4923_v40 = vpop.f32.mrf.mxu1  ;;  %5098 = vmatmul.mubr.msk.bf16.gmra.mxu0 %vm941_vm6, %v2874_v29 }
 0x3d3   :  { %5432 = vpow2.f32 %v2740_v12  ;;  %v2693_v1 = vmin.f32 %v7299_v49, 0.0  ;;  %v2573_v10 = vadd.f32 %v7002_v3, %v2330_v18  ;;  %5101 = vmatprep.mubr.msk.bf16.mxu0 %vm5576_vm0, %v7917_v56  ;;  %v2840_v3 = vsel %vm2650_vm2, %v7247_v11, %v4047_v61  ;;  %v8010_v11 = vld [vmem:[#allocation86_spill] sm:$0xff] }
 0x3d4   :  { %v5427_v50 = vpop.eup %5426  ;;  %v2218_v28 = vpop.f32.mrf.mxu1  ;;  %vm2655_vm8 = vcmp.gt.f32.partialorder %v7299_v49, 0.0 }
 0x3d5   :  { %v4048_v2 = vadd.f32 -1.0, %v5427_v50  ;;  %v2742_v48 = vmul.f32 1.442695, %v2693_v1  ;;  %v7309_v43 = vadd.f32 %v7199_v14, %v2573_v10  ;;  %v2331_v4 = vadd.f32 %v2218_v28, %v2088_v38  ;;  %v8011_v1 = vld [vmem:[#allocation88_spill] sm:$0xff] }
 0x3d6   :  { %v4924_v9 = vpop.f32.mrf.mxu1  ;;  %v2091_v10 = vadd.f32 %v8011_v1, %v7023_v46  ;;  %v8012_v46 = vld [vmem:[#allocation90_spill] sm:$0xff] }
 0x3d7   :  { %v2841_v62 = vsel %vm2651_vm3, %v7255_v20, %v4048_v2  ;;  %5434 = vpow2.f32 %v2742_v48  ;;  %v2694_v30 = vmin.f32 %v7309_v43, 0.0  ;;  %v2574_v21 = vadd.f32 %v7012_v16, %v2331_v4  ;;  %v5299_v16 = vld [vmem:[#allocation6 + $0x20] sm:$0xff]  }
 0x3d8   :  { %v2875_v41 = vpack.c.bf16 %v2841_v62, %v2840_v3  ;;  %v2223_v42 = vpop.f32.mrf.mxu1  ;;  %v5429_v57 = vpop.eup %5428  ;;  %v2090_v20 = vadd.f32 %v8010_v11, %v7014_v55  ;;  %vm2656_vm9 = vcmp.gt.f32.partialorder %v7309_v43, 0.0 }
 0x3d9   :  { %v2744_v44 = vmul.f32 1.442695, %v2694_v30  ;;  %v2332_v24 = vadd.f32 %v2223_v42, %v2089_v60  ;;  %v7320_v39 = vadd.f32 %v7199_v14, %v2574_v21  ;;  %v4049_v26 = vadd.f32 -1.0, %v5429_v57  ;;  %v8013_v21 = vld [vmem:[#allocation12_spill] sm:$0xff] }
 0x3da   :  { %v4927_v15 = vpop.f32.mrf.mxu1  ;;  %5058 = vmatmul.mubr.msk.bf16.vlgmr.msra.gmra.mxu1 %vm941_vm6, %v2875_v41  ;;  %5102 = vmatmul.mubr.msk.bf16.gmra.mxu0 %vm941_vm6, %v2875_v41 }
 0x3db   :  { %v2575_v32 = vadd.f32 %v7021_v17, %v2332_v24  ;;  %5118 = vmatpush3.bf16.msra.mxu1 %v5298_v52  ;;  %5061 = vmatprep.mubr.msk.bf16.mxu1 %vm5576_vm0, %v7917_v56  ;;  %5436 = vpow2.f32 %v2744_v44  ;;  %v2695_v6 = vmin.f32 %v7320_v39, 0.0  ;;  %v2842_v38 = vsel %vm2652_vm4, %v7266_v47, %v4049_v26 }
 0x3dc   :  { %v2226_v63 = vpop.f32.mrf.mxu1  ;;  %5105 = vmatprep.mubr.msk.bf16.mxu0 %vm5576_vm0, %v7917_v56  ;;  %5119 = vmatprep.subr.bf16.mxu1 %v7917_v56  ;;  %v5431_v29 = vpop.eup %5430  ;;  %vm2657_vm10 = vcmp.gt.f32.partialorder %v7320_v39, 0.0 }
 0x3dd   :  { %v7334_v17 = vadd.f32 %v7199_v14, %v2575_v32  ;;  %v2333_v7 = vadd.f32 %v2226_v63, %v2090_v20  ;;  %v4050_v55 = vadd.f32 -1.0, %v5431_v29  ;;  %v2746_v59 = vmul.f32 1.442695, %v2695_v6 }
 0x3de   :  { %v4928_v12 = vpop.f32.mrf.mxu1 }
 0x3df   :  { %v2696_v18 = vmin.f32 %v7334_v17, 0.0  ;;  %v2576_v40 = vadd.f32 %v7030_v34, %v2333_v7  ;;  %5120 = vmatpush3.bf16.msra.mxu1 %v5299_v16  ;;  %v2843_v61 = vsel %vm2653_vm5, %v7278_v0, %v4050_v55  ;;  %5438 = vpow2.f32 %v2746_v59  ;;  %v8015_v7 = vld [vmem:[#allocation75_spill] sm:$0xff] }
 0x3e0   :  { %v5433_v58 = vpop.eup %5432  ;;  %v2231_v50 = vpop.f32.mrf.mxu1  ;;  %5181 = vmatprep.subr.bf16.mxu1 %v7917_v56  ;;  %v2876_v28 = vpack.c.bf16 %v2843_v61, %v2842_v38  ;;  %v2092_v0 = vadd.f32 %v8012_v46, %v7032_v33  ;;  %vm2658_vm11 = vcmp.gt.f32.partialorder %v7334_v17, 0.0 }
 0x3e1   :  { %v2748_v2 = vmul.f32 1.442695, %v2696_v18  ;;  %v7346_v48 = vadd.f32 %v7199_v14, %v2576_v40  ;;  %v2334_v4 = vadd.f32 %v2231_v50, %v2091_v10  ;;  %v4051_v9 = vadd.f32 -1.0, %v5433_v58 }
 0x3e2   :  { %v4931_v34 = vpop.f32.mrf.mxu1  ;;  %5062 = vmatmul.mubr.msk.bf16.gmra.mxu1 %vm941_vm6, %v2876_v28  ;;  %5106 = vmatmul.mubr.msk.bf16.gmra.mxu0 %vm941_vm6, %v2876_v28 }
 0x3e3   :  { %5440 = vpow2.f32 %v2748_v2  ;;  %v2697_v47 = vmin.f32 %v7346_v48, 0.0  ;;  %v2577_v60 = vadd.f32 %v7039_v35, %v2334_v4  ;;  %5065 = vmatprep.mubr.msk.bf16.mxu1 %vm5576_vm0, %v7917_v56  ;;  %5109 = vmatprep.mubr.msk.bf16.mxu0 %vm5576_vm0, %v7917_v56  ;;  %v8014_v35 = vld [vmem:[#allocation92_spill] sm:$0xff]  ;;  %v2844_v57 = vsel %vm2654_vm7, %v7288_v53, %v4051_v9  ;;  %v8018_v34 = vld [vmem:[#allocation14_spill] sm:$0xff] }
 0x3e4   :  { %v5435_v22 = vpop.eup %5434  ;;  %v2234_v3 = vpop.f32.mrf.mxu1  ;;  %v2093_v42 = vadd.f32 %v8014_v35, %v8013_v21  ;;  %v8019_v9 = vld [vmem:[#allocation96_spill] sm:$0xff]  ;;  %v8022_v21 = vld [vmem:[#allocation77_spill] sm:$0xff]  ;;  %vm2659_vm12 = vcmp.gt.f32.partialorder %v7346_v48, 0.0 }
 0x3e5   :  { %v4052_v62 = vadd.f32 -1.0, %v5435_v22  ;;  %v2750_v30 = vmul.f32 1.442695, %v2697_v47  ;;  %v2335_v52 = vadd.f32 %v2234_v3, %v2092_v0  ;;  %v7361_v41 = vadd.f32 %v7199_v14, %v2577_v60 }
 0x3e6   :  { %v4932_v33 = vpop.f32.mrf.mxu1  ;;  %v2095_v47 = vadd.f32 %v8019_v9, %v8018_v34 }
 0x3e7   :  { %v2845_v44 = vsel %vm2655_vm8, %v7299_v49, %v4052_v62  ;;  %5442 = vpow2.f32 %v2750_v30  ;;  %v2578_v24 = vadd.f32 %v7048_v8, %v2335_v52  ;;  %v2698_v32 = vmin.f32 %v7361_v41, 0.0  ;;  %v8016_v8 = vld [vmem:[#allocation11_spill] sm:$0xff]  ;;  %v8017_v49 = vld [vmem:[#allocation94_spill] sm:$0xff] }
 0x3e8   :  { %v2877_v15 = vpack.c.bf16 %v2845_v44, %v2844_v57  ;;  %v2239_v11 = vpop.f32.mrf.mxu1  ;;  %v5437_v20 = vpop.eup %5436  ;;  %v2094_v55 = vadd.f32 %v8017_v49, %v8016_v8  ;;  %vm2660_vm13 = vcmp.gt.f32.partialorder %v7361_v41, 0.0 }
 0x3e9   :  { %v7370_v16 = vadd.f32 %v7199_v14, %v2578_v24  ;;  %v2336_v26 = vadd.f32 %v2239_v11, %v2093_v42  ;;  %v2752_v6 = vmul.f32 1.442695, %v2698_v32  ;;  %v4053_v59 = vadd.f32 -1.0, %v5437_v20  ;;  %v8023_v11 = vld [vmem:[#allocation16_spill] sm:$0xff] }
 0x3ea   :  { %v4935_v63 = vpop.f32.mrf.mxu1  ;;  %5066 = vmatmul.mubr.msk.bf16.gmra.mxu1 %vm941_vm6, %v2877_v15  ;;  %5110 = vmatmul.mubr.msk.bf16.gmra.mxu0 %vm941_vm6, %v2877_v15  ;;  %v8024_v20 = vld [vmem:[#allocation100_spill] sm:$0xff] }
 0x3eb   :  { %v2699_v29 = vmin.f32 %v7370_v16, 0.0  ;;  %v2579_v53 = vadd.f32 %v8015_v7, %v2336_v26  ;;  %5444 = vpow2.f32 %v2752_v6  ;;  %5069 = vmatprep.mubr.msk.bf16.mxu1 %vm5576_vm0, %v7917_v56  ;;  %5113 = vmatprep.mubr.msk.bf16.mxu0 %vm5576_vm0, %v7917_v56  ;;  %v2846_v2 = vsel %vm2656_vm9, %v7309_v43, %v4053_v59  ;;  %v8020_v43 = vld [vmem:[#allocation13_spill] sm:$0xff] }
 0x3ec   :  { %v2242_v12 = vpop.f32.mrf.mxu1  ;;  %v5439_v18 = vpop.eup %5438  ;;  %v2097_v26 = vadd.f32 %v8024_v20, %v8023_v11  ;;  %vm2661_vm14 = vcmp.gt.f32.partialorder %v7370_v16, 0.0 }
 0x3ed   :  { %v2754_v40 = vmul.f32 1.442695, %v2699_v29  ;;  %v7383_v58 = vadd.f32 %v7199_v14, %v2579_v53  ;;  %v2337_v38 = vadd.f32 %v2242_v12, %v2094_v55  ;;  %v4054_v61 = vadd.f32 -1.0, %v5439_v18 }
 0x3ee   :  { %v4936_v1 = vpop.f32.mrf.mxu1 }
 0x3ef   :  { %5446 = vpow2.f32 %v2754_v40  ;;  %v2700_v10 = vmin.f32 %v7383_v58, 0.0  ;;  %v2580_v50 = vadd.f32 %v7066_v5, %v2337_v38  ;;  %v2847_v4 = vsel %vm2657_vm10, %v7320_v39, %v4054_v61  ;;  %v8021_v39 = vld [vmem:[#allocation98_spill] sm:$0xff]  ;;  %v8025_v38 = vld [vmem:[#allocation79_spill] sm:$0xff] }
 0x3f0   :  { %v5441_v28 = vpop.eup %5440  ;;  %v2247_v46 = vpop.f32.mrf.mxu1  ;;  %v7393_v0 = vpack.c.bf16 %v2847_v4, %v2846_v2  ;;  %v2096_v52 = vadd.f32 %v8021_v39, %v8020_v43  ;;  %v8027_v61 = vld [vmem:[#allocation102_spill] sm:$0xff]  ;;  %vm2662_vm15 = vcmp.gt.f32.partialorder %v7383_v58, 0.0 }
 0x3f1   :  { %v2756_v22 = vmul.f32 1.442695, %v2700_v10  ;;  %v7396_v60 = vadd.f32 %v7199_v14, %v2580_v50  ;;  %v2338_v3 = vadd.f32 %v2247_v46, %v2095_v47  ;;  %v4055_v30 = vadd.f32 -1.0, %v5441_v28  ;;  %v8028_v47 = vld [vmem:[#allocation18_spill] sm:$0xff]  ;;  %v8029_v46 = vld [vmem:[#allocation104_spill] sm:$0xff] }
 0x3f2   :  { %v4939_v62 = vpop.f32.mrf.mxu1  ;;  %5070 = vmatmul.mubr.msk.bf16.gmra.mxu1 %vm941_vm6, %v7393_v0  ;;  %5114 = vmatmul.mubr.msk.bf16.gmra.mxu0 %vm941_vm6, %v7393_v0 }
 0x3f3   :  { %5448 = vpow2.f32 %v2756_v22  ;;  %v2701_v5 = vmin.f32 %v7396_v60, 0.0  ;;  %v2581_v35 = vadd.f32 %v8022_v21, %v2338_v3  ;;  %5073 = vmatprep.mubr.msk.bf16.mxu1 %vm5576_vm0, %v7917_v56  ;;  %5153 = vmatprep.mubr.msk.bf16.mxu0 %vm5576_vm0, %v7917_v56  ;;  %v2848_v6 = vsel %vm2658_vm11, %v7334_v17, %v4055_v30 }
 0x3f4   :  { %v5443_v33 = vpop.eup %5442  ;;  %v2250_v42 = vpop.f32.mrf.mxu1  ;;  %v2099_v22 = vadd.f32 %v8029_v46, %v8028_v47  ;;  %vm2663_vm1 = vcmp.gt.f32.partialorder %v7396_v60, 0.0 }
 0x3f5   :  { %v4056_v57 = vadd.f32 -1.0, %v5443_v33  ;;  %v2758_v44 = vmul.f32 1.442695, %v2701_v5  ;;  %v2339_v24 = vadd.f32 %v2250_v42, %v2096_v52  ;;  %v7413_v15 = vadd.f32 %v7199_v14, %v2581_v35 }
 0x3f6   :  { %v4940_v32 = vpop.f32.mrf.mxu1 }
 0x3f7   :  { %v2849_v63 = vsel %vm2659_vm12, %v7346_v48, %v4056_v57  ;;  %5450 = vpow2.f32 %v2758_v44  ;;  %v2582_v29 = vadd.f32 %v7084_v25, %v2339_v24  ;;  %v2702_v53 = vmin.f32 %v7413_v15, 0.0  ;;  %v8026_v25 = vld [vmem:[#allocation15_spill] sm:$0xff]  ;;  %v8031_v44 = vld [vmem:[#allocation105_spill] sm:$0xff] }
 0x3f8   :  { %v7420_v7 = vpack.c.bf16 %v2849_v63, %v2848_v6  ;;  %v2255_v8 = vpop.f32.mrf.mxu1  ;;  %v5445_v49 = vpop.eup %5444  ;;  %v2098_v1 = vadd.f32 %v8027_v61, %v8026_v25  ;;  %vm2664_vm2 = vcmp.gt.f32.partialorder %v7413_v15, 0.0 }
 0x3f9   :  { %v7424_v55 = vadd.f32 %v7199_v14, %v2582_v29  ;;  %v2340_v59 = vadd.f32 %v2255_v8, %v2097_v26  ;;  %v2760_v12 = vmul.f32 1.442695, %v2702_v53  ;;  %v4057_v40 = vadd.f32 -1.0, %v5445_v49  ;;  %v8032_v29 = vld [vmem:[#allocation81_spill] sm:$0xff]  ;;  %v8033_v53 = vld [vmem:[#allocation106_spill] sm:$0xff] }
 0x3fa   :  { %v4943_v18 = vpop.f32.mrf.mxu1  ;;  %5074 = vmatmul.mubr.msk.bf16.gmra.mxu1 %vm941_vm6, %v7420_v7  ;;  %v2101_v8 = vadd.f32 %v8033_v53, %v8032_v29 }
 0x3fb   :  { %v2703_v17 = vmin.f32 %v7424_v55, 0.0  ;;  %v2583_v48 = vadd.f32 %v8025_v38, %v2340_v59  ;;  %5452 = vpow2.f32 %v2760_v12  ;;  %5077 = vmatprep.mubr.msk.bf16.mxu1 %vm5576_vm0, %v7917_v56  ;;  %v2850_v3 = vsel %vm2660_vm13, %v7361_v41, %v4057_v40  ;;  %v8034_v18 = vld [vmem:[#allocation20_spill] sm:$0xff] }
 0x3fc   :  { %v5447_v10 = vpop.eup %5446  ;;  %v2258_v50 = vpop.f32.mrf.mxu1  ;;  %vm2665_vm3 = vcmp.gt.f32.partialorder %v7424_v55, 0.0 }
 0x3fd   :  { %v4058_v28 = vadd.f32 -1.0, %v5447_v10  ;;  %v2762_v2 = vmul.f32 1.442695, %v2703_v17  ;;  %v7435_v4 = vadd.f32 %v7199_v14, %v2583_v48  ;;  %v2341_v34 = vadd.f32 %v2258_v50, %v2098_v1 }
 0x3fe   :  { %v4944_v9 = vpop.f32.mrf.mxu1 }
 0x3ff   :  { %v2851_v62 = vsel %vm2661_vm14, %v7370_v16, %v4058_v28  ;;  %5454 = vpow2.f32 %v2762_v2  ;;  %v2704_v30 = vmin.f32 %v7435_v4, 0.0  ;;  %v2584_v39 = vadd.f32 %v7102_v27, %v2341_v34  ;;  %v8030_v16 = vld [vmem:[#allocation17_spill] sm:$0xff]  ;;  %v8037_v34 = vld [vmem:[#allocation83_spill] sm:$0xff] }
 0x400   :  { %v5449_v5 = vpop.eup %5448  ;;  %v7444_v43 = vpack.c.bf16 %v2851_v62, %v2850_v3  ;;  %v2263_v52 = vpop.f32.mrf.mxu1  ;;  %v2100_v24 = vadd.f32 %v8031_v44, %v8030_v16  ;;  %vm2666_vm4 = vcmp.gt.f32.partialorder %v7435_v4, 0.0 }
 0x401   :  { %v2764_v33 = vmul.f32 1.442695, %v2704_v30  ;;  %v2342_v21 = vadd.f32 %v2263_v52, %v2099_v22  ;;  %v7448_v35 = vadd.f32 %v7199_v14, %v2584_v39  ;;  %v4059_v57 = vadd.f32 -1.0, %v5449_v5  ;;  %v8038_v39 = vld [vmem:[#allocation108_spill] sm:$0xff] }
 0x402   :  { %v4947_v42 = vpop.f32.mrf.mxu1  ;;  %5078 = vmatmul.mubr.msk.bf16.gmra.mxu1 %vm941_vm6, %v7444_v43  ;;  %v2103_v52 = vadd.f32 %v8038_v39, %v7129_v54  ;;  %v8047_v39 = vld [vmem:[#allocation87_spill] sm:$0xff] }
 0x403   :  { %v2585_v41 = vadd.f32 %v7111_v23, %v2342_v21  ;;  %5456 = vpow2.f32 %v2764_v33  ;;  %v2705_v27 = vmin.f32 %v7448_v35, 0.0  ;;  %5081 = vmatprep.mubr.msk.bf16.mxu1 %vm5576_vm0, %v7917_v56  ;;  %v2852_v49 = vsel %vm2662_vm15, %v7383_v58, %v4059_v57  ;;  %v8035_v58 = vld [vmem:[#allocation19_spill] sm:$0xff] }
 0x404   :  { %v5451_v32 = vpop.eup %5450  ;;  %v2266_v11 = vpop.f32.mrf.mxu1  ;;  %vm2667_vm5 = vcmp.gt.f32.partialorder %v7448_v35, 0.0 }
 0x405   :  { %v4060_v20 = vadd.f32 -1.0, %v5451_v32  ;;  %v7459_v26 = vadd.f32 %v7199_v14, %v2585_v41  ;;  %v2343_v6 = vadd.f32 %v2266_v11, %v2100_v24  ;;  %v2766_v23 = vmul.f32 1.442695, %v2705_v27  ;;  %v8039_v41 = vld [vmem:[#allocation22_spill] sm:$0xff]  ;;  %v5302_v24 = vld [vmem:[#allocation6 + $0x48] sm:$0xff]  }
 0x406   :  { %v4948_v63 = vpop.f32.mrf.mxu1 }
 0x407   :  { %v2853_v59 = vsel %vm2663_vm1, %v7396_v60, %v4060_v20  ;;  %v2706_v12 = vmin.f32 %v7459_v26, 0.0  ;;  %v2586_v40 = vadd.f32 %v8034_v18, %v2343_v6  ;;  %5458 = vpow2.f32 %v2766_v23  ;;  %v8036_v60 = vld [vmem:[#allocation107_spill] sm:$0xff]  ;;  %v8041_v6 = vld [vmem:[#allocation21_spill] sm:$0xff]  ;;  %v8042_v23 = vld [vmem:[#allocation110_spill] sm:$0xff] }
 0x408   :  { %v7469_v17 = vpack.c.bf16 %v2853_v59, %v2852_v49  ;;  %v2271_v38 = vpop.f32.mrf.mxu1  ;;  %v5453_v48 = vpop.eup %5452  ;;  %v2102_v50 = vadd.f32 %v8036_v60, %v8035_v58  ;;  %v2104_v63 = vadd.f32 %v8042_v23, %v8041_v6  ;;  %v5303_v49 = vld [vmem:[#allocation6 + $0x40] sm:$0xff]   ;;  %v8043_v60 = vld [vmem:[#allocation24_spill] sm:$0xff]  ;;  %vm2668_vm7 = vcmp.gt.f32.partialorder %v7459_v26, 0.0 }
 0x409   :  { %v2768_v25 = vmul.f32 1.442695, %v2706_v12  ;;  %v7472_v61 = vadd.f32 %v7199_v14, %v2586_v40  ;;  %v2344_v1 = vadd.f32 %v2271_v38, %v2101_v8  ;;  %v4061_v28 = vadd.f32 -1.0, %v5453_v48 }
 0x40a   :  { %v4951_v10 = vpop.f32.mrf.mxu1  ;;  %5154 = vmatmul.mubr.msk.bf16.vlgmr.msra.gmra.mxu0 %vm941_vm6, %v7469_v17  ;;  %5082 = vmatmul.mubr.msk.bf16.gmra.mxu1 %vm941_vm6, %v7469_v17 }
 0x40b   :  { %5460 = vpow2.f32 %v2768_v25  ;;  %v2707_v2 = vmin.f32 %v7472_v61, 0.0  ;;  %v2587_v9 = vadd.f32 %v8037_v34, %v2344_v1  ;;  %5157 = vmatprep.mubr.msk.bf16.mxu0 %vm5576_vm0, %v7917_v56  ;;  %5121 = vmatprep.mubr.msk.bf16.mxu1 %vm5576_vm0, %v7917_v56  ;;  %v2854_v33 = vsel %vm2664_vm2, %v7413_v15, %v4061_v28  ;;  %v8040_v15 = vld [vmem:[#allocation85_spill] sm:$0xff] }
 0x40c   :  { %v5455_v47 = vpop.eup %5454  ;;  %v2274_v46 = vpop.f32.mrf.mxu1  ;;  %vm2669_vm8 = vcmp.gt.f32.partialorder %v7472_v61, 0.0 }
 0x40d   :  { %v4062_v22 = vadd.f32 -1.0, %v5455_v47  ;;  %v2770_v3 = vmul.f32 1.442695, %v2707_v2  ;;  %v7487_v62 = vadd.f32 %v7199_v14, %v2587_v9  ;;  %v2345_v30 = vadd.f32 %v2274_v46, %v2102_v50  ;;  %v8044_v50 = vld [vmem:[#allocation111_spill] sm:$0xff] }
 0x40e   :  { %v4952_v5 = vpop.f32.mrf.mxu1  ;;  %v2105_v28 = vadd.f32 %v8044_v50, %v8043_v60  ;;  %v8053_v60 = vld [vmem:[#allocation27_spill] sm:$0xff] }
 0x40f   :  { %v2855_v21 = vsel %vm2665_vm3, %v7424_v55, %v4062_v22  ;;  %5462 = vpow2.f32 %v2770_v3  ;;  %v2708_v42 = vmin.f32 %v7487_v62, 0.0  ;;  %v2588_v16 = vadd.f32 %v8039_v41, %v2345_v30  ;;  %v8046_v3 = vld [vmem:[#allocation113_spill] sm:$0xff] }
 0x410   :  { %v7496_v57 = vpack.c.bf16 %v2855_v21, %v2854_v33  ;;  %v2279_v44 = vpop.f32.mrf.mxu1  ;;  %v5457_v32 = vpop.eup %5456  ;;  %vm2670_vm9 = vcmp.gt.f32.partialorder %v7487_v62, 0.0 }
 0x411   :  { %v2772_v27 = vmul.f32 1.442695, %v2708_v42  ;;  %v2346_v11 = vadd.f32 %v2279_v44, %v2103_v52  ;;  %v7500_v20 = vadd.f32 %v7199_v14, %v2588_v16  ;;  %v4063_v29 = vadd.f32 -1.0, %v5457_v32  ;;  %v8048_v44 = vld [vmem:[#allocation26_spill] sm:$0xff] }
 0x412   :  { %v4955_v54 = vpop.f32.mrf.mxu1  ;;  %5158 = vmatmul.mubr.msk.bf16.gmra.mxu0 %vm941_vm6, %v7496_v57  ;;  %5122 = vmatmul.mubr.msk.bf16.vlgmr.msra.gmra.mxu1 %vm941_vm6, %v7393_v0 }
 0x413   :  { %v2589_v55 = vadd.f32 %v8040_v15, %v2346_v11  ;;  %5161 = vmatprep.mubr.msk.bf16.mxu0 %vm5576_vm0, %v7917_v56  ;;  %5464 = vpow2.f32 %v2772_v27  ;;  %v2709_v53 = vmin.f32 %v7500_v20, 0.0  ;;  %5182 = vmatpush3.bf16.msra.mxu1 %v5302_v24  ;;  %v2856_v10 = vsel %vm2666_vm4, %v7435_v4, %v4063_v29  ;;  %v8049_v24 = vld [vmem:[#allocation114_spill] sm:$0xff]  ;;  %v8050_v54 = vld [vmem:[#allocation25_spill] sm:$0xff] }
 0x414   :  { %v2282_v8 = vpop.f32.mrf.mxu1  ;;  %5125 = vmatprep.mubr.msk.bf16.mxu1 %vm5576_vm0, %v7917_v56  ;;  %v5459_v59 = vpop.eup %5458  ;;  %5183 = vmatprep.subr.bf16.mxu1 %v7917_v56  ;;  %v2107_v32 = vadd.f32 %v8049_v24, %v8048_v44  ;;  %vm2671_vm10 = vcmp.gt.f32.partialorder %v7500_v20, 0.0 }
 0x415   :  { %v7515_v12 = vadd.f32 %v7199_v14, %v2589_v55  ;;  %v2347_v0 = vadd.f32 %v2282_v8, %v2104_v63  ;;  %v4064_v18 = vadd.f32 -1.0, %v5459_v59  ;;  %v2774_v40 = vmul.f32 1.442695, %v2709_v53 }
 0x416   :  { %v4956_v38 = vpop.f32.mrf.mxu1 }
 0x417   :  { %v2710_v48 = vmin.f32 %v7515_v12, 0.0  ;;  %v2590_v25 = vadd.f32 %v7148_v36, %v2347_v0  ;;  %v2857_v58 = vsel %vm2667_vm5, %v7448_v35, %v4064_v18  ;;  %5466 = vpow2.f32 %v2774_v40  ;;  %5184 = vmatpush3.bf16.msra.mxu1 %v5303_v49  ;;  %v8045_v35 = vld [vmem:[#allocation23_spill] sm:$0xff]  ;;  %v8052_v0 = vld [vmem:[#allocation116_spill] sm:$0xff] }
 0x418   :  { %v5461_v1 = vpop.eup %5460  ;;  %v2287_v2 = vpop.f32.mrf.mxu1  ;;  %v7526_v34 = vpack.c.bf16 %v2857_v58, %v2856_v10  ;;  %5221 = vmatprep.subr.bf16.mxu1 %v7917_v56  ;;  %v2106_v30 = vadd.f32 %v8046_v3, %v8045_v35  ;;  %vm2672_vm11 = vcmp.gt.f32.partialorder %v7515_v12, 0.0 }
 0x419   :  { %v2776_v9 = vmul.f32 1.442695, %v2710_v48  ;;  %v7529_v47 = vadd.f32 %v7199_v14, %v2590_v25  ;;  %v2348_v36 = vadd.f32 %v2287_v2, %v2105_v28  ;;  %v4065_v22 = vadd.f32 -1.0, %v5461_v1 }
 0x41a   :  { %v4959_v46 = vpop.f32.mrf.mxu1  ;;  %5126 = vmatmul.mubr.msk.bf16.gmra.mxu1 %vm941_vm6, %v7420_v7  ;;  %5162 = vmatmul.mubr.msk.bf16.gmra.mxu0 %vm941_vm6, %v7526_v34 }
 0x41b   :  { %5468 = vpow2.f32 %v2776_v9  ;;  %v2711_v4 = vmin.f32 %v7529_v47, 0.0  ;;  %v2591_v52 = vadd.f32 %v8047_v39, %v2348_v36  ;;  %5129 = vmatprep.mubr.msk.bf16.mxu1 %vm5576_vm0, %v7917_v56  ;;  %5165 = vmatprep.mubr.msk.bf16.mxu0 %vm5576_vm0, %v7917_v56  ;;  %v2858_v27 = vsel %vm2668_vm7, %v7459_v26, %v4065_v22  ;;  %v8054_v36 = vld [vmem:[#allocation28_spill] sm:$0xff]  ;;  %v8055_v46 = vld [vmem:[#allocation118_spill] sm:$0xff] }
 0x41c   :  { %v5463_v5 = vpop.eup %5462  ;;  %v2290_v33 = vpop.f32.mrf.mxu1  ;;  %v2109_v22 = vadd.f32 %v8055_v46, %v8054_v36  ;;  %vm2673_vm12 = vcmp.gt.f32.partialorder %v7529_v47, 0.0 }
 0x41d   :  { %v4066_v21 = vadd.f32 -1.0, %v5463_v5  ;;  %v2778_v42 = vmul.f32 1.442695, %v2711_v4  ;;  %v2349_v41 = vadd.f32 %v2290_v33, %v2106_v30  ;;  %v7547_v7 = vadd.f32 %v7199_v14, %v2591_v52 }
 0x41e   :  { %v4960_v16 = vpop.f32.mrf.mxu1 }
 0x41f   :  { %v2859_v11 = vsel %vm2669_vm8, %v7472_v61, %v4066_v21  ;;  %5470 = vpow2.f32 %v2778_v42  ;;  %v2592_v15 = vadd.f32 %v8050_v54, %v2349_v41  ;;  %v2712_v6 = vmin.f32 %v7547_v7, 0.0  ;;  %v8051_v61 = vld [vmem:[#allocation89_spill] sm:$0xff] }
 0x420   :  { %v7554_v55 = vpack.c.bf16 %v2859_v11, %v2858_v27  ;;  %v2295_v23 = vpop.f32.mrf.mxu1  ;;  %v5465_v63 = vpop.eup %5464  ;;  %v2108_v18 = vadd.f32 %v8052_v0, %v8051_v61  ;;  %vm2674_vm13 = vcmp.gt.f32.partialorder %v7547_v7, 0.0 }
 0x421   :  { %v7558_v29 = vadd.f32 %v7199_v14, %v2592_v15  ;;  %v2350_v53 = vadd.f32 %v2295_v23, %v2107_v32  ;;  %v2780_v8 = vmul.f32 1.442695, %v2712_v6  ;;  %v4067_v40 = vadd.f32 -1.0, %v5465_v63 }
 0x422   :  { %v4963_v49 = vpop.f32.mrf.mxu1  ;;  %5130 = vmatmul.mubr.msk.bf16.gmra.mxu1 %vm941_vm6, %v7444_v43  ;;  %5166 = vmatmul.mubr.msk.bf16.gmra.mxu0 %vm941_vm6, %v7554_v55 }
 0x423   :  { %v2713_v59 = vmin.f32 %v7558_v29, 0.0  ;;  %v2593_v26 = vadd.f32 %v7169_v45, %v2350_v53  ;;  %5472 = vpow2.f32 %v2780_v8  ;;  %5133 = vmatprep.mubr.msk.bf16.mxu1 %vm5576_vm0, %v7917_v56  ;;  %5169 = vmatprep.mubr.msk.bf16.mxu0 %vm5576_vm0, %v7917_v56  ;;  %v2860_v2 = vsel %vm2670_vm9, %v7487_v62, %v4067_v40  ;;  %v8056_v62 = vld [vmem:[#allocation119_spill] sm:$0xff] }
 0x424   :  { %v2298_v38 = vpop.f32.mrf.mxu1  ;;  %v5467_v48 = vpop.eup %5466  ;;  %vm2675_vm14 = vcmp.gt.f32.partialorder %v7558_v29, 0.0 }
 0x425   :  { %v2782_v45 = vmul.f32 1.442695, %v2713_v59  ;;  %v7573_v25 = vadd.f32 %v7199_v14, %v2593_v26  ;;  %v2351_v43 = vadd.f32 %v2298_v38, %v2108_v18  ;;  %v4068_v1 = vadd.f32 -1.0, %v5467_v48  ;;  %v8059_v26 = vld [vmem:[#allocation121_spill] sm:$0xff] }
 0x426   :  { %v4964_v10 = vpop.f32.mrf.mxu1 }
 0x427   :  { %5474 = vpow2.f32 %v2782_v45  ;;  %v2714_v58 = vmin.f32 %v7573_v25, 0.0  ;;  %v2594_v50 = vadd.f32 %v8053_v60, %v2351_v43  ;;  %v2861_v9 = vsel %vm2671_vm10, %v7500_v20, %v4068_v1  ;;  %v8060_v60 = vld [vmem:[#allocation30_spill] sm:$0xff] }
 0x428   :  { %v5469_v28 = vpop.eup %5468  ;;  %v2303_v4 = vpop.f32.mrf.mxu1  ;;  %v7583_v35 = vpack.c.bf16 %v2861_v9, %v2860_v2  ;;  %v2110_v20 = vadd.f32 %v8056_v62, %v7178_v13  ;;  %vm2676_vm15 = vcmp.gt.f32.partialorder %v7573_v25, 0.0 }
 0x429   :  { %v2784_v3 = vmul.f32 1.442695, %v2714_v58  ;;  %v7586_v30 = vadd.f32 %v7199_v14, %v2594_v50  ;;  %v2352_v5 = vadd.f32 %v2303_v4, %v2109_v22  ;;  %v4069_v52 = vadd.f32 -1.0, %v5469_v28 }
 0x42a   :  { %v4967_v39 = vpop.f32.mrf.mxu1  ;;  %5134 = vmatmul.mubr.msk.bf16.gmra.mxu1 %vm941_vm6, %v7469_v17  ;;  %5170 = vmatmul.mubr.msk.bf16.gmra.mxu0 %vm941_vm6, %v7583_v35 }
 0x42b   :  { %5476 = vpow2.f32 %v2784_v3  ;;  %v2715_v33 = vmin.f32 %v7586_v30, 0.0  ;;  %v2595_v42 = vadd.f32 %v7183_v31, %v2352_v5  ;;  %5137 = vmatprep.mubr.msk.bf16.mxu1 %vm5576_vm0, %v7917_v56  ;;  %5173 = vmatprep.mubr.msk.bf16.mxu0 %vm5576_vm0, %v7917_v56  ;;  %v8057_v31 = vld [vmem:[#allocation120_spill] sm:$0xff]  ;;  %v2862_v27 = vsel %vm2672_vm11, %v7515_v12, %v4069_v52 }
 0x42c   :  { %v5471_v21 = vpop.eup %5470  ;;  %v2306_v41 = vpop.f32.mrf.mxu1  ;;  %v2111_v32 = vadd.f32 %v8057_v31, %v7185_v51  ;;  %vm2677_vm1 = vcmp.gt.f32.partialorder %v7586_v30, 0.0 }
 0x42d   :  { %v4070_v16 = vadd.f32 -1.0, %v5471_v21  ;;  %v2786_v44 = vmul.f32 1.442695, %v2715_v33  ;;  %v2353_v24 = vadd.f32 %v2306_v41, %v2110_v20  ;;  %v7603_v17 = vadd.f32 %v7199_v14, %v2595_v42  ;;  %v5505_v14 = vld [vmem:[%s7765_s4] ss:$0 sm:$0xff] }
 0x42e   :  { %v4968_v13 = vpop.f32.mrf.mxu1 }
 0x42f   :  { %v2863_v11 = vsel %vm2673_vm12, %v7529_v47, %v4070_v16  ;;  %5478 = vpow2.f32 %v2786_v44  ;;  %v2596_v54 = vadd.f32 %v7188_v37, %v2353_v24  ;;  %v2716_v6 = vmin.f32 %v7603_v17, 0.0  ;;  %v8058_v37 = vld [vmem:[#allocation91_spill] sm:$0xff] }
 0x430   :  { %v7610_v15 = vpack.c.bf16 %v2863_v11, %v2862_v27  ;;  %v2311_v23 = vpop.f32.mrf.mxu1  ;;  %v5473_v63 = vpop.eup %5472  ;;  %v2112_v61 = vadd.f32 %v8059_v26, %v8058_v37  ;;  %vm2678_vm2 = vcmp.gt.f32.partialorder %v7603_v17, 0.0  ;;  %v5305_v37 = vld [vmem:[%s7768_s7 + $0x8] sm:$0xff]  }
 0x431   :  { %v2641_v53 = vadd.f32 %v5505_v14, %v2596_v54  ;;  %v2354_v8 = vadd.f32 %v2311_v23, %v2111_v32  ;;  %v2788_v51 = vmul.f32 1.442695, %v2716_v6  ;;  %v4071_v12 = vadd.f32 -1.0, %v5473_v63 }
 0x432   :  { %v4971_v49 = vpop.f32.mrf.mxu1  ;;  %5138 = vmatmul.mubr.msk.bf16.gmra.mxu1 %vm941_vm6, %v7496_v57  ;;  %5174 = vmatmul.mubr.msk.bf16.gmra.mxu0 %vm941_vm6, %v7610_v15 }
 0x433   :  { %v2717_v59 = vmin.f32 %v2641_v53, 0.0  ;;  %v2597_v47 = vadd.f32 %v7194_v19, %v2354_v8  ;;  %5480 = vpow2.f32 %v2788_v51  ;;  %5141 = vmatprep.mubr.msk.bf16.mxu1 %vm5576_vm0, %v7917_v56  ;;  %5177 = vmatprep.mubr.msk.bf16.mxu0 %vm5576_vm0, %v7917_v56  ;;  %v2864_v45 = vsel %vm2674_vm13, %v7547_v7, %v4071_v12 }
 0x434   :  { %v5475_v0 = vpop.eup %5474  ;;  %v2314_v18 = vpop.f32.mrf.mxu1  ;;  %vm2679_vm3 = vcmp.gt.f32.partialorder %v2641_v53, 0.0 }
 0x435   :  { %v4072_v40 = vadd.f32 -1.0, %v5475_v0  ;;  %v2790_v19 = vmul.f32 1.442695, %v2717_v59  ;;  %v2642_v38 = vadd.f32 %v5505_v14, %v2597_v47  ;;  %v2355_v48 = vadd.f32 %v2314_v18, %v2112_v61 }
 0x436   :  { %v4972_v57 = vpop.f32.mrf.mxu1 }
 0x437   :  { %v2865_v43 = vsel %vm2675_vm14, %v7558_v29, %v4072_v40  ;;  %5482 = vpow2.f32 %v2790_v19  ;;  %v2718_v1 = vmin.f32 %v2642_v38, 0.0  ;;  %v2598_v50 = vadd.f32 %v8060_v60, %v2355_v48  ;;  %v5306_v40 = vld [vmem:[%s7768_s7] sm:$0xff]  }
 0x438   :  { %v5477_v10 = vpop.eup %5476  ;;  %v2887_v58 = vpack.c.bf16 %v2865_v43, %v2864_v45  ;;  %vm2680_vm4 = vcmp.gt.f32.partialorder %v2642_v38, 0.0  ;;  %v5304_v45 = vld [vmem:[%s7768_s7 + $0x18] sm:$0xff]   ;;  %vm3780_vm14 = vcmask 23552  }
 0x439   :  { %v2792_v28 = vmul.f32 1.442695, %v2718_v1  ;;  %v2643_v2 = vadd.f32 %v5505_v14, %v2598_v50  ;;  %v4073_v9 = vadd.f32 -1.0, %v5477_v10  ;;  %5214 = vmatpush3.bf16.msra.mxu0 %v5304_v45 }
 0x43a   :  { %5142 = vmatmul.mubr.msk.bf16.gmra.mxu1 %vm941_vm6, %v7526_v34  ;;  %5178 = vmatmul.mubr.msk.bf16.gmra.mxu0 %vm941_vm6, %v2887_v58 }
 0x43b   :  { %5484 = vpow2.f32 %v2792_v28  ;;  %v2719_v46 = vmin.f32 %v2643_v2, 0.0  ;;  %5145 = vmatprep.mubr.msk.bf16.mxu1 %vm5576_vm0, %v7917_v56  ;;  %5217 = vmatprep.mubr.msk.bf16.mxu0 %vm5576_vm0, %v7917_v56  ;;  %v2866_v22 = vsel %vm2676_vm15, %v7573_v25, %v4073_v9  ;;  %vm2681_vm5 = vcmp.gt.f32.partialorder %v2643_v2, 0.0 }
 0x43c   :  { %v5479_v36 = vpop.eup %5478  ;;  %5215 = vmatprep.subr.bf16.mxu0 %v7917_v56 }
 0x43d   :  { %v4074_v7 = vadd.f32 -1.0, %v5479_v36  ;;  %v2794_v29 = vmul.f32 1.442695, %v2719_v46 }
 0x43f   :  { %v2867_v34 = vsel %vm2677_vm1, %v7586_v30, %v4074_v7  ;;  %5486 = vpow2.f32 %v2794_v29 }
 0x440   :  { %v2888_v4 = vpack.c.bf16 %v2867_v34, %v2866_v22  ;;  %v5481_v3 = vpop.eup %5480 }
 0x441   :  { %v4075_v5 = vadd.f32 -1.0, %v5481_v3 }
 0x442   :  { %5146 = vmatmul.mubr.msk.bf16.gmra.mxu1 %vm941_vm6, %v7554_v55 }
 0x443   :  { %5185 = vmatprep.mubr.msk.bf16.mxu1 %vm5576_vm0, %v7917_v56  ;;  %v2868_v33 = vsel %vm2678_vm2, %v7603_v17, %v4075_v5 }
 0x444   :  { %v5483_v39 = vpop.eup %5482 }
 0x445   :  { %v4076_v52 = vadd.f32 -1.0, %v5483_v39 }
 0x447   :  { %v2869_v25 = vsel %vm2679_vm3, %v2641_v53, %v4076_v52 }
 0x448   :  { %v2889_v62 = vpack.c.bf16 %v2869_v25, %v2868_v33  ;;  %v5485_v30 = vpop.eup %5484  ;;  %v5307_v33 = vld [vmem:[%s7768_s7 + $0x10] sm:$0xff]  }
 0x449   :  { %v4077_v20 = vadd.f32 -1.0, %v5485_v30  ;;  %5216 = vmatpush3.bf16.msra.mxu0 %v5307_v33 }
 0x44a   :  { %5186 = vmatmul.mubr.msk.bf16.vlgmr.msra.gmra.mxu1 %vm941_vm6, %v7554_v55  ;;  %5229 = vmatprep.subr.bf16.mxu0 %v7917_v56 }
 0x44b   :  { %5189 = vmatprep.mubr.msk.bf16.mxu1 %vm5576_vm0, %v7917_v56  ;;  %v2870_v41 = vsel %vm2680_vm4, %v2642_v38, %v4077_v20  ;;  %5222 = vmatpush3.bf16.msra.mxu1 %v5305_v37 }
 0x44c   :  { %v5487_v21 = vpop.eup %5486  ;;  %5223 = vmatprep.subr.bf16.mxu1 %v7917_v56 }
 0x44d   :  { %v4078_v42 = vadd.f32 -1.0, %v5487_v21 }
 0x44f   :  { %v2871_v16 = vsel %vm2681_vm5, %v2643_v2, %v4078_v42  ;;  %5224 = vmatpush3.bf16.msra.mxu1 %v5306_v40 }
 0x450   :  { %v2890_v44 = vpack.c.bf16 %v2871_v16, %v2870_v41  ;;  %5237 = vmatprep.subr.bf16.mxu1 %v7917_v56 }
 0x452   :  { %5190 = vmatmul.mubr.msk.bf16.gmra.mxu1 %vm941_vm6, %v7583_v35 }
 0x453   :  { %5193 = vmatprep.mubr.msk.bf16.mxu1 %vm5576_vm0, %v7917_v56 }
 0x45a   :  { %5194 = vmatmul.mubr.msk.bf16.gmra.mxu1 %vm941_vm6, %v7610_v15 }
 0x45b   :  { %5197 = vmatprep.mubr.msk.bf16.mxu1 %vm5576_vm0, %v7917_v56 }
 0x462   :  { %5198 = vmatmul.mubr.msk.bf16.gmra.mxu1 %vm941_vm6, %v2887_v58 }
 0x463   :  { %5201 = vmatprep.mubr.msk.bf16.mxu1 %vm5576_vm0, %v7917_v56 }
 0x46a   :  { %5202 = vmatmul.mubr.msk.bf16.gmra.mxu1 %vm941_vm6, %v2888_v4 }
 0x46b   :  { %5205 = vmatprep.mubr.msk.bf16.mxu1 %vm5576_vm0, %v7917_v56 }
 0x472   :  { %5206 = vmatmul.mubr.msk.bf16.gmra.mxu1 %vm941_vm6, %v2889_v62 }
 0x473   :  { %5209 = vmatprep.mubr.msk.bf16.mxu1 %vm5576_vm0, %v7917_v56 }
 0x47a   :  { %5210 = vmatmul.mubr.msk.bf16.gmra.mxu1 %vm941_vm6, %v2890_v44 }
 0x47b   :  { %5225 = vmatprep.mubr.msk.bf16.mxu1 %vm5576_vm0, %v7917_v56 }
 0x482   :  { %v3069_v55 = vpop.f32.mrf.mxu0 }
 0x484   :  { %v5091_v35 = vpop.f32.mrf.mxu0 }
 0x486   :  { %v3072_v24 = vpop.f32.mrf.mxu0 }
 0x488   :  { %v5092_v17 = vpop.f32.mrf.mxu0 }
 0x48a   :  { %v3077_v13 = vpop.f32.mrf.mxu0 }
 0x48c   :  { %v5095_v31 = vpop.f32.mrf.mxu0 }
 0x48e   :  { %v3079_v32 = vpop.f32.mrf.mxu0 }
 0x490   :  { %v5096_v27 = vpop.f32.mrf.mxu0 }
 0x492   :  { %v3083_v11 = vpop.f32.mrf.mxu0 }
 0x494   :  { %v5099_v54 = vpop.f32.mrf.mxu0 }
 0x496   :  { %v3085_v15 = vpop.f32.mrf.mxu0 }
 0x498   :  { %v5100_v6 = vpop.f32.mrf.mxu0 }
 0x49a   :  { %v2967_v23 = vpop.f32.mrf.mxu1  ;;  %v3089_v63 = vpop.f32.mrf.mxu0 }
 0x49b   :  { %v7673_v14 = vadd.f32 %v3069_v55, %v2967_v23 }
 0x49c   :  { %v5059_v53 = vpop.f32.mrf.mxu1  ;;  %v5103_v8 = vpop.f32.mrf.mxu0 }
 0x49e   :  { %v2970_v51 = vpop.f32.mrf.mxu1  ;;  %v3092_v49 = vpop.f32.mrf.mxu0 }
 0x49f   :  { %v7675_v12 = vadd.f32 %v3072_v24, %v2970_v51 }
 0x4a0   :  { %v5060_v59 = vpop.f32.mrf.mxu1  ;;  %v5104_v47 = vpop.f32.mrf.mxu0 }
 0x4a2   :  { %v2975_v26 = vpop.f32.mrf.mxu1  ;;  %v3097_v61 = vpop.f32.mrf.mxu0 }
 0x4a4   :  { %v5063_v0 = vpop.f32.mrf.mxu1  ;;  %v5107_v18 = vpop.f32.mrf.mxu0 }
 0x4a6   :  { %v2977_v19 = vpop.f32.mrf.mxu1  ;;  %v3099_v38 = vpop.f32.mrf.mxu0 }
 0x4a8   :  { %v5064_v48 = vpop.f32.mrf.mxu1  ;;  %v5108_v57 = vpop.f32.mrf.mxu0 }
 0x4aa   :  { %v2981_v43 = vpop.f32.mrf.mxu1  ;;  %v3103_v1 = vpop.f32.mrf.mxu0 }
 0x4ac   :  { %v5067_v10 = vpop.f32.mrf.mxu1  ;;  %v5111_v58 = vpop.f32.mrf.mxu0 }
 0x4ae   :  { %v2983_v60 = vpop.f32.mrf.mxu1  ;;  %v3105_v50 = vpop.f32.mrf.mxu0 }
 0x4b0   :  { %v5068_v28 = vpop.f32.mrf.mxu1  ;;  %v5112_v2 = vpop.f32.mrf.mxu0 }
 0x4b2   :  { %v2987_v9 = vpop.f32.mrf.mxu1  ;;  %v3109_v36 = vpop.f32.mrf.mxu0 }
 0x4b3   :  { %v3090_v46 = vadd.f32 %v3089_v63, %v2987_v9 }
 0x4b4   :  { %v5071_v7 = vpop.f32.mrf.mxu1  ;;  %v5115_v29 = vpop.f32.mrf.mxu0 }
 0x4b6   :  { %v2990_v22 = vpop.f32.mrf.mxu1  ;;  %v3112_v34 = vpop.f32.mrf.mxu0 }
 0x4b7   :  { %v7689_v4 = vadd.f32 %v3092_v49, %v2990_v22 }
 0x4b8   :  { %v5072_v3 = vpop.f32.mrf.mxu1  ;;  %v5116_v5 = vpop.f32.mrf.mxu0 }
 0x4ba   :  { %v2995_v39 = vpop.f32.mrf.mxu1 }
 0x4bc   :  { %v5075_v52 = vpop.f32.mrf.mxu1 }
 0x4be   :  { %v2997_v25 = vpop.f32.mrf.mxu1 }
 0x4c0   :  { %v5076_v62 = vpop.f32.mrf.mxu1 }
 0x4c2   :  { %v3001_v30 = vpop.f32.mrf.mxu1 }
 0x4c4   :  { %v5079_v20 = vpop.f32.mrf.mxu1 }
 0x4c6   :  { %v3003_v21 = vpop.f32.mrf.mxu1 }
 0x4c8   :  { %v5080_v42 = vpop.f32.mrf.mxu1 }
 0x4ca   :  { %v3289_v41 = vpop.f32.mrf.mxu0  ;;  %v3007_v16 = vpop.f32.mrf.mxu1 }
 0x4cb   :  { %v3110_v44 = vadd.f32 %v3109_v36, %v3007_v16 }
 0x4cc   :  { %v5155_v55 = vpop.f32.mrf.mxu0  ;;  %v5083_v35 = vpop.f32.mrf.mxu1 }
 0x4ce   :  { %v7695_v24 = vpop.f32.mrf.mxu0  ;;  %v3010_v17 = vpop.f32.mrf.mxu1 }
 0x4cf   :  { %v7697_v13 = vadd.f32 %v3112_v34, %v3010_v17 }
 0x4d0   :  { %v5156_v31 = vpop.f32.mrf.mxu0  ;;  %v5084_v32 = vpop.f32.mrf.mxu1 }
 0x4d2   :  { %v3297_v27 = vpop.f32.mrf.mxu0  ;;  %v3176_v11 = vpop.f32.mrf.mxu1 }
 0x4d3   :  { %v3223_v54 = vadd.f32 %v3176_v11, %v7673_v14 }
 0x4d4   :  { %v5159_v15 = vpop.f32.mrf.mxu0  ;;  %v5123_v6 = vpop.f32.mrf.mxu1 }
 0x4d5   :  { %v3336_v63 = vadd.f32 %v3289_v41, %v3223_v54  ;;  %v7712_v54 = vld [vmem:[%s7767_s6] ss:$0 sm:$0xff] }
 0x4d6   :  { %v3299_v23 = vpop.f32.mrf.mxu0  ;;  %v3179_v53 = vpop.f32.mrf.mxu1 }
 0x4d7   :  { %v3224_v27 = vadd.f32 %v3179_v53, %v7675_v12 }
 0x4d8   :  { %v5160_v8 = vpop.f32.mrf.mxu0  ;;  %v5124_v51 = vpop.f32.mrf.mxu1 }
 0x4da   :  { %v3184_v49 = vpop.f32.mrf.mxu1  ;;  %v3303_v59 = vpop.f32.mrf.mxu0 }
 0x4dc   :  { %v5127_v47 = vpop.f32.mrf.mxu1  ;;  %v5163_v37 = vpop.f32.mrf.mxu0 }
 0x4de   :  { %v3186_v26 = vpop.f32.mrf.mxu1  ;;  %v3305_v61 = vpop.f32.mrf.mxu0 }
 0x4e0   :  { %v5128_v0 = vpop.f32.mrf.mxu1  ;;  %v5164_v18 = vpop.f32.mrf.mxu0 }
 0x4e2   :  { %v3190_v40 = vpop.f32.mrf.mxu1  ;;  %v3309_v19 = vpop.f32.mrf.mxu0 }
 0x4e4   :  { %v5131_v38 = vpop.f32.mrf.mxu1  ;;  %v5167_v48 = vpop.f32.mrf.mxu0 }
 0x4e6   :  { %v3192_v14 = vpop.f32.mrf.mxu1  ;;  %v7700_v57 = vpop.f32.mrf.mxu0 }
 0x4e8   :  { %v5132_v45 = vpop.f32.mrf.mxu1  ;;  %v5168_v43 = vpop.f32.mrf.mxu0 }
 0x4ea   :  { %v3196_v1 = vpop.f32.mrf.mxu1  ;;  %v3317_v10 = vpop.f32.mrf.mxu0 }
 0x4eb   :  { %v3225_v58 = vadd.f32 %v3196_v1, %v3090_v46 }
 0x4ec   :  { %v5135_v60 = vpop.f32.mrf.mxu1  ;;  %v5171_v50 = vpop.f32.mrf.mxu0 }
 0x4ed   :  { %v3338_v28 = vadd.f32 %v3309_v19, %v3225_v58 }
 0x4ee   :  { %v3199_v2 = vpop.f32.mrf.mxu1  ;;  %v3319_v9 = vpop.f32.mrf.mxu0 }
 0x4ef   :  { %v3226_v48 = vadd.f32 %v3199_v2, %v7689_v4 }
 0x4f0   :  { %v5136_v36 = vpop.f32.mrf.mxu1  ;;  %v5172_v7 = vpop.f32.mrf.mxu0 }
 0x4f1   :  { %v3339_v50 = vadd.f32 %v7700_v57, %v3226_v48 }
 0x4f2   :  { %v3204_v29 = vpop.f32.mrf.mxu1  ;;  %v3323_v22 = vpop.f32.mrf.mxu0 }
 0x4f4   :  { %v5139_v34 = vpop.f32.mrf.mxu1  ;;  %v5175_v3 = vpop.f32.mrf.mxu0 }
 0x4f6   :  { %v3206_v5 = vpop.f32.mrf.mxu1  ;;  %v3325_v39 = vpop.f32.mrf.mxu0 }
 0x4f8   :  { %v5140_v52 = vpop.f32.mrf.mxu1  ;;  %v5176_v33 = vpop.f32.mrf.mxu0 }
 0x4fa   :  { %v3210_v25 = vpop.f32.mrf.mxu1  ;;  %v3329_v62 = vpop.f32.mrf.mxu0 }
 0x4fc   :  { %v5143_v30 = vpop.f32.mrf.mxu1  ;;  %v5179_v20 = vpop.f32.mrf.mxu0 }
 0x4fe   :  { %v3212_v46 = vpop.f32.mrf.mxu1  ;;  %v7702_v21 = vpop.f32.mrf.mxu0 }
 0x500   :  { %v5144_v42 = vpop.f32.mrf.mxu1  ;;  %v5180_v41 = vpop.f32.mrf.mxu0 }
 0x502   :  { %v3216_v16 = vpop.f32.mrf.mxu1 }
 0x503   :  { %v3227_v55 = vadd.f32 %v3216_v16, %v3110_v44  ;;  %v3337_v44 = vadd.f32 %v7695_v24, %v3224_v27 }
 0x504   :  { %v5147_v35 = vpop.f32.mrf.mxu1 }
 0x505   :  { %v7704_v17 = vadd.f32 %v3329_v62, %v3227_v55 }
 0x506   :  { %v7706_v31 = vpop.f32.mrf.mxu1 }
 0x507   :  { %v3228_v42 = vadd.f32 %v7706_v31, %v7697_v13  ;;  %v5308_v13 = vld [vmem:[%s7768_s7 + $0x28] sm:$0xff]  }
 0x508   :  { %v5148_v32 = vpop.f32.mrf.mxu1 }
 0x50a   :  { %v3402_v11 = vpop.f32.mrf.mxu1 }
 0x50b   :  { %v3449_v15 = vadd.f32 %v3402_v11, %v3336_v63 }
 0x50c   :  { %v5187_v6 = vpop.f32.mrf.mxu1 }
 0x50d   :  { %v3462_v23 = vadd.f32 %v7712_v54, %v3449_v15  ;;  %v3341_v15 = vadd.f32 %v7702_v21, %v3228_v42 }
 0x50e   :  { %v3405_v8 = vpop.f32.mrf.mxu1 }
 0x50f   :  { %v3474_v51 = vmin.f32 %v3462_v23, 0.0  ;;  %v3450_v49 = vadd.f32 %v3405_v8, %v3337_v44  ;;  %vm3468_vm7 = vcmp.gt.f32.partialorder %v3462_v23, 0.0 }
 0x510   :  { %v5188_v59 = vpop.f32.mrf.mxu1 }
 0x511   :  { %v3480_v47 = vmul.f32 1.442695, %v3474_v51  ;;  %v3463_v37 = vadd.f32 %v7712_v54, %v3450_v49 }
 0x512   :  { %v3410_v12 = vpop.f32.mrf.mxu1 }
 0x513   :  { %5488 = vpow2.f32 %v3480_v47  ;;  %v3475_v53 = vmin.f32 %v3463_v37, 0.0  ;;  %vm3469_vm8 = vcmp.gt.f32.partialorder %v3463_v37, 0.0  ;;  %v5309_v47 = vld [vmem:[%s7768_s7 + $0x20] sm:$0xff]  }
 0x514   :  { %v5191_v26 = vpop.f32.mrf.mxu1 }
 0x515   :  { %v3482_v61 = vmul.f32 1.442695, %v3475_v53 }
 0x516   :  { %v3412_v0 = vpop.f32.mrf.mxu1 }
 0x517   :  { %5490 = vpow2.f32 %v3482_v61 }
 0x518   :  { %v5192_v63 = vpop.f32.mrf.mxu1 }
 0x51a   :  { %v3416_v18 = vpop.f32.mrf.mxu1 }
 0x51b   :  { %v5310_v18 = vld [vmem:[%s7770_s9 + $0x8] sm:$0xff]  }
 0x51c   :  { %v5195_v40 = vpop.f32.mrf.mxu1 }
 0x51d   :  { %v5311_v40 = vld [vmem:[%s7770_s9] sm:$0xff]  }
 0x51e   :  { %v3418_v19 = vpop.f32.mrf.mxu1 }
 0x520   :  { %v5489_v38 = vpop.eup %5488  ;;  %v5196_v24 = vpop.f32.mrf.mxu1 }
 0x521   :  { %v4125_v45 = vadd.f32 -1.0, %v5489_v38 }
 0x522   :  { %v3422_v14 = vpop.f32.mrf.mxu1 }
 0x523   :  { %v3451_v43 = vadd.f32 %v3422_v14, %v3338_v28  ;;  %v3498_v36 = vsel %vm3468_vm7, %v3462_v23, %v4125_v45 }
 0x524   :  { %v5491_v1 = vpop.eup %5490  ;;  %v5199_v10 = vpop.f32.mrf.mxu1 }
 0x525   :  { %v4126_v58 = vadd.f32 -1.0, %v5491_v1  ;;  %v3464_v60 = vadd.f32 %v7712_v54, %v3451_v43 }
 0x526   :  { %v3425_v9 = vpop.f32.mrf.mxu1 }
 0x527   :  { %v3499_v7 = vsel %vm3469_vm8, %v3463_v37, %v4126_v58  ;;  %v3476_v29 = vmin.f32 %v3464_v60, 0.0  ;;  %v3452_v22 = vadd.f32 %v3425_v9, %v3339_v50  ;;  %vm3470_vm9 = vcmp.gt.f32.partialorder %v3464_v60, 0.0 }
 0x528   :  { %v3504_v34 = vpack.c.bf16 %v3499_v7, %v3498_v36  ;;  %v5200_v3 = vpop.f32.mrf.mxu1 }
 0x529   :  { %v3484_v4 = vmul.f32 1.442695, %v3476_v29  ;;  %v3465_v2 = vadd.f32 %v7712_v54, %v3452_v22 }
 0x52a   :  { %v3430_v28 = vpop.f32.mrf.mxu1  ;;  %5226 = vmatmul.mubr.msk.bf16.vlgmr.msra.gmra.mxu1 %vm941_vm6, %v3504_v34 }
 0x52b   :  { %5492 = vpow2.f32 %v3484_v4  ;;  %v3477_v5 = vmin.f32 %v3465_v2, 0.0  ;;  %5241 = vmatprep.mubr.msk.bf16.mxu1 %vm5576_vm0, %v7917_v56  ;;  %vm3471_vm10 = vcmp.gt.f32.partialorder %v3465_v2, 0.0  ;;  %5238 = vmatpush3.bf16.msra.mxu1 %v5310_v18 }
 0x52c   :  { %v5203_v57 = vpop.f32.mrf.mxu1  ;;  %5239 = vmatprep.subr.bf16.mxu1 %v7917_v56 }
 0x52d   :  { %v3486_v39 = vmul.f32 1.442695, %v3477_v5 }
 0x52e   :  { %v3432_v52 = vpop.f32.mrf.mxu1 }
 0x52f   :  { %5494 = vpow2.f32 %v3486_v39  ;;  %5240 = vmatpush3.bf16.msra.mxu1 %v5311_v40 }
 0x530   :  { %v5204_v33 = vpop.f32.mrf.mxu1 }
 0x532   :  { %v3436_v25 = vpop.f32.mrf.mxu1 }
 0x534   :  { %v5207_v62 = vpop.f32.mrf.mxu1 }
 0x536   :  { %v3438_v30 = vpop.f32.mrf.mxu1 }
 0x537   :  { %v4151_v30 = vld [vmem:[%s7771_s10] ss:$0 sm:$0xff] }
 0x538   :  { %v5493_v20 = vpop.eup %5492  ;;  %v5208_v46 = vpop.f32.mrf.mxu1 }
 0x539   :  { %v4127_v16 = vadd.f32 -1.0, %v5493_v20 }
 0x53a   :  { %v3442_v41 = vpop.f32.mrf.mxu1 }
 0x53b   :  { %v3453_v55 = vadd.f32 %v3442_v41, %v7704_v17  ;;  %v3500_v23 = vsel %vm3470_vm9, %v3464_v60, %v4127_v16  ;;  %v4148_v60 = vld [vmem:[%s7769_s8] ss:$0 sm:$0xff] }
 0x53c   :  { %v5495_v35 = vpop.eup %5494  ;;  %v5211_v32 = vpop.f32.mrf.mxu1 }
 0x53d   :  { %v4128_v27 = vadd.f32 -1.0, %v5495_v35  ;;  %v3466_v11 = vadd.f32 %v7712_v54, %v3453_v55 }
 0x53e   :  { %v3445_v6 = vpop.f32.mrf.mxu1 }
 0x53f   :  { %v3501_v44 = vsel %vm3471_vm10, %v3465_v2, %v4128_v27  ;;  %v3478_v8 = vmin.f32 %v3466_v11, 0.0  ;;  %v3454_v51 = vadd.f32 %v3445_v6, %v3341_v15  ;;  %vm3472_vm11 = vcmp.gt.f32.partialorder %v3466_v11, 0.0 }
 0x540   :  { %v3505_v31 = vpack.c.bf16 %v3501_v44, %v3500_v23  ;;  %v5212_v17 = vpop.f32.mrf.mxu1 }
 0x541   :  { %v3488_v49 = vmul.f32 1.442695, %v3478_v8  ;;  %v3467_v59 = vadd.f32 %v7712_v54, %v3454_v51 }
 0x542   :  { %5218 = vmatmul.mubr.msk.bf16.vlgmr.msra.gmra.mxu0 %vm941_vm6, %v3505_v31 }
 0x543   :  { %5496 = vpow2.f32 %v3488_v49  ;;  %v3479_v21 = vmin.f32 %v3467_v59, 0.0  ;;  %5230 = vmatpush3.bf16.msra.mxu0 %v5308_v13  ;;  %5233 = vmatprep.mubr.msk.bf16.mxu0 %vm5576_vm0, %v7917_v56  ;;  %vm3473_vm12 = vcmp.gt.f32.partialorder %v3467_v59, 0.0 }
 0x544   :  { %5231 = vmatprep.subr.bf16.mxu0 %v7917_v56 }
 0x545   :  { %v3490_v37 = vmul.f32 1.442695, %v3479_v21 }
 0x547   :  { %5498 = vpow2.f32 %v3490_v37  ;;  %5232 = vmatpush3.bf16.msra.mxu0 %v5309_v47 }
 0x550   :  { %v5497_v12 = vpop.eup %5496 }
 0x551   :  { %v4129_v53 = vadd.f32 -1.0, %v5497_v12 }
 0x553   :  { %v3502_v61 = vsel %vm3472_vm11, %v3466_v11, %v4129_v53 }
 0x554   :  { %v5499_v54 = vpop.eup %5498 }
 0x555   :  { %v4130_v26 = vadd.f32 -1.0, %v5499_v54 }
 0x557   :  { %v3503_v0 = vsel %vm3473_vm12, %v3467_v59, %v4130_v26 }
 0x558   :  { %v3506_v63 = vpack.c.bf16 %v3503_v0, %v3502_v61 }
 0x55a   :  { %5234 = vmatmul.mubr.msk.bf16.vlgmr.msra.gmra.mxu0 %vm941_vm6, %v3506_v63 }
 0x5ea   :  { %v3621_v19 = vpop.f32.mrf.mxu1 }
 0x5ec   :  { %v5227_v38 = vpop.f32.mrf.mxu1 }
 0x5ee   :  { %v3624_v24 = vpop.f32.mrf.mxu1 }
 0x5f0   :  { %v5228_v48 = vpop.f32.mrf.mxu1 }
 0x602   :  { %v3565_v14 = vpop.f32.mrf.mxu0 }
 0x603   :  { %v3622_v10 = vadd.f32 %v3621_v19, %v3565_v14 }
 0x604   :  { %v5219_v45 = vpop.f32.mrf.mxu0 }
 0x606   :  { %v3568_v43 = vpop.f32.mrf.mxu0 }
 0x607   :  { %v3625_v9 = vadd.f32 %v3624_v24, %v3568_v43 }
 0x608   :  { %v5220_v1 = vpop.f32.mrf.mxu0 }
 0x61a   :  { %v3682_v58 = vpop.f32.mrf.mxu0 }
 0x61b   :  { %v3689_v56 = vadd.f32 %v3682_v58, %v3622_v10 }
 0x61c   :  { %v5235_v50 = vpop.f32.mrf.mxu0 }
 0x61d   :  { %v3698_v36 = vadd.f32 %v4148_v60, %v3689_v56 }
 0x61e   :  { %v3685_v7 = vpop.f32.mrf.mxu0 }
 0x61f   :  { %v3702_v29 = vmin.f32 %v3698_v36, 0.0  ;;  %v3690_v22 = vadd.f32 %v3685_v7, %v3625_v9  ;;  %vm3700_vm0 = vcmp.gt.f32.partialorder %v3698_v36, 0.0 }
 0x620   :  { %v5236_v34 = vpop.f32.mrf.mxu0 }
 0x621   :  { %v3704_v3 = vmul.f32 1.442695, %v3702_v29  ;;  %v3699_v4 = vadd.f32 %v4148_v60, %v3690_v22 }
 0x623   :  { %5500 = vpow2.f32 %v3704_v3  ;;  %v3703_v2 = vmin.f32 %v3699_v4, 0.0  ;;  %vm3701_vm13 = vcmp.gt.f32.partialorder %v3699_v4, 0.0 }
 0x625   :  { %v3706_v28 = vmul.f32 1.442695, %v3703_v2 }
 0x627   :  { %5502 = vpow2.f32 %v3706_v28 }
 0x630   :  { %v5501_v5 = vpop.eup %5500 }
 0x631   :  { %v4149_v57 = vadd.f32 -1.0, %v5501_v5 }
 0x633   :  { %v3710_v33 = vsel %vm3700_vm0, %v3698_v36, %v4149_v57 }
 0x634   :  { %v5503_v39 = vpop.eup %5502 }
 0x635   :  { %v4150_v52 = vadd.f32 -1.0, %v5503_v39 }
 0x637   :  { %v3711_v25 = vsel %vm3701_vm13, %v3699_v4, %v4150_v52 }
 0x638   :  { %v3712_v62 = vpack.c.bf16 %v3711_v25, %v3710_v33 }
 0x63a   :  { %5242 = vmatmul.mubr.msk.bf16.vlgmr.msra.gmra.mxu1 %vm941_vm6, %v3712_v62 }
 0x6fa   :  { %v3773_v20 = vpop.f32.mrf.mxu1 }
 0x6fb   :  { %v3774_v46 = vadd.f32 %v4151_v30, %v3773_v20 }
 0x6fc   :  { %v5243_v42 = vpop.f32.mrf.mxu1 }
 0x6fd   :  { %3781 = vst.msk [vmem:[%s7772_s11] sm:$0xff] %vm3780_vm14, %v3774_v46 }
 0x6fe   :  { %v3776_v41 = vpop.f32.mrf.mxu1 }
 0x6ff   :  { %v3777_v16 = vadd.f32 %v4151_v30, %v3776_v41 }
 0x700   :  { %v5244_v55 = vpop.f32.mrf.mxu1 }
 0x701   :  { %3782 = vst.msk [vmem:[%s7772_s11 + $0x8] sm:$0xff] %vm3780_vm14, %v3777_v16 }
 0x702   :  { %3787 = vsyncpa [#allocation3], 1 }
 0x703   :  { %3788 = vsyncpa [#allocation5], 1 }

</bundles_post_ra>
